<compile_context>
chip_gen: v5e
topology: v5e:2x2
jax: 0.10.0
libtpu: 0.0.40
codegen_flags: <defaults>
</compile_context>

<pallas_src>
import jax
import jax.numpy as jnp
from jax import lax
from jax.experimental import pallas as pl
from jax.experimental.pallas import tpu as pltpu

H, W = 8, 90          # 8 * 90 = 720 features feeding fc1
WP = 128              # width zero-padded to a full lane dimension
HIDDEN = 60
HIDP = 64             # fc1 hidden zero-padded to 64 lanes
N_CONV = 5
FLATP = H * WP        # 1024 zero-padded flat features per image


def _cdiv(a, b):
    return -(-a // b)


def _round_up(n, m):
    return _cdiv(n, m) * m


def net5_kernel(x_ref, cw_ref, cb_ref, w1_ref, b1_ref, w2_ref, b2_ref,
                out_ref, conv_ref):
    # x_ref   : (8, Bt, 128) VMEM  image row r -> x_ref[r]; batch on sublanes,
    #                              width on lanes; columns >= 90 are zero.
    # cw_ref  : (45,)  SMEM        conv taps, [conv, 3x3 row-major] flattened.
    # cb_ref  : (5,)   SMEM        conv biases.
    # w1_ref  : (1024, 64) VMEM    fc1 weight (720,60) re-laid-out + zero-padded.
    # b1_ref  : (1, 64) VMEM
    # w2_ref  : (1, 64) VMEM       fc2 weight (60,1) as a zero-padded row.
    # b2_ref  : (1,)   SMEM
    # out_ref : (1, 1, Bt) VMEM    lane-dense output (batch on lanes).
    # conv_ref: (Bt, 1024) VMEM    scratch: masked conv5 output, flat per image.
    bt = x_ref.shape[1]
    sb = 16 if bt % 16 == 0 else 8        # sub-slab size (bounds the live set)
    n_sub = bt // sb

    # Re-zeros the padded columns (>= 90) after every conv so the lane-roll
    # wrap-around keeps injecting exact zero padding (do NOT remove).
    col = lax.broadcasted_iota(jnp.int32, (1, WP), 1)
    col_mask = (col < W).astype(jnp.float32)            # (1, 128)

    @pl.loop(0, n_sub)
    def _(s):
        off = pl.multiple_of(s * sb, sb)
        rows = [x_ref[r, pl.ds(off, sb), :] for r in range(H)]   # H x (sb, 128)

        # 5 chained 3x3 "SAME" convolutions; ReLU on the *input* of conv2..conv5
        # (matches x = convN(relu(x)) in the PyTorch forward).
        for c in range(N_CONV):
            if c > 0:
                rows = [jnp.maximum(r, 0.0) for r in rows]
            k = [cw_ref[c * 9 + t] for t in range(9)]
            bias = cb_ref[c]
            acc = [None] * H
            # Per-source-row accumulation: each source row's two lane rolls are
            # computed once and scattered into the <=3 output rows they feed,
            # keeping only ~18 (sb,128) arrays live (fits the 64-vreg file).
            for si in range(H):
                ctr = rows[si]
                lft = pltpu.roll(ctr, shift=1, axis=1)        # lft[j] = ctr[j-1]
                rgt = pltpu.roll(ctr, shift=WP - 1, axis=1)   # rgt[j] = ctr[j+1]
                for di in range(3):
                    oi = si + 1 - di          # output row fed via kernel row di
                    if 0 <= oi < H:           # static zero-padding at top/bottom
                        t = (k[di * 3 + 0] * lft + k[di * 3 + 1] * ctr
                             + k[di * 3 + 2] * rgt)
                        acc[oi] = t if acc[oi] is None else acc[oi] + t
            rows = [(a + bias) * col_mask for a in acc]

        # Stash conv5 output (no ReLU before the flatten, like PyTorch) into the
        # flat scratch so fc1 is a single matmul.  Lane offsets are 128-aligned.
        for r in range(H):
            conv_ref[pl.ds(off, sb), pl.ds(r * WP, WP)] = rows[r]

    # fc1: one (Bt,1024)@(1024,64) MXU matmul (padded rows/lanes of W1 are zero).
    h = jnp.dot(conv_ref[...], w1_ref[...], preferred_element_type=jnp.float32)
    h = jnp.maximum(h + b1_ref[...], 0.0)                 # (Bt, 64)

    # fc2: broadcast multiply + lane reduce (avoids an N=1 MXU matmul); emit the
    # result lane-dense with batch on lanes.
    y = jnp.sum(h * w2_ref[...], axis=-1) + b2_ref[0]     # (Bt,)
    out_ref[...] = y.reshape(1, 1, bt)


def net5_forward(x, params, *, block_b=256):
    """x: (B, 1, 8, 90) float32 (NCHW, like PyTorch).  Returns (B, 1)."""
    cw, cb, w1, b1, w2, b2 = params
    B = x.shape[0]
    xs = x.reshape(B, H, W).astype(jnp.float32)           # squeeze the channel

    # Batch-tile selection (perf review):
    #  * never round the padded batch up to an extra full tile,
    #  * use >=2 grid steps when feasible so v7x shards tiles over its 2 TCs.
    n_tiles = _cdiv(B, block_b)
    if n_tiles == 1 and B > 8:
        n_tiles = 2
    bt = _round_up(_cdiv(B, n_tiles), 8)                   # multiple of 8
    bpad = n_tiles * bt

    # (H, Bpad, 128): image rows major, batch on sublanes, width zero-padded on
    # lanes (zero lanes make the in-kernel roll wrap-around exact).
    # TODO(synk): producing activations upstream already in this layout would
    # remove one extra HBM round trip of wrapper-side transpose/pad.
    xt = jnp.pad(jnp.transpose(xs, (1, 0, 2)),
                 ((0, 0), (0, bpad - B), (0, WP - W)))

    cw_flat = cw.reshape(N_CONV * 9).astype(jnp.float32)   # 1D SMEM (no 2D pad)
    cb_1d = cb.astype(jnp.float32)
    w1p = jnp.zeros((H, WP, HIDP), jnp.float32)
    w1p = w1p.at[:, :W, :HIDDEN].set(w1.reshape(H, W, HIDDEN).astype(jnp.float32))
    w1p = w1p.reshape(FLATP, HIDP)
    b1p = jnp.zeros((1, HIDP), jnp.float32).at[0, :HIDDEN].set(b1.astype(jnp.float32))
    w2p = jnp.zeros((1, HIDP), jnp.float32).at[0, :HIDDEN].set(w2[:, 0].astype(jnp.float32))
    b2s = b2.reshape(1).astype(jnp.float32)

    out = pl.pallas_call(
        net5_kernel,
        out_shape=jax.ShapeDtypeStruct((n_tiles, 1, bt), jnp.float32),
        grid_spec=pltpu.PrefetchScalarGridSpec(
            num_scalar_prefetch=0,
            grid=(n_tiles,),
            in_specs=[
                pl.BlockSpec((H, bt, WP), lambda b: (0, b, 0)),
                pl.BlockSpec((N_CONV * 9,), lambda b: (0,),
                             memory_space=pltpu.MemorySpace.SMEM),
                pl.BlockSpec((N_CONV,), lambda b: (0,),
                             memory_space=pltpu.MemorySpace.SMEM),
                pl.BlockSpec((FLATP, HIDP), lambda b: (0, 0)),
                pl.BlockSpec((1, HIDP), lambda b: (0, 0)),
                pl.BlockSpec((1, HIDP), lambda b: (0, 0)),
                pl.BlockSpec((1,), lambda b: (0,),
                             memory_space=pltpu.MemorySpace.SMEM),
            ],
            out_specs=pl.BlockSpec((1, 1, bt), lambda b: (b, 0, 0)),
            scratch_shapes=[pltpu.VMEM((bt, FLATP), jnp.float32)],
        ),
        compiler_params=pltpu.CompilerParams(
            dimension_semantics=("parallel",),   # batch tiles shard across TCs
            vmem_limit_bytes=32 * 1024 * 1024),
    )(xt, cw_flat, cb_1d, w1p, b1p, w2p, b2s)
    return out.reshape(bpad)[:B].reshape(B, 1)


def ref_forward(x, params):
    """Pure-JAX reference matching the PyTorch forward exactly."""
    cw, cb, w1, b1, w2, b2 = params
    out = x  # (B, 1, 8, 90)
    for c in range(N_CONV):
        if c > 0:
            out = jnp.maximum(out, 0.0)
        kern = cw[c].reshape(1, 1, 3, 3)
        out = lax.conv_general_dilated(
            out, kern, window_strides=(1, 1), padding="SAME",
            dimension_numbers=("NCHW", "OIHW", "NCHW")) + cb[c]
    flat = out.reshape(out.shape[0], H * W)
    h = jnp.maximum(flat @ w1 + b1, 0.0)
    return h @ w2 + b2


def init_params(key):
    ks = jax.random.split(key, 6)
    def u(k, shape, scale):
        return (jax.random.uniform(k, shape, jnp.float32) * 2.0 - 1.0) * scale
    cw = u(ks[0], (N_CONV, 3, 3), 1.0 / 3.0)                 # conv1..conv5 (1,1,3,3)
    cb = u(ks[1], (N_CONV,), 1.0 / 3.0)
    w1 = u(ks[2], (H * W, HIDDEN), 1.0 / jnp.sqrt(720.0))    # fc1.weight.T  (720, 60)
    b1 = u(ks[3], (HIDDEN,), 1.0 / jnp.sqrt(720.0))
    w2 = u(ks[4], (HIDDEN, 1), 1.0 / jnp.sqrt(60.0))         # fc2.weight.T  (60, 1)
    b2 = u(ks[5], (1,), 1.0 / jnp.sqrt(60.0))
    return (cw, cb, w1, b1, w2, b2)


if __name__ == "__main__":
    key = jax.random.PRNGKey(0)
    k_param, k_x, k_x2 = jax.random.split(key, 3)
    params = init_params(k_param)

    # Primary small-shape check (single tile, single sub-slab).
    B = 2
    x = jax.random.normal(k_x, (B, 1, H, W), jnp.float32)    # NCHW like PyTorch
    y_kernel = jax.block_until_ready(net5_forward(x, params))
    y_ref = jax.block_until_ready(ref_forward(x, params))
    assert y_kernel.shape == (B, 1)
    assert jnp.allclose(y_kernel, y_ref, atol=1e-3, rtol=1e-3), (y_kernel, y_ref)

    # Secondary check exercising the multi-tile grid and the in-kernel
    # sub-slab loop (n_tiles=2, bt=32, two sub-slabs of 16).
    B2 = 64
    x2 = jax.random.normal(k_x2, (B2, 1, H, W), jnp.float32)
    y2_kernel = jax.block_until_ready(net5_forward(x2, params))
    y2_ref = jax.block_until_ready(ref_forward(x2, params))
    assert y2_kernel.shape == (B2, 1)
    assert jnp.allclose(y2_kernel, y2_ref, atol=1e-3, rtol=1e-3)

    print("KERNEL_OK")
</pallas_src>

<mosaic_0001>
module attributes {stable_mosaic.version = 11 : i64} {
  func.func @net5_kernel(%arg0: i32, %arg1: memref<8x8x128xf32, #tpu.memory_space<vmem>>, %arg2: memref<45xf32, #tpu.memory_space<smem>>, %arg3: memref<5xf32, #tpu.memory_space<smem>>, %arg4: memref<1024x64xf32, #tpu.memory_space<vmem>>, %arg5: memref<1x64xf32, #tpu.memory_space<vmem>>, %arg6: memref<1x64xf32, #tpu.memory_space<vmem>>, %arg7: memref<1xf32, #tpu.memory_space<smem>>, %arg8: memref<1x1x8xf32, #tpu.memory_space<vmem>>, %arg9: memref<8x1024xf32, #tpu.memory_space<vmem>>) attributes {dimension_semantics = [#tpu.dimension_semantics<parallel>], iteration_bounds = array<i64: 1>, scalar_prefetch = 0 : i64, scratch_operands = 1 : i64, tpu.core_type = #tpu.core_type<tc>, window_params = [{transform_indices = @transform_0, window_bounds = array<i64: 8, 8, 128>}, {transform_indices = @transform_1, window_bounds = array<i64: 45>}, {transform_indices = @transform_2, window_bounds = array<i64: 5>}, {pipeline_mode = #tpu.pipeline_mode<synchronous>, transform_indices = @transform_3, window_bounds = array<i64: 1024, 64>}, {pipeline_mode = #tpu.pipeline_mode<synchronous>, transform_indices = @transform_4, window_bounds = array<i64: 1, 64>}, {pipeline_mode = #tpu.pipeline_mode<synchronous>, transform_indices = @transform_5, window_bounds = array<i64: 1, 64>}, {transform_indices = @transform_6, window_bounds = array<i64: 1>}, {transform_indices = @transform_7, window_bounds = array<i64: 1, 1, 8>}]} {
    %0 = tpu.iota {dimensions = array<i32: 1>} : vector<1x128xi32>
    %c90_i32 = arith.constant 90 : i32
    %1 = vector.broadcast %c90_i32 : i32 to vector<1x128xi32>
    %2 = arith.cmpi slt, %0, %1 : vector<1x128xi32>
    %3 = arith.extui %2 : vector<1x128xi1> to vector<1x128xi32>
    %4 = arith.sitofp %3 : vector<1x128xi32> to vector<1x128xf32>
    %c0_i32 = arith.constant 0 : i32
    %c1_i32 = arith.constant 1 : i32
    %5 = arith.muli %c0_i32, %c1_i32 : i32
    %c0_i32_0 = arith.constant 0 : i32
    %6 = arith.addi %c0_i32_0, %5 : i32
    %c8_i32 = arith.constant 8 : i32
    %7 = arith.muli %6, %c8_i32 : i32
    %8 = tpu.assume_multiple %7, 8 : i32
    %c0 = arith.constant 0 : index
    %9 = arith.index_cast %8 : i32 to index
    %c0_1 = arith.constant 0 : index
    %10 = vector.load %arg1[%c0, %9, %c0_1] : memref<8x8x128xf32, #tpu.memory_space<vmem>>, vector<1x8x128xf32>
    %11 = vector.shape_cast %10 : vector<1x8x128xf32> to vector<8x128xf32>
    %c1 = arith.constant 1 : index
    %12 = arith.index_cast %8 : i32 to index
    %c0_2 = arith.constant 0 : index
    %13 = vector.load %arg1[%c1, %12, %c0_2] : memref<8x8x128xf32, #tpu.memory_space<vmem>>, vector<1x8x128xf32>
    %14 = vector.shape_cast %13 : vector<1x8x128xf32> to vector<8x128xf32>
    %c2 = arith.constant 2 : index
    %15 = arith.index_cast %8 : i32 to index
    %c0_3 = arith.constant 0 : index
    %16 = vector.load %arg1[%c2, %15, %c0_3] : memref<8x8x128xf32, #tpu.memory_space<vmem>>, vector<1x8x128xf32>
    %17 = vector.shape_cast %16 : vector<1x8x128xf32> to vector<8x128xf32>
    %c3 = arith.constant 3 : index
    %18 = arith.index_cast %8 : i32 to index
    %c0_4 = arith.constant 0 : index
    %19 = vector.load %arg1[%c3, %18, %c0_4] : memref<8x8x128xf32, #tpu.memory_space<vmem>>, vector<1x8x128xf32>
    %20 = vector.shape_cast %19 : vector<1x8x128xf32> to vector<8x128xf32>
    %c4 = arith.constant 4 : index
    %21 = arith.index_cast %8 : i32 to index
    %c0_5 = arith.constant 0 : index
    %22 = vector.load %arg1[%c4, %21, %c0_5] : memref<8x8x128xf32, #tpu.memory_space<vmem>>, vector<1x8x128xf32>
    %23 = vector.shape_cast %22 : vector<1x8x128xf32> to vector<8x128xf32>
    %c5 = arith.constant 5 : index
    %24 = arith.index_cast %8 : i32 to index
    %c0_6 = arith.constant 0 : index
    %25 = vector.load %arg1[%c5, %24, %c0_6] : memref<8x8x128xf32, #tpu.memory_space<vmem>>, vector<1x8x128xf32>
    %26 = vector.shape_cast %25 : vector<1x8x128xf32> to vector<8x128xf32>
    %c6 = arith.constant 6 : index
    %27 = arith.index_cast %8 : i32 to index
    %c0_7 = arith.constant 0 : index
    %28 = vector.load %arg1[%c6, %27, %c0_7] : memref<8x8x128xf32, #tpu.memory_space<vmem>>, vector<1x8x128xf32>
    %29 = vector.shape_cast %28 : vector<1x8x128xf32> to vector<8x128xf32>
    %c7 = arith.constant 7 : index
    %30 = arith.index_cast %8 : i32 to index
    %c0_8 = arith.constant 0 : index
    %31 = vector.load %arg1[%c7, %30, %c0_8] : memref<8x8x128xf32, #tpu.memory_space<vmem>>, vector<1x8x128xf32>
    %32 = vector.shape_cast %31 : vector<1x8x128xf32> to vector<8x128xf32>
    %c0_9 = arith.constant 0 : index
    %33 = memref.load %arg2[%c0_9] : memref<45xf32, #tpu.memory_space<smem>>
    %c1_10 = arith.constant 1 : index
    %34 = memref.load %arg2[%c1_10] : memref<45xf32, #tpu.memory_space<smem>>
    %c2_11 = arith.constant 2 : index
    %35 = memref.load %arg2[%c2_11] : memref<45xf32, #tpu.memory_space<smem>>
    %c3_12 = arith.constant 3 : index
    %36 = memref.load %arg2[%c3_12] : memref<45xf32, #tpu.memory_space<smem>>
    %c4_13 = arith.constant 4 : index
    %37 = memref.load %arg2[%c4_13] : memref<45xf32, #tpu.memory_space<smem>>
    %c5_14 = arith.constant 5 : index
    %38 = memref.load %arg2[%c5_14] : memref<45xf32, #tpu.memory_space<smem>>
    %c6_15 = arith.constant 6 : index
    %39 = memref.load %arg2[%c6_15] : memref<45xf32, #tpu.memory_space<smem>>
    %c7_16 = arith.constant 7 : index
    %40 = memref.load %arg2[%c7_16] : memref<45xf32, #tpu.memory_space<smem>>
    %c8 = arith.constant 8 : index
    %41 = memref.load %arg2[%c8] : memref<45xf32, #tpu.memory_space<smem>>
    %c0_17 = arith.constant 0 : index
    %42 = memref.load %arg3[%c0_17] : memref<5xf32, #tpu.memory_space<smem>>
    %c1_i32_18 = arith.constant 1 : i32
    %43 = tpu.dynamic_rotate %11 by %c1_i32_18 dim 1 : vector<8x128xf32>, i32 -> vector<8x128xf32>
    %c127_i32 = arith.constant 127 : i32
    %44 = tpu.dynamic_rotate %11 by %c127_i32 dim 1 : vector<8x128xf32>, i32 -> vector<8x128xf32>
    %45 = vector.broadcast %33 : f32 to vector<8x128xf32>
    %46 = arith.mulf %45, %43 : vector<8x128xf32>
    %47 = vector.broadcast %34 : f32 to vector<8x128xf32>
    %48 = arith.mulf %47, %11 : vector<8x128xf32>
    %49 = arith.addf %46, %48 : vector<8x128xf32>
    %50 = vector.broadcast %35 : f32 to vector<8x128xf32>
    %51 = arith.mulf %50, %44 : vector<8x128xf32>
    %52 = arith.addf %49, %51 : vector<8x128xf32>
    %53 = vector.broadcast %36 : f32 to vector<8x128xf32>
    %54 = arith.mulf %53, %43 : vector<8x128xf32>
    %55 = vector.broadcast %37 : f32 to vector<8x128xf32>
    %56 = arith.mulf %55, %11 : vector<8x128xf32>
    %57 = arith.addf %54, %56 : vector<8x128xf32>
    %58 = vector.broadcast %38 : f32 to vector<8x128xf32>
    %59 = arith.mulf %58, %44 : vector<8x128xf32>
    %60 = arith.addf %57, %59 : vector<8x128xf32>
    %c1_i32_19 = arith.constant 1 : i32
    %61 = tpu.dynamic_rotate %14 by %c1_i32_19 dim 1 : vector<8x128xf32>, i32 -> vector<8x128xf32>
    %c127_i32_20 = arith.constant 127 : i32
    %62 = tpu.dynamic_rotate %14 by %c127_i32_20 dim 1 : vector<8x128xf32>, i32 -> vector<8x128xf32>
    %63 = vector.broadcast %33 : f32 to vector<8x128xf32>
    %64 = arith.mulf %63, %61 : vector<8x128xf32>
    %65 = vector.broadcast %34 : f32 to vector<8x128xf32>
    %66 = arith.mulf %65, %14 : vector<8x128xf32>
    %67 = arith.addf %64, %66 : vector<8x128xf32>
    %68 = vector.broadcast %35 : f32 to vector<8x128xf32>
    %69 = arith.mulf %68, %62 : vector<8x128xf32>
    %70 = arith.addf %67, %69 : vector<8x128xf32>
    %71 = vector.broadcast %36 : f32 to vector<8x128xf32>
    %72 = arith.mulf %71, %61 : vector<8x128xf32>
    %73 = vector.broadcast %37 : f32 to vector<8x128xf32>
    %74 = arith.mulf %73, %14 : vector<8x128xf32>
    %75 = arith.addf %72, %74 : vector<8x128xf32>
    %76 = vector.broadcast %38 : f32 to vector<8x128xf32>
    %77 = arith.mulf %76, %62 : vector<8x128xf32>
    %78 = arith.addf %75, %77 : vector<8x128xf32>
    %79 = arith.addf %52, %78 : vector<8x128xf32>
    %80 = vector.broadcast %39 : f32 to vector<8x128xf32>
    %81 = arith.mulf %80, %61 : vector<8x128xf32>
    %82 = vector.broadcast %40 : f32 to vector<8x128xf32>
    %83 = arith.mulf %82, %14 : vector<8x128xf32>
    %84 = arith.addf %81, %83 : vector<8x128xf32>
    %85 = vector.broadcast %41 : f32 to vector<8x128xf32>
    %86 = arith.mulf %85, %62 : vector<8x128xf32>
    %87 = arith.addf %84, %86 : vector<8x128xf32>
    %88 = arith.addf %60, %87 : vector<8x128xf32>
    %c1_i32_21 = arith.constant 1 : i32
    %89 = tpu.dynamic_rotate %17 by %c1_i32_21 dim 1 : vector<8x128xf32>, i32 -> vector<8x128xf32>
    %c127_i32_22 = arith.constant 127 : i32
    %90 = tpu.dynamic_rotate %17 by %c127_i32_22 dim 1 : vector<8x128xf32>, i32 -> vector<8x128xf32>
    %91 = vector.broadcast %33 : f32 to vector<8x128xf32>
    %92 = arith.mulf %91, %89 : vector<8x128xf32>
    %93 = vector.broadcast %34 : f32 to vector<8x128xf32>
    %94 = arith.mulf %93, %17 : vector<8x128xf32>
    %95 = arith.addf %92, %94 : vector<8x128xf32>
    %96 = vector.broadcast %35 : f32 to vector<8x128xf32>
    %97 = arith.mulf %96, %90 : vector<8x128xf32>
    %98 = arith.addf %95, %97 : vector<8x128xf32>
    %99 = vector.broadcast %36 : f32 to vector<8x128xf32>
    %100 = arith.mulf %99, %89 : vector<8x128xf32>
    %101 = vector.broadcast %37 : f32 to vector<8x128xf32>
    %102 = arith.mulf %101, %17 : vector<8x128xf32>
    %103 = arith.addf %100, %102 : vector<8x128xf32>
    %104 = vector.broadcast %38 : f32 to vector<8x128xf32>
    %105 = arith.mulf %104, %90 : vector<8x128xf32>
    %106 = arith.addf %103, %105 : vector<8x128xf32>
    %107 = arith.addf %70, %106 : vector<8x128xf32>
    %108 = vector.broadcast %39 : f32 to vector<8x128xf32>
    %109 = arith.mulf %108, %89 : vector<8x128xf32>
    %110 = vector.broadcast %40 : f32 to vector<8x128xf32>
    %111 = arith.mulf %110, %17 : vector<8x128xf32>
    %112 = arith.addf %109, %111 : vector<8x128xf32>
    %113 = vector.broadcast %41 : f32 to vector<8x128xf32>
    %114 = arith.mulf %113, %90 : vector<8x128xf32>
    %115 = arith.addf %112, %114 : vector<8x128xf32>
    %116 = arith.addf %79, %115 : vector<8x128xf32>
    %c1_i32_23 = arith.constant 1 : i32
    %117 = tpu.dynamic_rotate %20 by %c1_i32_23 dim 1 : vector<8x128xf32>, i32 -> vector<8x128xf32>
    %c127_i32_24 = arith.constant 127 : i32
    %118 = tpu.dynamic_rotate %20 by %c127_i32_24 dim 1 : vector<8x128xf32>, i32 -> vector<8x128xf32>
    %119 = vector.broadcast %33 : f32 to vector<8x128xf32>
    %120 = arith.mulf %119, %117 : vector<8x128xf32>
    %121 = vector.broadcast %34 : f32 to vector<8x128xf32>
    %122 = arith.mulf %121, %20 : vector<8x128xf32>
    %123 = arith.addf %120, %122 : vector<8x128xf32>
    %124 = vector.broadcast %35 : f32 to vector<8x128xf32>
    %125 = arith.mulf %124, %118 : vector<8x128xf32>
    %126 = arith.addf %123, %125 : vector<8x128xf32>
    %127 = vector.broadcast %36 : f32 to vector<8x128xf32>
    %128 = arith.mulf %127, %117 : vector<8x128xf32>
    %129 = vector.broadcast %37 : f32 to vector<8x128xf32>
    %130 = arith.mulf %129, %20 : vector<8x128xf32>
    %131 = arith.addf %128, %130 : vector<8x128xf32>
    %132 = vector.broadcast %38 : f32 to vector<8x128xf32>
    %133 = arith.mulf %132, %118 : vector<8x128xf32>
    %134 = arith.addf %131, %133 : vector<8x128xf32>
    %135 = arith.addf %98, %134 : vector<8x128xf32>
    %136 = vector.broadcast %39 : f32 to vector<8x128xf32>
    %137 = arith.mulf %136, %117 : vector<8x128xf32>
    %138 = vector.broadcast %40 : f32 to vector<8x128xf32>
    %139 = arith.mulf %138, %20 : vector<8x128xf32>
    %140 = arith.addf %137, %139 : vector<8x128xf32>
    %141 = vector.broadcast %41 : f32 to vector<8x128xf32>
    %142 = arith.mulf %141, %118 : vector<8x128xf32>
    %143 = arith.addf %140, %142 : vector<8x128xf32>
    %144 = arith.addf %107, %143 : vector<8x128xf32>
    %c1_i32_25 = arith.constant 1 : i32
    %145 = tpu.dynamic_rotate %23 by %c1_i32_25 dim 1 : vector<8x128xf32>, i32 -> vector<8x128xf32>
    %c127_i32_26 = arith.constant 127 : i32
    %146 = tpu.dynamic_rotate %23 by %c127_i32_26 dim 1 : vector<8x128xf32>, i32 -> vector<8x128xf32>
    %147 = vector.broadcast %33 : f32 to vector<8x128xf32>
    %148 = arith.mulf %147, %145 : vector<8x128xf32>
    %149 = vector.broadcast %34 : f32 to vector<8x128xf32>
    %150 = arith.mulf %149, %23 : vector<8x128xf32>
    %151 = arith.addf %148, %150 : vector<8x128xf32>
    %152 = vector.broadcast %35 : f32 to vector<8x128xf32>
    %153 = arith.mulf %152, %146 : vector<8x128xf32>
    %154 = arith.addf %151, %153 : vector<8x128xf32>
    %155 = vector.broadcast %36 : f32 to vector<8x128xf32>
    %156 = arith.mulf %155, %145 : vector<8x128xf32>
    %157 = vector.broadcast %37 : f32 to vector<8x128xf32>
    %158 = arith.mulf %157, %23 : vector<8x128xf32>
    %159 = arith.addf %156, %158 : vector<8x128xf32>
    %160 = vector.broadcast %38 : f32 to vector<8x128xf32>
    %161 = arith.mulf %160, %146 : vector<8x128xf32>
    %162 = arith.addf %159, %161 : vector<8x128xf32>
    %163 = arith.addf %126, %162 : vector<8x128xf32>
    %164 = vector.broadcast %39 : f32 to vector<8x128xf32>
    %165 = arith.mulf %164, %145 : vector<8x128xf32>
    %166 = vector.broadcast %40 : f32 to vector<8x128xf32>
    %167 = arith.mulf %166, %23 : vector<8x128xf32>
    %168 = arith.addf %165, %167 : vector<8x128xf32>
    %169 = vector.broadcast %41 : f32 to vector<8x128xf32>
    %170 = arith.mulf %169, %146 : vector<8x128xf32>
    %171 = arith.addf %168, %170 : vector<8x128xf32>
    %172 = arith.addf %135, %171 : vector<8x128xf32>
    %c1_i32_27 = arith.constant 1 : i32
    %173 = tpu.dynamic_rotate %26 by %c1_i32_27 dim 1 : vector<8x128xf32>, i32 -> vector<8x128xf32>
    %c127_i32_28 = arith.constant 127 : i32
    %174 = tpu.dynamic_rotate %26 by %c127_i32_28 dim 1 : vector<8x128xf32>, i32 -> vector<8x128xf32>
    %175 = vector.broadcast %33 : f32 to vector<8x128xf32>
    %176 = arith.mulf %175, %173 : vector<8x128xf32>
    %177 = vector.broadcast %34 : f32 to vector<8x128xf32>
    %178 = arith.mulf %177, %26 : vector<8x128xf32>
    %179 = arith.addf %176, %178 : vector<8x128xf32>
    %180 = vector.broadcast %35 : f32 to vector<8x128xf32>
    %181 = arith.mulf %180, %174 : vector<8x128xf32>
    %182 = arith.addf %179, %181 : vector<8x128xf32>
    %183 = vector.broadcast %36 : f32 to vector<8x128xf32>
    %184 = arith.mulf %183, %173 : vector<8x128xf32>
    %185 = vector.broadcast %37 : f32 to vector<8x128xf32>
    %186 = arith.mulf %185, %26 : vector<8x128xf32>
    %187 = arith.addf %184, %186 : vector<8x128xf32>
    %188 = vector.broadcast %38 : f32 to vector<8x128xf32>
    %189 = arith.mulf %188, %174 : vector<8x128xf32>
    %190 = arith.addf %187, %189 : vector<8x128xf32>
    %191 = arith.addf %154, %190 : vector<8x128xf32>
    %192 = vector.broadcast %39 : f32 to vector<8x128xf32>
    %193 = arith.mulf %192, %173 : vector<8x128xf32>
    %194 = vector.broadcast %40 : f32 to vector<8x128xf32>
    %195 = arith.mulf %194, %26 : vector<8x128xf32>
    %196 = arith.addf %193, %195 : vector<8x128xf32>
    %197 = vector.broadcast %41 : f32 to vector<8x128xf32>
    %198 = arith.mulf %197, %174 : vector<8x128xf32>
    %199 = arith.addf %196, %198 : vector<8x128xf32>
    %200 = arith.addf %163, %199 : vector<8x128xf32>
    %c1_i32_29 = arith.constant 1 : i32
    %201 = tpu.dynamic_rotate %29 by %c1_i32_29 dim 1 : vector<8x128xf32>, i32 -> vector<8x128xf32>
    %c127_i32_30 = arith.constant 127 : i32
    %202 = tpu.dynamic_rotate %29 by %c127_i32_30 dim 1 : vector<8x128xf32>, i32 -> vector<8x128xf32>
    %203 = vector.broadcast %33 : f32 to vector<8x128xf32>
    %204 = arith.mulf %203, %201 : vector<8x128xf32>
    %205 = vector.broadcast %34 : f32 to vector<8x128xf32>
    %206 = arith.mulf %205, %29 : vector<8x128xf32>
    %207 = arith.addf %204, %206 : vector<8x128xf32>
    %208 = vector.broadcast %35 : f32 to vector<8x128xf32>
    %209 = arith.mulf %208, %202 : vector<8x128xf32>
    %210 = arith.addf %207, %209 : vector<8x128xf32>
    %211 = vector.broadcast %36 : f32 to vector<8x128xf32>
    %212 = arith.mulf %211, %201 : vector<8x128xf32>
    %213 = vector.broadcast %37 : f32 to vector<8x128xf32>
    %214 = arith.mulf %213, %29 : vector<8x128xf32>
    %215 = arith.addf %212, %214 : vector<8x128xf32>
    %216 = vector.broadcast %38 : f32 to vector<8x128xf32>
    %217 = arith.mulf %216, %202 : vector<8x128xf32>
    %218 = arith.addf %215, %217 : vector<8x128xf32>
    %219 = arith.addf %182, %218 : vector<8x128xf32>
    %220 = vector.broadcast %39 : f32 to vector<8x128xf32>
    %221 = arith.mulf %220, %201 : vector<8x128xf32>
    %222 = vector.broadcast %40 : f32 to vector<8x128xf32>
    %223 = arith.mulf %222, %29 : vector<8x128xf32>
    %224 = arith.addf %221, %223 : vector<8x128xf32>
    %225 = vector.broadcast %41 : f32 to vector<8x128xf32>
    %226 = arith.mulf %225, %202 : vector<8x128xf32>
    %227 = arith.addf %224, %226 : vector<8x128xf32>
    %228 = arith.addf %191, %227 : vector<8x128xf32>
    %c1_i32_31 = arith.constant 1 : i32
    %229 = tpu.dynamic_rotate %32 by %c1_i32_31 dim 1 : vector<8x128xf32>, i32 -> vector<8x128xf32>
    %c127_i32_32 = arith.constant 127 : i32
    %230 = tpu.dynamic_rotate %32 by %c127_i32_32 dim 1 : vector<8x128xf32>, i32 -> vector<8x128xf32>
    %231 = vector.broadcast %36 : f32 to vector<8x128xf32>
    %232 = arith.mulf %231, %229 : vector<8x128xf32>
    %233 = vector.broadcast %37 : f32 to vector<8x128xf32>
    %234 = arith.mulf %233, %32 : vector<8x128xf32>
    %235 = arith.addf %232, %234 : vector<8x128xf32>
    %236 = vector.broadcast %38 : f32 to vector<8x128xf32>
    %237 = arith.mulf %236, %230 : vector<8x128xf32>
    %238 = arith.addf %235, %237 : vector<8x128xf32>
    %239 = arith.addf %210, %238 : vector<8x128xf32>
    %240 = vector.broadcast %39 : f32 to vector<8x128xf32>
    %241 = arith.mulf %240, %229 : vector<8x128xf32>
    %242 = vector.broadcast %40 : f32 to vector<8x128xf32>
    %243 = arith.mulf %242, %32 : vector<8x128xf32>
    %244 = arith.addf %241, %243 : vector<8x128xf32>
    %245 = vector.broadcast %41 : f32 to vector<8x128xf32>
    %246 = arith.mulf %245, %230 : vector<8x128xf32>
    %247 = arith.addf %244, %246 : vector<8x128xf32>
    %248 = arith.addf %219, %247 : vector<8x128xf32>
    %249 = vector.broadcast %42 : f32 to vector<8x128xf32>
    %250 = arith.addf %88, %249 : vector<8x128xf32>
    %251 = vector.broadcast %4 : vector<1x128xf32> to vector<8x128xf32>
    %252 = arith.mulf %250, %251 : vector<8x128xf32>
    %253 = vector.broadcast %42 : f32 to vector<8x128xf32>
    %254 = arith.addf %116, %253 : vector<8x128xf32>
    %255 = vector.broadcast %4 : vector<1x128xf32> to vector<8x128xf32>
    %256 = arith.mulf %254, %255 : vector<8x128xf32>
    %257 = vector.broadcast %42 : f32 to vector<8x128xf32>
    %258 = arith.addf %144, %257 : vector<8x128xf32>
    %259 = vector.broadcast %4 : vector<1x128xf32> to vector<8x128xf32>
    %260 = arith.mulf %258, %259 : vector<8x128xf32>
    %261 = vector.broadcast %42 : f32 to vector<8x128xf32>
    %262 = arith.addf %172, %261 : vector<8x128xf32>
    %263 = vector.broadcast %4 : vector<1x128xf32> to vector<8x128xf32>
    %264 = arith.mulf %262, %263 : vector<8x128xf32>
    %265 = vector.broadcast %42 : f32 to vector<8x128xf32>
    %266 = arith.addf %200, %265 : vector<8x128xf32>
    %267 = vector.broadcast %4 : vector<1x128xf32> to vector<8x128xf32>
    %268 = arith.mulf %266, %267 : vector<8x128xf32>
    %269 = vector.broadcast %42 : f32 to vector<8x128xf32>
    %270 = arith.addf %228, %269 : vector<8x128xf32>
    %271 = vector.broadcast %4 : vector<1x128xf32> to vector<8x128xf32>
    %272 = arith.mulf %270, %271 : vector<8x128xf32>
    %273 = vector.broadcast %42 : f32 to vector<8x128xf32>
    %274 = arith.addf %248, %273 : vector<8x128xf32>
    %275 = vector.broadcast %4 : vector<1x128xf32> to vector<8x128xf32>
    %276 = arith.mulf %274, %275 : vector<8x128xf32>
    %277 = vector.broadcast %42 : f32 to vector<8x128xf32>
    %278 = arith.addf %239, %277 : vector<8x128xf32>
    %279 = vector.broadcast %4 : vector<1x128xf32> to vector<8x128xf32>
    %280 = arith.mulf %278, %279 : vector<8x128xf32>
    %cst = arith.constant 0.000000e+00 : f32
    %281 = vector.broadcast %cst : f32 to vector<8x128xf32>
    %282 = arith.maximumf %252, %281 : vector<8x128xf32>
    %cst_33 = arith.constant 0.000000e+00 : f32
    %283 = vector.broadcast %cst_33 : f32 to vector<8x128xf32>
    %284 = arith.maximumf %256, %283 : vector<8x128xf32>
    %cst_34 = arith.constant 0.000000e+00 : f32
    %285 = vector.broadcast %cst_34 : f32 to vector<8x128xf32>
    %286 = arith.maximumf %260, %285 : vector<8x128xf32>
    %cst_35 = arith.constant 0.000000e+00 : f32
    %287 = vector.broadcast %cst_35 : f32 to vector<8x128xf32>
    %288 = arith.maximumf %264, %287 : vector<8x128xf32>
    %cst_36 = arith.constant 0.000000e+00 : f32
    %289 = vector.broadcast %cst_36 : f32 to vector<8x128xf32>
    %290 = arith.maximumf %268, %289 : vector<8x128xf32>
    %cst_37 = arith.constant 0.000000e+00 : f32
    %291 = vector.broadcast %cst_37 : f32 to vector<8x128xf32>
    %292 = arith.maximumf %272, %291 : vector<8x128xf32>
    %cst_38 = arith.constant 0.000000e+00 : f32
    %293 = vector.broadcast %cst_38 : f32 to vector<8x128xf32>
    %294 = arith.maximumf %276, %293 : vector<8x128xf32>
    %cst_39 = arith.constant 0.000000e+00 : f32
    %295 = vector.broadcast %cst_39 : f32 to vector<8x128xf32>
    %296 = arith.maximumf %280, %295 : vector<8x128xf32>
    %c9 = arith.constant 9 : index
    %297 = memref.load %arg2[%c9] : memref<45xf32, #tpu.memory_space<smem>>
    %c10 = arith.constant 10 : index
    %298 = memref.load %arg2[%c10] : memref<45xf32, #tpu.memory_space<smem>>
    %c11 = arith.constant 11 : index
    %299 = memref.load %arg2[%c11] : memref<45xf32, #tpu.memory_space<smem>>
    %c12 = arith.constant 12 : index
    %300 = memref.load %arg2[%c12] : memref<45xf32, #tpu.memory_space<smem>>
    %c13 = arith.constant 13 : index
    %301 = memref.load %arg2[%c13] : memref<45xf32, #tpu.memory_space<smem>>
    %c14 = arith.constant 14 : index
    %302 = memref.load %arg2[%c14] : memref<45xf32, #tpu.memory_space<smem>>
    %c15 = arith.constant 15 : index
    %303 = memref.load %arg2[%c15] : memref<45xf32, #tpu.memory_space<smem>>
    %c16 = arith.constant 16 : index
    %304 = memref.load %arg2[%c16] : memref<45xf32, #tpu.memory_space<smem>>
    %c17 = arith.constant 17 : index
    %305 = memref.load %arg2[%c17] : memref<45xf32, #tpu.memory_space<smem>>
    %c1_40 = arith.constant 1 : index
    %306 = memref.load %arg3[%c1_40] : memref<5xf32, #tpu.memory_space<smem>>
    %c1_i32_41 = arith.constant 1 : i32
    %307 = tpu.dynamic_rotate %282 by %c1_i32_41 dim 1 : vector<8x128xf32>, i32 -> vector<8x128xf32>
    %c127_i32_42 = arith.constant 127 : i32
    %308 = tpu.dynamic_rotate %282 by %c127_i32_42 dim 1 : vector<8x128xf32>, i32 -> vector<8x128xf32>
    %309 = vector.broadcast %297 : f32 to vector<8x128xf32>
    %310 = arith.mulf %309, %307 : vector<8x128xf32>
    %311 = vector.broadcast %298 : f32 to vector<8x128xf32>
    %312 = arith.mulf %311, %282 : vector<8x128xf32>
    %313 = arith.addf %310, %312 : vector<8x128xf32>
    %314 = vector.broadcast %299 : f32 to vector<8x128xf32>
    %315 = arith.mulf %314, %308 : vector<8x128xf32>
    %316 = arith.addf %313, %315 : vector<8x128xf32>
    %317 = vector.broadcast %300 : f32 to vector<8x128xf32>
    %318 = arith.mulf %317, %307 : vector<8x128xf32>
    %319 = vector.broadcast %301 : f32 to vector<8x128xf32>
    %320 = arith.mulf %319, %282 : vector<8x128xf32>
    %321 = arith.addf %318, %320 : vector<8x128xf32>
    %322 = vector.broadcast %302 : f32 to vector<8x128xf32>
    %323 = arith.mulf %322, %308 : vector<8x128xf32>
    %324 = arith.addf %321, %323 : vector<8x128xf32>
    %c1_i32_43 = arith.constant 1 : i32
    %325 = tpu.dynamic_rotate %284 by %c1_i32_43 dim 1 : vector<8x128xf32>, i32 -> vector<8x128xf32>
    %c127_i32_44 = arith.constant 127 : i32
    %326 = tpu.dynamic_rotate %284 by %c127_i32_44 dim 1 : vector<8x128xf32>, i32 -> vector<8x128xf32>
    %327 = vector.broadcast %297 : f32 to vector<8x128xf32>
    %328 = arith.mulf %327, %325 : vector<8x128xf32>
    %329 = vector.broadcast %298 : f32 to vector<8x128xf32>
    %330 = arith.mulf %329, %284 : vector<8x128xf32>
    %331 = arith.addf %328, %330 : vector<8x128xf32>
    %332 = vector.broadcast %299 : f32 to vector<8x128xf32>
    %333 = arith.mulf %332, %326 : vector<8x128xf32>
    %334 = arith.addf %331, %333 : vector<8x128xf32>
    %335 = vector.broadcast %300 : f32 to vector<8x128xf32>
    %336 = arith.mulf %335, %325 : vector<8x128xf32>
    %337 = vector.broadcast %301 : f32 to vector<8x128xf32>
    %338 = arith.mulf %337, %284 : vector<8x128xf32>
    %339 = arith.addf %336, %338 : vector<8x128xf32>
    %340 = vector.broadcast %302 : f32 to vector<8x128xf32>
    %341 = arith.mulf %340, %326 : vector<8x128xf32>
    %342 = arith.addf %339, %341 : vector<8x128xf32>
    %343 = arith.addf %316, %342 : vector<8x128xf32>
    %344 = vector.broadcast %303 : f32 to vector<8x128xf32>
    %345 = arith.mulf %344, %325 : vector<8x128xf32>
    %346 = vector.broadcast %304 : f32 to vector<8x128xf32>
    %347 = arith.mulf %346, %284 : vector<8x128xf32>
    %348 = arith.addf %345, %347 : vector<8x128xf32>
    %349 = vector.broadcast %305 : f32 to vector<8x128xf32>
    %350 = arith.mulf %349, %326 : vector<8x128xf32>
    %351 = arith.addf %348, %350 : vector<8x128xf32>
    %352 = arith.addf %324, %351 : vector<8x128xf32>
    %c1_i32_45 = arith.constant 1 : i32
    %353 = tpu.dynamic_rotate %286 by %c1_i32_45 dim 1 : vector<8x128xf32>, i32 -> vector<8x128xf32>
    %c127_i32_46 = arith.constant 127 : i32
    %354 = tpu.dynamic_rotate %286 by %c127_i32_46 dim 1 : vector<8x128xf32>, i32 -> vector<8x128xf32>
    %355 = vector.broadcast %297 : f32 to vector<8x128xf32>
    %356 = arith.mulf %355, %353 : vector<8x128xf32>
    %357 = vector.broadcast %298 : f32 to vector<8x128xf32>
    %358 = arith.mulf %357, %286 : vector<8x128xf32>
    %359 = arith.addf %356, %358 : vector<8x128xf32>
    %360 = vector.broadcast %299 : f32 to vector<8x128xf32>
    %361 = arith.mulf %360, %354 : vector<8x128xf32>
    %362 = arith.addf %359, %361 : vector<8x128xf32>
    %363 = vector.broadcast %300 : f32 to vector<8x128xf32>
    %364 = arith.mulf %363, %353 : vector<8x128xf32>
    %365 = vector.broadcast %301 : f32 to vector<8x128xf32>
    %366 = arith.mulf %365, %286 : vector<8x128xf32>
    %367 = arith.addf %364, %366 : vector<8x128xf32>
    %368 = vector.broadcast %302 : f32 to vector<8x128xf32>
    %369 = arith.mulf %368, %354 : vector<8x128xf32>
    %370 = arith.addf %367, %369 : vector<8x128xf32>
    %371 = arith.addf %334, %370 : vector<8x128xf32>
    %372 = vector.broadcast %303 : f32 to vector<8x128xf32>
    %373 = arith.mulf %372, %353 : vector<8x128xf32>
    %374 = vector.broadcast %304 : f32 to vector<8x128xf32>
    %375 = arith.mulf %374, %286 : vector<8x128xf32>
    %376 = arith.addf %373, %375 : vector<8x128xf32>
    %377 = vector.broadcast %305 : f32 to vector<8x128xf32>
    %378 = arith.mulf %377, %354 : vector<8x128xf32>
    %379 = arith.addf %376, %378 : vector<8x128xf32>
    %380 = arith.addf %343, %379 : vector<8x128xf32>
    %c1_i32_47 = arith.constant 1 : i32
    %381 = tpu.dynamic_rotate %288 by %c1_i32_47 dim 1 : vector<8x128xf32>, i32 -> vector<8x128xf32>
    %c127_i32_48 = arith.constant 127 : i32
    %382 = tpu.dynamic_rotate %288 by %c127_i32_48 dim 1 : vector<8x128xf32>, i32 -> vector<8x128xf32>
    %383 = vector.broadcast %297 : f32 to vector<8x128xf32>
    %384 = arith.mulf %383, %381 : vector<8x128xf32>
    %385 = vector.broadcast %298 : f32 to vector<8x128xf32>
    %386 = arith.mulf %385, %288 : vector<8x128xf32>
    %387 = arith.addf %384, %386 : vector<8x128xf32>
    %388 = vector.broadcast %299 : f32 to vector<8x128xf32>
    %389 = arith.mulf %388, %382 : vector<8x128xf32>
    %390 = arith.addf %387, %389 : vector<8x128xf32>
    %391 = vector.broadcast %300 : f32 to vector<8x128xf32>
    %392 = arith.mulf %391, %381 : vector<8x128xf32>
    %393 = vector.broadcast %301 : f32 to vector<8x128xf32>
    %394 = arith.mulf %393, %288 : vector<8x128xf32>
    %395 = arith.addf %392, %394 : vector<8x128xf32>
    %396 = vector.broadcast %302 : f32 to vector<8x128xf32>
    %397 = arith.mulf %396, %382 : vector<8x128xf32>
    %398 = arith.addf %395, %397 : vector<8x128xf32>
    %399 = arith.addf %362, %398 : vector<8x128xf32>
    %400 = vector.broadcast %303 : f32 to vector<8x128xf32>
    %401 = arith.mulf %400, %381 : vector<8x128xf32>
    %402 = vector.broadcast %304 : f32 to vector<8x128xf32>
    %403 = arith.mulf %402, %288 : vector<8x128xf32>
    %404 = arith.addf %401, %403 : vector<8x128xf32>
    %405 = vector.broadcast %305 : f32 to vector<8x128xf32>
    %406 = arith.mulf %405, %382 : vector<8x128xf32>
    %407 = arith.addf %404, %406 : vector<8x128xf32>
    %408 = arith.addf %371, %407 : vector<8x128xf32>
    %c1_i32_49 = arith.constant 1 : i32
    %409 = tpu.dynamic_rotate %290 by %c1_i32_49 dim 1 : vector<8x128xf32>, i32 -> vector<8x128xf32>
    %c127_i32_50 = arith.constant 127 : i32
    %410 = tpu.dynamic_rotate %290 by %c127_i32_50 dim 1 : vector<8x128xf32>, i32 -> vector<8x128xf32>
    %411 = vector.broadcast %297 : f32 to vector<8x128xf32>
    %412 = arith.mulf %411, %409 : vector<8x128xf32>
    %413 = vector.broadcast %298 : f32 to vector<8x128xf32>
    %414 = arith.mulf %413, %290 : vector<8x128xf32>
    %415 = arith.addf %412, %414 : vector<8x128xf32>
    %416 = vector.broadcast %299 : f32 to vector<8x128xf32>
    %417 = arith.mulf %416, %410 : vector<8x128xf32>
    %418 = arith.addf %415, %417 : vector<8x128xf32>
    %419 = vector.broadcast %300 : f32 to vector<8x128xf32>
    %420 = arith.mulf %419, %409 : vector<8x128xf32>
    %421 = vector.broadcast %301 : f32 to vector<8x128xf32>
    %422 = arith.mulf %421, %290 : vector<8x128xf32>
    %423 = arith.addf %420, %422 : vector<8x128xf32>
    %424 = vector.broadcast %302 : f32 to vector<8x128xf32>
    %425 = arith.mulf %424, %410 : vector<8x128xf32>
    %426 = arith.addf %423, %425 : vector<8x128xf32>
    %427 = arith.addf %390, %426 : vector<8x128xf32>
    %428 = vector.broadcast %303 : f32 to vector<8x128xf32>
    %429 = arith.mulf %428, %409 : vector<8x128xf32>
    %430 = vector.broadcast %304 : f32 to vector<8x128xf32>
    %431 = arith.mulf %430, %290 : vector<8x128xf32>
    %432 = arith.addf %429, %431 : vector<8x128xf32>
    %433 = vector.broadcast %305 : f32 to vector<8x128xf32>
    %434 = arith.mulf %433, %410 : vector<8x128xf32>
    %435 = arith.addf %432, %434 : vector<8x128xf32>
    %436 = arith.addf %399, %435 : vector<8x128xf32>
    %c1_i32_51 = arith.constant 1 : i32
    %437 = tpu.dynamic_rotate %292 by %c1_i32_51 dim 1 : vector<8x128xf32>, i32 -> vector<8x128xf32>
    %c127_i32_52 = arith.constant 127 : i32
    %438 = tpu.dynamic_rotate %292 by %c127_i32_52 dim 1 : vector<8x128xf32>, i32 -> vector<8x128xf32>
    %439 = vector.broadcast %297 : f32 to vector<8x128xf32>
    %440 = arith.mulf %439, %437 : vector<8x128xf32>
    %441 = vector.broadcast %298 : f32 to vector<8x128xf32>
    %442 = arith.mulf %441, %292 : vector<8x128xf32>
    %443 = arith.addf %440, %442 : vector<8x128xf32>
    %444 = vector.broadcast %299 : f32 to vector<8x128xf32>
    %445 = arith.mulf %444, %438 : vector<8x128xf32>
    %446 = arith.addf %443, %445 : vector<8x128xf32>
    %447 = vector.broadcast %300 : f32 to vector<8x128xf32>
    %448 = arith.mulf %447, %437 : vector<8x128xf32>
    %449 = vector.broadcast %301 : f32 to vector<8x128xf32>
    %450 = arith.mulf %449, %292 : vector<8x128xf32>
    %451 = arith.addf %448, %450 : vector<8x128xf32>
    %452 = vector.broadcast %302 : f32 to vector<8x128xf32>
    %453 = arith.mulf %452, %438 : vector<8x128xf32>
    %454 = arith.addf %451, %453 : vector<8x128xf32>
    %455 = arith.addf %418, %454 : vector<8x128xf32>
    %456 = vector.broadcast %303 : f32 to vector<8x128xf32>
    %457 = arith.mulf %456, %437 : vector<8x128xf32>
    %458 = vector.broadcast %304 : f32 to vector<8x128xf32>
    %459 = arith.mulf %458, %292 : vector<8x128xf32>
    %460 = arith.addf %457, %459 : vector<8x128xf32>
    %461 = vector.broadcast %305 : f32 to vector<8x128xf32>
    %462 = arith.mulf %461, %438 : vector<8x128xf32>
    %463 = arith.addf %460, %462 : vector<8x128xf32>
    %464 = arith.addf %427, %463 : vector<8x128xf32>
    %c1_i32_53 = arith.constant 1 : i32
    %465 = tpu.dynamic_rotate %294 by %c1_i32_53 dim 1 : vector<8x128xf32>, i32 -> vector<8x128xf32>
    %c127_i32_54 = arith.constant 127 : i32
    %466 = tpu.dynamic_rotate %294 by %c127_i32_54 dim 1 : vector<8x128xf32>, i32 -> vector<8x128xf32>
    %467 = vector.broadcast %297 : f32 to vector<8x128xf32>
    %468 = arith.mulf %467, %465 : vector<8x128xf32>
    %469 = vector.broadcast %298 : f32 to vector<8x128xf32>
    %470 = arith.mulf %469, %294 : vector<8x128xf32>
    %471 = arith.addf %468, %470 : vector<8x128xf32>
    %472 = vector.broadcast %299 : f32 to vector<8x128xf32>
    %473 = arith.mulf %472, %466 : vector<8x128xf32>
    %474 = arith.addf %471, %473 : vector<8x128xf32>
    %475 = vector.broadcast %300 : f32 to vector<8x128xf32>
    %476 = arith.mulf %475, %465 : vector<8x128xf32>
    %477 = vector.broadcast %301 : f32 to vector<8x128xf32>
    %478 = arith.mulf %477, %294 : vector<8x128xf32>
    %479 = arith.addf %476, %478 : vector<8x128xf32>
    %480 = vector.broadcast %302 : f32 to vector<8x128xf32>
    %481 = arith.mulf %480, %466 : vector<8x128xf32>
    %482 = arith.addf %479, %481 : vector<8x128xf32>
    %483 = arith.addf %446, %482 : vector<8x128xf32>
    %484 = vector.broadcast %303 : f32 to vector<8x128xf32>
    %485 = arith.mulf %484, %465 : vector<8x128xf32>
    %486 = vector.broadcast %304 : f32 to vector<8x128xf32>
    %487 = arith.mulf %486, %294 : vector<8x128xf32>
    %488 = arith.addf %485, %487 : vector<8x128xf32>
    %489 = vector.broadcast %305 : f32 to vector<8x128xf32>
    %490 = arith.mulf %489, %466 : vector<8x128xf32>
    %491 = arith.addf %488, %490 : vector<8x128xf32>
    %492 = arith.addf %455, %491 : vector<8x128xf32>
    %c1_i32_55 = arith.constant 1 : i32
    %493 = tpu.dynamic_rotate %296 by %c1_i32_55 dim 1 : vector<8x128xf32>, i32 -> vector<8x128xf32>
    %c127_i32_56 = arith.constant 127 : i32
    %494 = tpu.dynamic_rotate %296 by %c127_i32_56 dim 1 : vector<8x128xf32>, i32 -> vector<8x128xf32>
    %495 = vector.broadcast %300 : f32 to vector<8x128xf32>
    %496 = arith.mulf %495, %493 : vector<8x128xf32>
    %497 = vector.broadcast %301 : f32 to vector<8x128xf32>
    %498 = arith.mulf %497, %296 : vector<8x128xf32>
    %499 = arith.addf %496, %498 : vector<8x128xf32>
    %500 = vector.broadcast %302 : f32 to vector<8x128xf32>
    %501 = arith.mulf %500, %494 : vector<8x128xf32>
    %502 = arith.addf %499, %501 : vector<8x128xf32>
    %503 = arith.addf %474, %502 : vector<8x128xf32>
    %504 = vector.broadcast %303 : f32 to vector<8x128xf32>
    %505 = arith.mulf %504, %493 : vector<8x128xf32>
    %506 = vector.broadcast %304 : f32 to vector<8x128xf32>
    %507 = arith.mulf %506, %296 : vector<8x128xf32>
    %508 = arith.addf %505, %507 : vector<8x128xf32>
    %509 = vector.broadcast %305 : f32 to vector<8x128xf32>
    %510 = arith.mulf %509, %494 : vector<8x128xf32>
    %511 = arith.addf %508, %510 : vector<8x128xf32>
    %512 = arith.addf %483, %511 : vector<8x128xf32>
    %513 = vector.broadcast %306 : f32 to vector<8x128xf32>
    %514 = arith.addf %352, %513 : vector<8x128xf32>
    %515 = vector.broadcast %4 : vector<1x128xf32> to vector<8x128xf32>
    %516 = arith.mulf %514, %515 : vector<8x128xf32>
    %517 = vector.broadcast %306 : f32 to vector<8x128xf32>
    %518 = arith.addf %380, %517 : vector<8x128xf32>
    %519 = vector.broadcast %4 : vector<1x128xf32> to vector<8x128xf32>
    %520 = arith.mulf %518, %519 : vector<8x128xf32>
    %521 = vector.broadcast %306 : f32 to vector<8x128xf32>
    %522 = arith.addf %408, %521 : vector<8x128xf32>
    %523 = vector.broadcast %4 : vector<1x128xf32> to vector<8x128xf32>
    %524 = arith.mulf %522, %523 : vector<8x128xf32>
    %525 = vector.broadcast %306 : f32 to vector<8x128xf32>
    %526 = arith.addf %436, %525 : vector<8x128xf32>
    %527 = vector.broadcast %4 : vector<1x128xf32> to vector<8x128xf32>
    %528 = arith.mulf %526, %527 : vector<8x128xf32>
    %529 = vector.broadcast %306 : f32 to vector<8x128xf32>
    %530 = arith.addf %464, %529 : vector<8x128xf32>
    %531 = vector.broadcast %4 : vector<1x128xf32> to vector<8x128xf32>
    %532 = arith.mulf %530, %531 : vector<8x128xf32>
    %533 = vector.broadcast %306 : f32 to vector<8x128xf32>
    %534 = arith.addf %492, %533 : vector<8x128xf32>
    %535 = vector.broadcast %4 : vector<1x128xf32> to vector<8x128xf32>
    %536 = arith.mulf %534, %535 : vector<8x128xf32>
    %537 = vector.broadcast %306 : f32 to vector<8x128xf32>
    %538 = arith.addf %512, %537 : vector<8x128xf32>
    %539 = vector.broadcast %4 : vector<1x128xf32> to vector<8x128xf32>
    %540 = arith.mulf %538, %539 : vector<8x128xf32>
    %541 = vector.broadcast %306 : f32 to vector<8x128xf32>
    %542 = arith.addf %503, %541 : vector<8x128xf32>
    %543 = vector.broadcast %4 : vector<1x128xf32> to vector<8x128xf32>
    %544 = arith.mulf %542, %543 : vector<8x128xf32>
    %cst_57 = arith.constant 0.000000e+00 : f32
    %545 = vector.broadcast %cst_57 : f32 to vector<8x128xf32>
    %546 = arith.maximumf %516, %545 : vector<8x128xf32>
    %cst_58 = arith.constant 0.000000e+00 : f32
    %547 = vector.broadcast %cst_58 : f32 to vector<8x128xf32>
    %548 = arith.maximumf %520, %547 : vector<8x128xf32>
    %cst_59 = arith.constant 0.000000e+00 : f32
    %549 = vector.broadcast %cst_59 : f32 to vector<8x128xf32>
    %550 = arith.maximumf %524, %549 : vector<8x128xf32>
    %cst_60 = arith.constant 0.000000e+00 : f32
    %551 = vector.broadcast %cst_60 : f32 to vector<8x128xf32>
    %552 = arith.maximumf %528, %551 : vector<8x128xf32>
    %cst_61 = arith.constant 0.000000e+00 : f32
    %553 = vector.broadcast %cst_61 : f32 to vector<8x128xf32>
    %554 = arith.maximumf %532, %553 : vector<8x128xf32>
    %cst_62 = arith.constant 0.000000e+00 : f32
    %555 = vector.broadcast %cst_62 : f32 to vector<8x128xf32>
    %556 = arith.maximumf %536, %555 : vector<8x128xf32>
    %cst_63 = arith.constant 0.000000e+00 : f32
    %557 = vector.broadcast %cst_63 : f32 to vector<8x128xf32>
    %558 = arith.maximumf %540, %557 : vector<8x128xf32>
    %cst_64 = arith.constant 0.000000e+00 : f32
    %559 = vector.broadcast %cst_64 : f32 to vector<8x128xf32>
    %560 = arith.maximumf %544, %559 : vector<8x128xf32>
    %c18 = arith.constant 18 : index
    %561 = memref.load %arg2[%c18] : memref<45xf32, #tpu.memory_space<smem>>
    %c19 = arith.constant 19 : index
    %562 = memref.load %arg2[%c19] : memref<45xf32, #tpu.memory_space<smem>>
    %c20 = arith.constant 20 : index
    %563 = memref.load %arg2[%c20] : memref<45xf32, #tpu.memory_space<smem>>
    %c21 = arith.constant 21 : index
    %564 = memref.load %arg2[%c21] : memref<45xf32, #tpu.memory_space<smem>>
    %c22 = arith.constant 22 : index
    %565 = memref.load %arg2[%c22] : memref<45xf32, #tpu.memory_space<smem>>
    %c23 = arith.constant 23 : index
    %566 = memref.load %arg2[%c23] : memref<45xf32, #tpu.memory_space<smem>>
    %c24 = arith.constant 24 : index
    %567 = memref.load %arg2[%c24] : memref<45xf32, #tpu.memory_space<smem>>
    %c25 = arith.constant 25 : index
    %568 = memref.load %arg2[%c25] : memref<45xf32, #tpu.memory_space<smem>>
    %c26 = arith.constant 26 : index
    %569 = memref.load %arg2[%c26] : memref<45xf32, #tpu.memory_space<smem>>
    %c2_65 = arith.constant 2 : index
    %570 = memref.load %arg3[%c2_65] : memref<5xf32, #tpu.memory_space<smem>>
    %c1_i32_66 = arith.constant 1 : i32
    %571 = tpu.dynamic_rotate %546 by %c1_i32_66 dim 1 : vector<8x128xf32>, i32 -> vector<8x128xf32>
    %c127_i32_67 = arith.constant 127 : i32
    %572 = tpu.dynamic_rotate %546 by %c127_i32_67 dim 1 : vector<8x128xf32>, i32 -> vector<8x128xf32>
    %573 = vector.broadcast %561 : f32 to vector<8x128xf32>
    %574 = arith.mulf %573, %571 : vector<8x128xf32>
    %575 = vector.broadcast %562 : f32 to vector<8x128xf32>
    %576 = arith.mulf %575, %546 : vector<8x128xf32>
    %577 = arith.addf %574, %576 : vector<8x128xf32>
    %578 = vector.broadcast %563 : f32 to vector<8x128xf32>
    %579 = arith.mulf %578, %572 : vector<8x128xf32>
    %580 = arith.addf %577, %579 : vector<8x128xf32>
    %581 = vector.broadcast %564 : f32 to vector<8x128xf32>
    %582 = arith.mulf %581, %571 : vector<8x128xf32>
    %583 = vector.broadcast %565 : f32 to vector<8x128xf32>
    %584 = arith.mulf %583, %546 : vector<8x128xf32>
    %585 = arith.addf %582, %584 : vector<8x128xf32>
    %586 = vector.broadcast %566 : f32 to vector<8x128xf32>
    %587 = arith.mulf %586, %572 : vector<8x128xf32>
    %588 = arith.addf %585, %587 : vector<8x128xf32>
    %c1_i32_68 = arith.constant 1 : i32
    %589 = tpu.dynamic_rotate %548 by %c1_i32_68 dim 1 : vector<8x128xf32>, i32 -> vector<8x128xf32>
    %c127_i32_69 = arith.constant 127 : i32
    %590 = tpu.dynamic_rotate %548 by %c127_i32_69 dim 1 : vector<8x128xf32>, i32 -> vector<8x128xf32>
    %591 = vector.broadcast %561 : f32 to vector<8x128xf32>
    %592 = arith.mulf %591, %589 : vector<8x128xf32>
    %593 = vector.broadcast %562 : f32 to vector<8x128xf32>
    %594 = arith.mulf %593, %548 : vector<8x128xf32>
    %595 = arith.addf %592, %594 : vector<8x128xf32>
    %596 = vector.broadcast %563 : f32 to vector<8x128xf32>
    %597 = arith.mulf %596, %590 : vector<8x128xf32>
    %598 = arith.addf %595, %597 : vector<8x128xf32>
    %599 = vector.broadcast %564 : f32 to vector<8x128xf32>
    %600 = arith.mulf %599, %589 : vector<8x128xf32>
    %601 = vector.broadcast %565 : f32 to vector<8x128xf32>
    %602 = arith.mulf %601, %548 : vector<8x128xf32>
    %603 = arith.addf %600, %602 : vector<8x128xf32>
    %604 = vector.broadcast %566 : f32 to vector<8x128xf32>
    %605 = arith.mulf %604, %590 : vector<8x128xf32>
    %606 = arith.addf %603, %605 : vector<8x128xf32>
    %607 = arith.addf %580, %606 : vector<8x128xf32>
    %608 = vector.broadcast %567 : f32 to vector<8x128xf32>
    %609 = arith.mulf %608, %589 : vector<8x128xf32>
    %610 = vector.broadcast %568 : f32 to vector<8x128xf32>
    %611 = arith.mulf %610, %548 : vector<8x128xf32>
    %612 = arith.addf %609, %611 : vector<8x128xf32>
    %613 = vector.broadcast %569 : f32 to vector<8x128xf32>
    %614 = arith.mulf %613, %590 : vector<8x128xf32>
    %615 = arith.addf %612, %614 : vector<8x128xf32>
    %616 = arith.addf %588, %615 : vector<8x128xf32>
    %c1_i32_70 = arith.constant 1 : i32
    %617 = tpu.dynamic_rotate %550 by %c1_i32_70 dim 1 : vector<8x128xf32>, i32 -> vector<8x128xf32>
    %c127_i32_71 = arith.constant 127 : i32
    %618 = tpu.dynamic_rotate %550 by %c127_i32_71 dim 1 : vector<8x128xf32>, i32 -> vector<8x128xf32>
    %619 = vector.broadcast %561 : f32 to vector<8x128xf32>
    %620 = arith.mulf %619, %617 : vector<8x128xf32>
    %621 = vector.broadcast %562 : f32 to vector<8x128xf32>
    %622 = arith.mulf %621, %550 : vector<8x128xf32>
    %623 = arith.addf %620, %622 : vector<8x128xf32>
    %624 = vector.broadcast %563 : f32 to vector<8x128xf32>
    %625 = arith.mulf %624, %618 : vector<8x128xf32>
    %626 = arith.addf %623, %625 : vector<8x128xf32>
    %627 = vector.broadcast %564 : f32 to vector<8x128xf32>
    %628 = arith.mulf %627, %617 : vector<8x128xf32>
    %629 = vector.broadcast %565 : f32 to vector<8x128xf32>
    %630 = arith.mulf %629, %550 : vector<8x128xf32>
    %631 = arith.addf %628, %630 : vector<8x128xf32>
    %632 = vector.broadcast %566 : f32 to vector<8x128xf32>
    %633 = arith.mulf %632, %618 : vector<8x128xf32>
    %634 = arith.addf %631, %633 : vector<8x128xf32>
    %635 = arith.addf %598, %634 : vector<8x128xf32>
    %636 = vector.broadcast %567 : f32 to vector<8x128xf32>
    %637 = arith.mulf %636, %617 : vector<8x128xf32>
    %638 = vector.broadcast %568 : f32 to vector<8x128xf32>
    %639 = arith.mulf %638, %550 : vector<8x128xf32>
    %640 = arith.addf %637, %639 : vector<8x128xf32>
    %641 = vector.broadcast %569 : f32 to vector<8x128xf32>
    %642 = arith.mulf %641, %618 : vector<8x128xf32>
    %643 = arith.addf %640, %642 : vector<8x128xf32>
    %644 = arith.addf %607, %643 : vector<8x128xf32>
    %c1_i32_72 = arith.constant 1 : i32
    %645 = tpu.dynamic_rotate %552 by %c1_i32_72 dim 1 : vector<8x128xf32>, i32 -> vector<8x128xf32>
    %c127_i32_73 = arith.constant 127 : i32
    %646 = tpu.dynamic_rotate %552 by %c127_i32_73 dim 1 : vector<8x128xf32>, i32 -> vector<8x128xf32>
    %647 = vector.broadcast %561 : f32 to vector<8x128xf32>
    %648 = arith.mulf %647, %645 : vector<8x128xf32>
    %649 = vector.broadcast %562 : f32 to vector<8x128xf32>
    %650 = arith.mulf %649, %552 : vector<8x128xf32>
    %651 = arith.addf %648, %650 : vector<8x128xf32>
    %652 = vector.broadcast %563 : f32 to vector<8x128xf32>
    %653 = arith.mulf %652, %646 : vector<8x128xf32>
    %654 = arith.addf %651, %653 : vector<8x128xf32>
    %655 = vector.broadcast %564 : f32 to vector<8x128xf32>
    %656 = arith.mulf %655, %645 : vector<8x128xf32>
    %657 = vector.broadcast %565 : f32 to vector<8x128xf32>
    %658 = arith.mulf %657, %552 : vector<8x128xf32>
    %659 = arith.addf %656, %658 : vector<8x128xf32>
    %660 = vector.broadcast %566 : f32 to vector<8x128xf32>
    %661 = arith.mulf %660, %646 : vector<8x128xf32>
    %662 = arith.addf %659, %661 : vector<8x128xf32>
    %663 = arith.addf %626, %662 : vector<8x128xf32>
    %664 = vector.broadcast %567 : f32 to vector<8x128xf32>
    %665 = arith.mulf %664, %645 : vector<8x128xf32>
    %666 = vector.broadcast %568 : f32 to vector<8x128xf32>
    %667 = arith.mulf %666, %552 : vector<8x128xf32>
    %668 = arith.addf %665, %667 : vector<8x128xf32>
    %669 = vector.broadcast %569 : f32 to vector<8x128xf32>
    %670 = arith.mulf %669, %646 : vector<8x128xf32>
    %671 = arith.addf %668, %670 : vector<8x128xf32>
    %672 = arith.addf %635, %671 : vector<8x128xf32>
    %c1_i32_74 = arith.constant 1 : i32
    %673 = tpu.dynamic_rotate %554 by %c1_i32_74 dim 1 : vector<8x128xf32>, i32 -> vector<8x128xf32>
    %c127_i32_75 = arith.constant 127 : i32
    %674 = tpu.dynamic_rotate %554 by %c127_i32_75 dim 1 : vector<8x128xf32>, i32 -> vector<8x128xf32>
    %675 = vector.broadcast %561 : f32 to vector<8x128xf32>
    %676 = arith.mulf %675, %673 : vector<8x128xf32>
    %677 = vector.broadcast %562 : f32 to vector<8x128xf32>
    %678 = arith.mulf %677, %554 : vector<8x128xf32>
    %679 = arith.addf %676, %678 : vector<8x128xf32>
    %680 = vector.broadcast %563 : f32 to vector<8x128xf32>
    %681 = arith.mulf %680, %674 : vector<8x128xf32>
    %682 = arith.addf %679, %681 : vector<8x128xf32>
    %683 = vector.broadcast %564 : f32 to vector<8x128xf32>
    %684 = arith.mulf %683, %673 : vector<8x128xf32>
    %685 = vector.broadcast %565 : f32 to vector<8x128xf32>
    %686 = arith.mulf %685, %554 : vector<8x128xf32>
    %687 = arith.addf %684, %686 : vector<8x128xf32>
    %688 = vector.broadcast %566 : f32 to vector<8x128xf32>
    %689 = arith.mulf %688, %674 : vector<8x128xf32>
    %690 = arith.addf %687, %689 : vector<8x128xf32>
    %691 = arith.addf %654, %690 : vector<8x128xf32>
    %692 = vector.broadcast %567 : f32 to vector<8x128xf32>
    %693 = arith.mulf %692, %673 : vector<8x128xf32>
    %694 = vector.broadcast %568 : f32 to vector<8x128xf32>
    %695 = arith.mulf %694, %554 : vector<8x128xf32>
    %696 = arith.addf %693, %695 : vector<8x128xf32>
    %697 = vector.broadcast %569 : f32 to vector<8x128xf32>
    %698 = arith.mulf %697, %674 : vector<8x128xf32>
    %699 = arith.addf %696, %698 : vector<8x128xf32>
    %700 = arith.addf %663, %699 : vector<8x128xf32>
    %c1_i32_76 = arith.constant 1 : i32
    %701 = tpu.dynamic_rotate %556 by %c1_i32_76 dim 1 : vector<8x128xf32>, i32 -> vector<8x128xf32>
    %c127_i32_77 = arith.constant 127 : i32
    %702 = tpu.dynamic_rotate %556 by %c127_i32_77 dim 1 : vector<8x128xf32>, i32 -> vector<8x128xf32>
    %703 = vector.broadcast %561 : f32 to vector<8x128xf32>
    %704 = arith.mulf %703, %701 : vector<8x128xf32>
    %705 = vector.broadcast %562 : f32 to vector<8x128xf32>
    %706 = arith.mulf %705, %556 : vector<8x128xf32>
    %707 = arith.addf %704, %706 : vector<8x128xf32>
    %708 = vector.broadcast %563 : f32 to vector<8x128xf32>
    %709 = arith.mulf %708, %702 : vector<8x128xf32>
    %710 = arith.addf %707, %709 : vector<8x128xf32>
    %711 = vector.broadcast %564 : f32 to vector<8x128xf32>
    %712 = arith.mulf %711, %701 : vector<8x128xf32>
    %713 = vector.broadcast %565 : f32 to vector<8x128xf32>
    %714 = arith.mulf %713, %556 : vector<8x128xf32>
    %715 = arith.addf %712, %714 : vector<8x128xf32>
    %716 = vector.broadcast %566 : f32 to vector<8x128xf32>
    %717 = arith.mulf %716, %702 : vector<8x128xf32>
    %718 = arith.addf %715, %717 : vector<8x128xf32>
    %719 = arith.addf %682, %718 : vector<8x128xf32>
    %720 = vector.broadcast %567 : f32 to vector<8x128xf32>
    %721 = arith.mulf %720, %701 : vector<8x128xf32>
    %722 = vector.broadcast %568 : f32 to vector<8x128xf32>
    %723 = arith.mulf %722, %556 : vector<8x128xf32>
    %724 = arith.addf %721, %723 : vector<8x128xf32>
    %725 = vector.broadcast %569 : f32 to vector<8x128xf32>
    %726 = arith.mulf %725, %702 : vector<8x128xf32>
    %727 = arith.addf %724, %726 : vector<8x128xf32>
    %728 = arith.addf %691, %727 : vector<8x128xf32>
    %c1_i32_78 = arith.constant 1 : i32
    %729 = tpu.dynamic_rotate %558 by %c1_i32_78 dim 1 : vector<8x128xf32>, i32 -> vector<8x128xf32>
    %c127_i32_79 = arith.constant 127 : i32
    %730 = tpu.dynamic_rotate %558 by %c127_i32_79 dim 1 : vector<8x128xf32>, i32 -> vector<8x128xf32>
    %731 = vector.broadcast %561 : f32 to vector<8x128xf32>
    %732 = arith.mulf %731, %729 : vector<8x128xf32>
    %733 = vector.broadcast %562 : f32 to vector<8x128xf32>
    %734 = arith.mulf %733, %558 : vector<8x128xf32>
    %735 = arith.addf %732, %734 : vector<8x128xf32>
    %736 = vector.broadcast %563 : f32 to vector<8x128xf32>
    %737 = arith.mulf %736, %730 : vector<8x128xf32>
    %738 = arith.addf %735, %737 : vector<8x128xf32>
    %739 = vector.broadcast %564 : f32 to vector<8x128xf32>
    %740 = arith.mulf %739, %729 : vector<8x128xf32>
    %741 = vector.broadcast %565 : f32 to vector<8x128xf32>
    %742 = arith.mulf %741, %558 : vector<8x128xf32>
    %743 = arith.addf %740, %742 : vector<8x128xf32>
    %744 = vector.broadcast %566 : f32 to vector<8x128xf32>
    %745 = arith.mulf %744, %730 : vector<8x128xf32>
    %746 = arith.addf %743, %745 : vector<8x128xf32>
    %747 = arith.addf %710, %746 : vector<8x128xf32>
    %748 = vector.broadcast %567 : f32 to vector<8x128xf32>
    %749 = arith.mulf %748, %729 : vector<8x128xf32>
    %750 = vector.broadcast %568 : f32 to vector<8x128xf32>
    %751 = arith.mulf %750, %558 : vector<8x128xf32>
    %752 = arith.addf %749, %751 : vector<8x128xf32>
    %753 = vector.broadcast %569 : f32 to vector<8x128xf32>
    %754 = arith.mulf %753, %730 : vector<8x128xf32>
    %755 = arith.addf %752, %754 : vector<8x128xf32>
    %756 = arith.addf %719, %755 : vector<8x128xf32>
    %c1_i32_80 = arith.constant 1 : i32
    %757 = tpu.dynamic_rotate %560 by %c1_i32_80 dim 1 : vector<8x128xf32>, i32 -> vector<8x128xf32>
    %c127_i32_81 = arith.constant 127 : i32
    %758 = tpu.dynamic_rotate %560 by %c127_i32_81 dim 1 : vector<8x128xf32>, i32 -> vector<8x128xf32>
    %759 = vector.broadcast %564 : f32 to vector<8x128xf32>
    %760 = arith.mulf %759, %757 : vector<8x128xf32>
    %761 = vector.broadcast %565 : f32 to vector<8x128xf32>
    %762 = arith.mulf %761, %560 : vector<8x128xf32>
    %763 = arith.addf %760, %762 : vector<8x128xf32>
    %764 = vector.broadcast %566 : f32 to vector<8x128xf32>
    %765 = arith.mulf %764, %758 : vector<8x128xf32>
    %766 = arith.addf %763, %765 : vector<8x128xf32>
    %767 = arith.addf %738, %766 : vector<8x128xf32>
    %768 = vector.broadcast %567 : f32 to vector<8x128xf32>
    %769 = arith.mulf %768, %757 : vector<8x128xf32>
    %770 = vector.broadcast %568 : f32 to vector<8x128xf32>
    %771 = arith.mulf %770, %560 : vector<8x128xf32>
    %772 = arith.addf %769, %771 : vector<8x128xf32>
    %773 = vector.broadcast %569 : f32 to vector<8x128xf32>
    %774 = arith.mulf %773, %758 : vector<8x128xf32>
    %775 = arith.addf %772, %774 : vector<8x128xf32>
    %776 = arith.addf %747, %775 : vector<8x128xf32>
    %777 = vector.broadcast %570 : f32 to vector<8x128xf32>
    %778 = arith.addf %616, %777 : vector<8x128xf32>
    %779 = vector.broadcast %4 : vector<1x128xf32> to vector<8x128xf32>
    %780 = arith.mulf %778, %779 : vector<8x128xf32>
    %781 = vector.broadcast %570 : f32 to vector<8x128xf32>
    %782 = arith.addf %644, %781 : vector<8x128xf32>
    %783 = vector.broadcast %4 : vector<1x128xf32> to vector<8x128xf32>
    %784 = arith.mulf %782, %783 : vector<8x128xf32>
    %785 = vector.broadcast %570 : f32 to vector<8x128xf32>
    %786 = arith.addf %672, %785 : vector<8x128xf32>
    %787 = vector.broadcast %4 : vector<1x128xf32> to vector<8x128xf32>
    %788 = arith.mulf %786, %787 : vector<8x128xf32>
    %789 = vector.broadcast %570 : f32 to vector<8x128xf32>
    %790 = arith.addf %700, %789 : vector<8x128xf32>
    %791 = vector.broadcast %4 : vector<1x128xf32> to vector<8x128xf32>
    %792 = arith.mulf %790, %791 : vector<8x128xf32>
    %793 = vector.broadcast %570 : f32 to vector<8x128xf32>
    %794 = arith.addf %728, %793 : vector<8x128xf32>
    %795 = vector.broadcast %4 : vector<1x128xf32> to vector<8x128xf32>
    %796 = arith.mulf %794, %795 : vector<8x128xf32>
    %797 = vector.broadcast %570 : f32 to vector<8x128xf32>
    %798 = arith.addf %756, %797 : vector<8x128xf32>
    %799 = vector.broadcast %4 : vector<1x128xf32> to vector<8x128xf32>
    %800 = arith.mulf %798, %799 : vector<8x128xf32>
    %801 = vector.broadcast %570 : f32 to vector<8x128xf32>
    %802 = arith.addf %776, %801 : vector<8x128xf32>
    %803 = vector.broadcast %4 : vector<1x128xf32> to vector<8x128xf32>
    %804 = arith.mulf %802, %803 : vector<8x128xf32>
    %805 = vector.broadcast %570 : f32 to vector<8x128xf32>
    %806 = arith.addf %767, %805 : vector<8x128xf32>
    %807 = vector.broadcast %4 : vector<1x128xf32> to vector<8x128xf32>
    %808 = arith.mulf %806, %807 : vector<8x128xf32>
    %cst_82 = arith.constant 0.000000e+00 : f32
    %809 = vector.broadcast %cst_82 : f32 to vector<8x128xf32>
    %810 = arith.maximumf %780, %809 : vector<8x128xf32>
    %cst_83 = arith.constant 0.000000e+00 : f32
    %811 = vector.broadcast %cst_83 : f32 to vector<8x128xf32>
    %812 = arith.maximumf %784, %811 : vector<8x128xf32>
    %cst_84 = arith.constant 0.000000e+00 : f32
    %813 = vector.broadcast %cst_84 : f32 to vector<8x128xf32>
    %814 = arith.maximumf %788, %813 : vector<8x128xf32>
    %cst_85 = arith.constant 0.000000e+00 : f32
    %815 = vector.broadcast %cst_85 : f32 to vector<8x128xf32>
    %816 = arith.maximumf %792, %815 : vector<8x128xf32>
    %cst_86 = arith.constant 0.000000e+00 : f32
    %817 = vector.broadcast %cst_86 : f32 to vector<8x128xf32>
    %818 = arith.maximumf %796, %817 : vector<8x128xf32>
    %cst_87 = arith.constant 0.000000e+00 : f32
    %819 = vector.broadcast %cst_87 : f32 to vector<8x128xf32>
    %820 = arith.maximumf %800, %819 : vector<8x128xf32>
    %cst_88 = arith.constant 0.000000e+00 : f32
    %821 = vector.broadcast %cst_88 : f32 to vector<8x128xf32>
    %822 = arith.maximumf %804, %821 : vector<8x128xf32>
    %cst_89 = arith.constant 0.000000e+00 : f32
    %823 = vector.broadcast %cst_89 : f32 to vector<8x128xf32>
    %824 = arith.maximumf %808, %823 : vector<8x128xf32>
    %c27 = arith.constant 27 : index
    %825 = memref.load %arg2[%c27] : memref<45xf32, #tpu.memory_space<smem>>
    %c28 = arith.constant 28 : index
    %826 = memref.load %arg2[%c28] : memref<45xf32, #tpu.memory_space<smem>>
    %c29 = arith.constant 29 : index
    %827 = memref.load %arg2[%c29] : memref<45xf32, #tpu.memory_space<smem>>
    %c30 = arith.constant 30 : index
    %828 = memref.load %arg2[%c30] : memref<45xf32, #tpu.memory_space<smem>>
    %c31 = arith.constant 31 : index
    %829 = memref.load %arg2[%c31] : memref<45xf32, #tpu.memory_space<smem>>
    %c32 = arith.constant 32 : index
    %830 = memref.load %arg2[%c32] : memref<45xf32, #tpu.memory_space<smem>>
    %c33 = arith.constant 33 : index
    %831 = memref.load %arg2[%c33] : memref<45xf32, #tpu.memory_space<smem>>
    %c34 = arith.constant 34 : index
    %832 = memref.load %arg2[%c34] : memref<45xf32, #tpu.memory_space<smem>>
    %c35 = arith.constant 35 : index
    %833 = memref.load %arg2[%c35] : memref<45xf32, #tpu.memory_space<smem>>
    %c3_90 = arith.constant 3 : index
    %834 = memref.load %arg3[%c3_90] : memref<5xf32, #tpu.memory_space<smem>>
    %c1_i32_91 = arith.constant 1 : i32
    %835 = tpu.dynamic_rotate %810 by %c1_i32_91 dim 1 : vector<8x128xf32>, i32 -> vector<8x128xf32>
    %c127_i32_92 = arith.constant 127 : i32
    %836 = tpu.dynamic_rotate %810 by %c127_i32_92 dim 1 : vector<8x128xf32>, i32 -> vector<8x128xf32>
    %837 = vector.broadcast %825 : f32 to vector<8x128xf32>
    %838 = arith.mulf %837, %835 : vector<8x128xf32>
    %839 = vector.broadcast %826 : f32 to vector<8x128xf32>
    %840 = arith.mulf %839, %810 : vector<8x128xf32>
    %841 = arith.addf %838, %840 : vector<8x128xf32>
    %842 = vector.broadcast %827 : f32 to vector<8x128xf32>
    %843 = arith.mulf %842, %836 : vector<8x128xf32>
    %844 = arith.addf %841, %843 : vector<8x128xf32>
    %845 = vector.broadcast %828 : f32 to vector<8x128xf32>
    %846 = arith.mulf %845, %835 : vector<8x128xf32>
    %847 = vector.broadcast %829 : f32 to vector<8x128xf32>
    %848 = arith.mulf %847, %810 : vector<8x128xf32>
    %849 = arith.addf %846, %848 : vector<8x128xf32>
    %850 = vector.broadcast %830 : f32 to vector<8x128xf32>
    %851 = arith.mulf %850, %836 : vector<8x128xf32>
    %852 = arith.addf %849, %851 : vector<8x128xf32>
    %c1_i32_93 = arith.constant 1 : i32
    %853 = tpu.dynamic_rotate %812 by %c1_i32_93 dim 1 : vector<8x128xf32>, i32 -> vector<8x128xf32>
    %c127_i32_94 = arith.constant 127 : i32
    %854 = tpu.dynamic_rotate %812 by %c127_i32_94 dim 1 : vector<8x128xf32>, i32 -> vector<8x128xf32>
    %855 = vector.broadcast %825 : f32 to vector<8x128xf32>
    %856 = arith.mulf %855, %853 : vector<8x128xf32>
    %857 = vector.broadcast %826 : f32 to vector<8x128xf32>
    %858 = arith.mulf %857, %812 : vector<8x128xf32>
    %859 = arith.addf %856, %858 : vector<8x128xf32>
    %860 = vector.broadcast %827 : f32 to vector<8x128xf32>
    %861 = arith.mulf %860, %854 : vector<8x128xf32>
    %862 = arith.addf %859, %861 : vector<8x128xf32>
    %863 = vector.broadcast %828 : f32 to vector<8x128xf32>
    %864 = arith.mulf %863, %853 : vector<8x128xf32>
    %865 = vector.broadcast %829 : f32 to vector<8x128xf32>
    %866 = arith.mulf %865, %812 : vector<8x128xf32>
    %867 = arith.addf %864, %866 : vector<8x128xf32>
    %868 = vector.broadcast %830 : f32 to vector<8x128xf32>
    %869 = arith.mulf %868, %854 : vector<8x128xf32>
    %870 = arith.addf %867, %869 : vector<8x128xf32>
    %871 = arith.addf %844, %870 : vector<8x128xf32>
    %872 = vector.broadcast %831 : f32 to vector<8x128xf32>
    %873 = arith.mulf %872, %853 : vector<8x128xf32>
    %874 = vector.broadcast %832 : f32 to vector<8x128xf32>
    %875 = arith.mulf %874, %812 : vector<8x128xf32>
    %876 = arith.addf %873, %875 : vector<8x128xf32>
    %877 = vector.broadcast %833 : f32 to vector<8x128xf32>
    %878 = arith.mulf %877, %854 : vector<8x128xf32>
    %879 = arith.addf %876, %878 : vector<8x128xf32>
    %880 = arith.addf %852, %879 : vector<8x128xf32>
    %c1_i32_95 = arith.constant 1 : i32
    %881 = tpu.dynamic_rotate %814 by %c1_i32_95 dim 1 : vector<8x128xf32>, i32 -> vector<8x128xf32>
    %c127_i32_96 = arith.constant 127 : i32
    %882 = tpu.dynamic_rotate %814 by %c127_i32_96 dim 1 : vector<8x128xf32>, i32 -> vector<8x128xf32>
    %883 = vector.broadcast %825 : f32 to vector<8x128xf32>
    %884 = arith.mulf %883, %881 : vector<8x128xf32>
    %885 = vector.broadcast %826 : f32 to vector<8x128xf32>
    %886 = arith.mulf %885, %814 : vector<8x128xf32>
    %887 = arith.addf %884, %886 : vector<8x128xf32>
    %888 = vector.broadcast %827 : f32 to vector<8x128xf32>
    %889 = arith.mulf %888, %882 : vector<8x128xf32>
    %890 = arith.addf %887, %889 : vector<8x128xf32>
    %891 = vector.broadcast %828 : f32 to vector<8x128xf32>
    %892 = arith.mulf %891, %881 : vector<8x128xf32>
    %893 = vector.broadcast %829 : f32 to vector<8x128xf32>
    %894 = arith.mulf %893, %814 : vector<8x128xf32>
    %895 = arith.addf %892, %894 : vector<8x128xf32>
    %896 = vector.broadcast %830 : f32 to vector<8x128xf32>
    %897 = arith.mulf %896, %882 : vector<8x128xf32>
    %898 = arith.addf %895, %897 : vector<8x128xf32>
    %899 = arith.addf %862, %898 : vector<8x128xf32>
    %900 = vector.broadcast %831 : f32 to vector<8x128xf32>
    %901 = arith.mulf %900, %881 : vector<8x128xf32>
    %902 = vector.broadcast %832 : f32 to vector<8x128xf32>
    %903 = arith.mulf %902, %814 : vector<8x128xf32>
    %904 = arith.addf %901, %903 : vector<8x128xf32>
    %905 = vector.broadcast %833 : f32 to vector<8x128xf32>
    %906 = arith.mulf %905, %882 : vector<8x128xf32>
    %907 = arith.addf %904, %906 : vector<8x128xf32>
    %908 = arith.addf %871, %907 : vector<8x128xf32>
    %c1_i32_97 = arith.constant 1 : i32
    %909 = tpu.dynamic_rotate %816 by %c1_i32_97 dim 1 : vector<8x128xf32>, i32 -> vector<8x128xf32>
    %c127_i32_98 = arith.constant 127 : i32
    %910 = tpu.dynamic_rotate %816 by %c127_i32_98 dim 1 : vector<8x128xf32>, i32 -> vector<8x128xf32>
    %911 = vector.broadcast %825 : f32 to vector<8x128xf32>
    %912 = arith.mulf %911, %909 : vector<8x128xf32>
    %913 = vector.broadcast %826 : f32 to vector<8x128xf32>
    %914 = arith.mulf %913, %816 : vector<8x128xf32>
    %915 = arith.addf %912, %914 : vector<8x128xf32>
    %916 = vector.broadcast %827 : f32 to vector<8x128xf32>
    %917 = arith.mulf %916, %910 : vector<8x128xf32>
    %918 = arith.addf %915, %917 : vector<8x128xf32>
    %919 = vector.broadcast %828 : f32 to vector<8x128xf32>
    %920 = arith.mulf %919, %909 : vector<8x128xf32>
    %921 = vector.broadcast %829 : f32 to vector<8x128xf32>
    %922 = arith.mulf %921, %816 : vector<8x128xf32>
    %923 = arith.addf %920, %922 : vector<8x128xf32>
    %924 = vector.broadcast %830 : f32 to vector<8x128xf32>
    %925 = arith.mulf %924, %910 : vector<8x128xf32>
    %926 = arith.addf %923, %925 : vector<8x128xf32>
    %927 = arith.addf %890, %926 : vector<8x128xf32>
    %928 = vector.broadcast %831 : f32 to vector<8x128xf32>
    %929 = arith.mulf %928, %909 : vector<8x128xf32>
    %930 = vector.broadcast %832 : f32 to vector<8x128xf32>
    %931 = arith.mulf %930, %816 : vector<8x128xf32>
    %932 = arith.addf %929, %931 : vector<8x128xf32>
    %933 = vector.broadcast %833 : f32 to vector<8x128xf32>
    %934 = arith.mulf %933, %910 : vector<8x128xf32>
    %935 = arith.addf %932, %934 : vector<8x128xf32>
    %936 = arith.addf %899, %935 : vector<8x128xf32>
    %c1_i32_99 = arith.constant 1 : i32
    %937 = tpu.dynamic_rotate %818 by %c1_i32_99 dim 1 : vector<8x128xf32>, i32 -> vector<8x128xf32>
    %c127_i32_100 = arith.constant 127 : i32
    %938 = tpu.dynamic_rotate %818 by %c127_i32_100 dim 1 : vector<8x128xf32>, i32 -> vector<8x128xf32>
    %939 = vector.broadcast %825 : f32 to vector<8x128xf32>
    %940 = arith.mulf %939, %937 : vector<8x128xf32>
    %941 = vector.broadcast %826 : f32 to vector<8x128xf32>
    %942 = arith.mulf %941, %818 : vector<8x128xf32>
    %943 = arith.addf %940, %942 : vector<8x128xf32>
    %944 = vector.broadcast %827 : f32 to vector<8x128xf32>
    %945 = arith.mulf %944, %938 : vector<8x128xf32>
    %946 = arith.addf %943, %945 : vector<8x128xf32>
    %947 = vector.broadcast %828 : f32 to vector<8x128xf32>
    %948 = arith.mulf %947, %937 : vector<8x128xf32>
    %949 = vector.broadcast %829 : f32 to vector<8x128xf32>
    %950 = arith.mulf %949, %818 : vector<8x128xf32>
    %951 = arith.addf %948, %950 : vector<8x128xf32>
    %952 = vector.broadcast %830 : f32 to vector<8x128xf32>
    %953 = arith.mulf %952, %938 : vector<8x128xf32>
    %954 = arith.addf %951, %953 : vector<8x128xf32>
    %955 = arith.addf %918, %954 : vector<8x128xf32>
    %956 = vector.broadcast %831 : f32 to vector<8x128xf32>
    %957 = arith.mulf %956, %937 : vector<8x128xf32>
    %958 = vector.broadcast %832 : f32 to vector<8x128xf32>
    %959 = arith.mulf %958, %818 : vector<8x128xf32>
    %960 = arith.addf %957, %959 : vector<8x128xf32>
    %961 = vector.broadcast %833 : f32 to vector<8x128xf32>
    %962 = arith.mulf %961, %938 : vector<8x128xf32>
    %963 = arith.addf %960, %962 : vector<8x128xf32>
    %964 = arith.addf %927, %963 : vector<8x128xf32>
    %c1_i32_101 = arith.constant 1 : i32
    %965 = tpu.dynamic_rotate %820 by %c1_i32_101 dim 1 : vector<8x128xf32>, i32 -> vector<8x128xf32>
    %c127_i32_102 = arith.constant 127 : i32
    %966 = tpu.dynamic_rotate %820 by %c127_i32_102 dim 1 : vector<8x128xf32>, i32 -> vector<8x128xf32>
    %967 = vector.broadcast %825 : f32 to vector<8x128xf32>
    %968 = arith.mulf %967, %965 : vector<8x128xf32>
    %969 = vector.broadcast %826 : f32 to vector<8x128xf32>
    %970 = arith.mulf %969, %820 : vector<8x128xf32>
    %971 = arith.addf %968, %970 : vector<8x128xf32>
    %972 = vector.broadcast %827 : f32 to vector<8x128xf32>
    %973 = arith.mulf %972, %966 : vector<8x128xf32>
    %974 = arith.addf %971, %973 : vector<8x128xf32>
    %975 = vector.broadcast %828 : f32 to vector<8x128xf32>
    %976 = arith.mulf %975, %965 : vector<8x128xf32>
    %977 = vector.broadcast %829 : f32 to vector<8x128xf32>
    %978 = arith.mulf %977, %820 : vector<8x128xf32>
    %979 = arith.addf %976, %978 : vector<8x128xf32>
    %980 = vector.broadcast %830 : f32 to vector<8x128xf32>
    %981 = arith.mulf %980, %966 : vector<8x128xf32>
    %982 = arith.addf %979, %981 : vector<8x128xf32>
    %983 = arith.addf %946, %982 : vector<8x128xf32>
    %984 = vector.broadcast %831 : f32 to vector<8x128xf32>
    %985 = arith.mulf %984, %965 : vector<8x128xf32>
    %986 = vector.broadcast %832 : f32 to vector<8x128xf32>
    %987 = arith.mulf %986, %820 : vector<8x128xf32>
    %988 = arith.addf %985, %987 : vector<8x128xf32>
    %989 = vector.broadcast %833 : f32 to vector<8x128xf32>
    %990 = arith.mulf %989, %966 : vector<8x128xf32>
    %991 = arith.addf %988, %990 : vector<8x128xf32>
    %992 = arith.addf %955, %991 : vector<8x128xf32>
    %c1_i32_103 = arith.constant 1 : i32
    %993 = tpu.dynamic_rotate %822 by %c1_i32_103 dim 1 : vector<8x128xf32>, i32 -> vector<8x128xf32>
    %c127_i32_104 = arith.constant 127 : i32
    %994 = tpu.dynamic_rotate %822 by %c127_i32_104 dim 1 : vector<8x128xf32>, i32 -> vector<8x128xf32>
    %995 = vector.broadcast %825 : f32 to vector<8x128xf32>
    %996 = arith.mulf %995, %993 : vector<8x128xf32>
    %997 = vector.broadcast %826 : f32 to vector<8x128xf32>
    %998 = arith.mulf %997, %822 : vector<8x128xf32>
    %999 = arith.addf %996, %998 : vector<8x128xf32>
    %1000 = vector.broadcast %827 : f32 to vector<8x128xf32>
    %1001 = arith.mulf %1000, %994 : vector<8x128xf32>
    %1002 = arith.addf %999, %1001 : vector<8x128xf32>
    %1003 = vector.broadcast %828 : f32 to vector<8x128xf32>
    %1004 = arith.mulf %1003, %993 : vector<8x128xf32>
    %1005 = vector.broadcast %829 : f32 to vector<8x128xf32>
    %1006 = arith.mulf %1005, %822 : vector<8x128xf32>
    %1007 = arith.addf %1004, %1006 : vector<8x128xf32>
    %1008 = vector.broadcast %830 : f32 to vector<8x128xf32>
    %1009 = arith.mulf %1008, %994 : vector<8x128xf32>
    %1010 = arith.addf %1007, %1009 : vector<8x128xf32>
    %1011 = arith.addf %974, %1010 : vector<8x128xf32>
    %1012 = vector.broadcast %831 : f32 to vector<8x128xf32>
    %1013 = arith.mulf %1012, %993 : vector<8x128xf32>
    %1014 = vector.broadcast %832 : f32 to vector<8x128xf32>
    %1015 = arith.mulf %1014, %822 : vector<8x128xf32>
    %1016 = arith.addf %1013, %1015 : vector<8x128xf32>
    %1017 = vector.broadcast %833 : f32 to vector<8x128xf32>
    %1018 = arith.mulf %1017, %994 : vector<8x128xf32>
    %1019 = arith.addf %1016, %1018 : vector<8x128xf32>
    %1020 = arith.addf %983, %1019 : vector<8x128xf32>
    %c1_i32_105 = arith.constant 1 : i32
    %1021 = tpu.dynamic_rotate %824 by %c1_i32_105 dim 1 : vector<8x128xf32>, i32 -> vector<8x128xf32>
    %c127_i32_106 = arith.constant 127 : i32
    %1022 = tpu.dynamic_rotate %824 by %c127_i32_106 dim 1 : vector<8x128xf32>, i32 -> vector<8x128xf32>
    %1023 = vector.broadcast %828 : f32 to vector<8x128xf32>
    %1024 = arith.mulf %1023, %1021 : vector<8x128xf32>
    %1025 = vector.broadcast %829 : f32 to vector<8x128xf32>
    %1026 = arith.mulf %1025, %824 : vector<8x128xf32>
    %1027 = arith.addf %1024, %1026 : vector<8x128xf32>
    %1028 = vector.broadcast %830 : f32 to vector<8x128xf32>
    %1029 = arith.mulf %1028, %1022 : vector<8x128xf32>
    %1030 = arith.addf %1027, %1029 : vector<8x128xf32>
    %1031 = arith.addf %1002, %1030 : vector<8x128xf32>
    %1032 = vector.broadcast %831 : f32 to vector<8x128xf32>
    %1033 = arith.mulf %1032, %1021 : vector<8x128xf32>
    %1034 = vector.broadcast %832 : f32 to vector<8x128xf32>
    %1035 = arith.mulf %1034, %824 : vector<8x128xf32>
    %1036 = arith.addf %1033, %1035 : vector<8x128xf32>
    %1037 = vector.broadcast %833 : f32 to vector<8x128xf32>
    %1038 = arith.mulf %1037, %1022 : vector<8x128xf32>
    %1039 = arith.addf %1036, %1038 : vector<8x128xf32>
    %1040 = arith.addf %1011, %1039 : vector<8x128xf32>
    %1041 = vector.broadcast %834 : f32 to vector<8x128xf32>
    %1042 = arith.addf %880, %1041 : vector<8x128xf32>
    %1043 = vector.broadcast %4 : vector<1x128xf32> to vector<8x128xf32>
    %1044 = arith.mulf %1042, %1043 : vector<8x128xf32>
    %1045 = vector.broadcast %834 : f32 to vector<8x128xf32>
    %1046 = arith.addf %908, %1045 : vector<8x128xf32>
    %1047 = vector.broadcast %4 : vector<1x128xf32> to vector<8x128xf32>
    %1048 = arith.mulf %1046, %1047 : vector<8x128xf32>
    %1049 = vector.broadcast %834 : f32 to vector<8x128xf32>
    %1050 = arith.addf %936, %1049 : vector<8x128xf32>
    %1051 = vector.broadcast %4 : vector<1x128xf32> to vector<8x128xf32>
    %1052 = arith.mulf %1050, %1051 : vector<8x128xf32>
    %1053 = vector.broadcast %834 : f32 to vector<8x128xf32>
    %1054 = arith.addf %964, %1053 : vector<8x128xf32>
    %1055 = vector.broadcast %4 : vector<1x128xf32> to vector<8x128xf32>
    %1056 = arith.mulf %1054, %1055 : vector<8x128xf32>
    %1057 = vector.broadcast %834 : f32 to vector<8x128xf32>
    %1058 = arith.addf %992, %1057 : vector<8x128xf32>
    %1059 = vector.broadcast %4 : vector<1x128xf32> to vector<8x128xf32>
    %1060 = arith.mulf %1058, %1059 : vector<8x128xf32>
    %1061 = vector.broadcast %834 : f32 to vector<8x128xf32>
    %1062 = arith.addf %1020, %1061 : vector<8x128xf32>
    %1063 = vector.broadcast %4 : vector<1x128xf32> to vector<8x128xf32>
    %1064 = arith.mulf %1062, %1063 : vector<8x128xf32>
    %1065 = vector.broadcast %834 : f32 to vector<8x128xf32>
    %1066 = arith.addf %1040, %1065 : vector<8x128xf32>
    %1067 = vector.broadcast %4 : vector<1x128xf32> to vector<8x128xf32>
    %1068 = arith.mulf %1066, %1067 : vector<8x128xf32>
    %1069 = vector.broadcast %834 : f32 to vector<8x128xf32>
    %1070 = arith.addf %1031, %1069 : vector<8x128xf32>
    %1071 = vector.broadcast %4 : vector<1x128xf32> to vector<8x128xf32>
    %1072 = arith.mulf %1070, %1071 : vector<8x128xf32>
    %cst_107 = arith.constant 0.000000e+00 : f32
    %1073 = vector.broadcast %cst_107 : f32 to vector<8x128xf32>
    %1074 = arith.maximumf %1044, %1073 : vector<8x128xf32>
    %cst_108 = arith.constant 0.000000e+00 : f32
    %1075 = vector.broadcast %cst_108 : f32 to vector<8x128xf32>
    %1076 = arith.maximumf %1048, %1075 : vector<8x128xf32>
    %cst_109 = arith.constant 0.000000e+00 : f32
    %1077 = vector.broadcast %cst_109 : f32 to vector<8x128xf32>
    %1078 = arith.maximumf %1052, %1077 : vector<8x128xf32>
    %cst_110 = arith.constant 0.000000e+00 : f32
    %1079 = vector.broadcast %cst_110 : f32 to vector<8x128xf32>
    %1080 = arith.maximumf %1056, %1079 : vector<8x128xf32>
    %cst_111 = arith.constant 0.000000e+00 : f32
    %1081 = vector.broadcast %cst_111 : f32 to vector<8x128xf32>
    %1082 = arith.maximumf %1060, %1081 : vector<8x128xf32>
    %cst_112 = arith.constant 0.000000e+00 : f32
    %1083 = vector.broadcast %cst_112 : f32 to vector<8x128xf32>
    %1084 = arith.maximumf %1064, %1083 : vector<8x128xf32>
    %cst_113 = arith.constant 0.000000e+00 : f32
    %1085 = vector.broadcast %cst_113 : f32 to vector<8x128xf32>
    %1086 = arith.maximumf %1068, %1085 : vector<8x128xf32>
    %cst_114 = arith.constant 0.000000e+00 : f32
    %1087 = vector.broadcast %cst_114 : f32 to vector<8x128xf32>
    %1088 = arith.maximumf %1072, %1087 : vector<8x128xf32>
    %c36 = arith.constant 36 : index
    %1089 = memref.load %arg2[%c36] : memref<45xf32, #tpu.memory_space<smem>>
    %c37 = arith.constant 37 : index
    %1090 = memref.load %arg2[%c37] : memref<45xf32, #tpu.memory_space<smem>>
    %c38 = arith.constant 38 : index
    %1091 = memref.load %arg2[%c38] : memref<45xf32, #tpu.memory_space<smem>>
    %c39 = arith.constant 39 : index
    %1092 = memref.load %arg2[%c39] : memref<45xf32, #tpu.memory_space<smem>>
    %c40 = arith.constant 40 : index
    %1093 = memref.load %arg2[%c40] : memref<45xf32, #tpu.memory_space<smem>>
    %c41 = arith.constant 41 : index
    %1094 = memref.load %arg2[%c41] : memref<45xf32, #tpu.memory_space<smem>>
    %c42 = arith.constant 42 : index
    %1095 = memref.load %arg2[%c42] : memref<45xf32, #tpu.memory_space<smem>>
    %c43 = arith.constant 43 : index
    %1096 = memref.load %arg2[%c43] : memref<45xf32, #tpu.memory_space<smem>>
    %c44 = arith.constant 44 : index
    %1097 = memref.load %arg2[%c44] : memref<45xf32, #tpu.memory_space<smem>>
    %c4_115 = arith.constant 4 : index
    %1098 = memref.load %arg3[%c4_115] : memref<5xf32, #tpu.memory_space<smem>>
    %c1_i32_116 = arith.constant 1 : i32
    %1099 = tpu.dynamic_rotate %1074 by %c1_i32_116 dim 1 : vector<8x128xf32>, i32 -> vector<8x128xf32>
    %c127_i32_117 = arith.constant 127 : i32
    %1100 = tpu.dynamic_rotate %1074 by %c127_i32_117 dim 1 : vector<8x128xf32>, i32 -> vector<8x128xf32>
    %1101 = vector.broadcast %1089 : f32 to vector<8x128xf32>
    %1102 = arith.mulf %1101, %1099 : vector<8x128xf32>
    %1103 = vector.broadcast %1090 : f32 to vector<8x128xf32>
    %1104 = arith.mulf %1103, %1074 : vector<8x128xf32>
    %1105 = arith.addf %1102, %1104 : vector<8x128xf32>
    %1106 = vector.broadcast %1091 : f32 to vector<8x128xf32>
    %1107 = arith.mulf %1106, %1100 : vector<8x128xf32>
    %1108 = arith.addf %1105, %1107 : vector<8x128xf32>
    %1109 = vector.broadcast %1092 : f32 to vector<8x128xf32>
    %1110 = arith.mulf %1109, %1099 : vector<8x128xf32>
    %1111 = vector.broadcast %1093 : f32 to vector<8x128xf32>
    %1112 = arith.mulf %1111, %1074 : vector<8x128xf32>
    %1113 = arith.addf %1110, %1112 : vector<8x128xf32>
    %1114 = vector.broadcast %1094 : f32 to vector<8x128xf32>
    %1115 = arith.mulf %1114, %1100 : vector<8x128xf32>
    %1116 = arith.addf %1113, %1115 : vector<8x128xf32>
    %c1_i32_118 = arith.constant 1 : i32
    %1117 = tpu.dynamic_rotate %1076 by %c1_i32_118 dim 1 : vector<8x128xf32>, i32 -> vector<8x128xf32>
    %c127_i32_119 = arith.constant 127 : i32
    %1118 = tpu.dynamic_rotate %1076 by %c127_i32_119 dim 1 : vector<8x128xf32>, i32 -> vector<8x128xf32>
    %1119 = vector.broadcast %1089 : f32 to vector<8x128xf32>
    %1120 = arith.mulf %1119, %1117 : vector<8x128xf32>
    %1121 = vector.broadcast %1090 : f32 to vector<8x128xf32>
    %1122 = arith.mulf %1121, %1076 : vector<8x128xf32>
    %1123 = arith.addf %1120, %1122 : vector<8x128xf32>
    %1124 = vector.broadcast %1091 : f32 to vector<8x128xf32>
    %1125 = arith.mulf %1124, %1118 : vector<8x128xf32>
    %1126 = arith.addf %1123, %1125 : vector<8x128xf32>
    %1127 = vector.broadcast %1092 : f32 to vector<8x128xf32>
    %1128 = arith.mulf %1127, %1117 : vector<8x128xf32>
    %1129 = vector.broadcast %1093 : f32 to vector<8x128xf32>
    %1130 = arith.mulf %1129, %1076 : vector<8x128xf32>
    %1131 = arith.addf %1128, %1130 : vector<8x128xf32>
    %1132 = vector.broadcast %1094 : f32 to vector<8x128xf32>
    %1133 = arith.mulf %1132, %1118 : vector<8x128xf32>
    %1134 = arith.addf %1131, %1133 : vector<8x128xf32>
    %1135 = arith.addf %1108, %1134 : vector<8x128xf32>
    %1136 = vector.broadcast %1095 : f32 to vector<8x128xf32>
    %1137 = arith.mulf %1136, %1117 : vector<8x128xf32>
    %1138 = vector.broadcast %1096 : f32 to vector<8x128xf32>
    %1139 = arith.mulf %1138, %1076 : vector<8x128xf32>
    %1140 = arith.addf %1137, %1139 : vector<8x128xf32>
    %1141 = vector.broadcast %1097 : f32 to vector<8x128xf32>
    %1142 = arith.mulf %1141, %1118 : vector<8x128xf32>
    %1143 = arith.addf %1140, %1142 : vector<8x128xf32>
    %1144 = arith.addf %1116, %1143 : vector<8x128xf32>
    %c1_i32_120 = arith.constant 1 : i32
    %1145 = tpu.dynamic_rotate %1078 by %c1_i32_120 dim 1 : vector<8x128xf32>, i32 -> vector<8x128xf32>
    %c127_i32_121 = arith.constant 127 : i32
    %1146 = tpu.dynamic_rotate %1078 by %c127_i32_121 dim 1 : vector<8x128xf32>, i32 -> vector<8x128xf32>
    %1147 = vector.broadcast %1089 : f32 to vector<8x128xf32>
    %1148 = arith.mulf %1147, %1145 : vector<8x128xf32>
    %1149 = vector.broadcast %1090 : f32 to vector<8x128xf32>
    %1150 = arith.mulf %1149, %1078 : vector<8x128xf32>
    %1151 = arith.addf %1148, %1150 : vector<8x128xf32>
    %1152 = vector.broadcast %1091 : f32 to vector<8x128xf32>
    %1153 = arith.mulf %1152, %1146 : vector<8x128xf32>
    %1154 = arith.addf %1151, %1153 : vector<8x128xf32>
    %1155 = vector.broadcast %1092 : f32 to vector<8x128xf32>
    %1156 = arith.mulf %1155, %1145 : vector<8x128xf32>
    %1157 = vector.broadcast %1093 : f32 to vector<8x128xf32>
    %1158 = arith.mulf %1157, %1078 : vector<8x128xf32>
    %1159 = arith.addf %1156, %1158 : vector<8x128xf32>
    %1160 = vector.broadcast %1094 : f32 to vector<8x128xf32>
    %1161 = arith.mulf %1160, %1146 : vector<8x128xf32>
    %1162 = arith.addf %1159, %1161 : vector<8x128xf32>
    %1163 = arith.addf %1126, %1162 : vector<8x128xf32>
    %1164 = vector.broadcast %1095 : f32 to vector<8x128xf32>
    %1165 = arith.mulf %1164, %1145 : vector<8x128xf32>
    %1166 = vector.broadcast %1096 : f32 to vector<8x128xf32>
    %1167 = arith.mulf %1166, %1078 : vector<8x128xf32>
    %1168 = arith.addf %1165, %1167 : vector<8x128xf32>
    %1169 = vector.broadcast %1097 : f32 to vector<8x128xf32>
    %1170 = arith.mulf %1169, %1146 : vector<8x128xf32>
    %1171 = arith.addf %1168, %1170 : vector<8x128xf32>
    %1172 = arith.addf %1135, %1171 : vector<8x128xf32>
    %c1_i32_122 = arith.constant 1 : i32
    %1173 = tpu.dynamic_rotate %1080 by %c1_i32_122 dim 1 : vector<8x128xf32>, i32 -> vector<8x128xf32>
    %c127_i32_123 = arith.constant 127 : i32
    %1174 = tpu.dynamic_rotate %1080 by %c127_i32_123 dim 1 : vector<8x128xf32>, i32 -> vector<8x128xf32>
    %1175 = vector.broadcast %1089 : f32 to vector<8x128xf32>
    %1176 = arith.mulf %1175, %1173 : vector<8x128xf32>
    %1177 = vector.broadcast %1090 : f32 to vector<8x128xf32>
    %1178 = arith.mulf %1177, %1080 : vector<8x128xf32>
    %1179 = arith.addf %1176, %1178 : vector<8x128xf32>
    %1180 = vector.broadcast %1091 : f32 to vector<8x128xf32>
    %1181 = arith.mulf %1180, %1174 : vector<8x128xf32>
    %1182 = arith.addf %1179, %1181 : vector<8x128xf32>
    %1183 = vector.broadcast %1092 : f32 to vector<8x128xf32>
    %1184 = arith.mulf %1183, %1173 : vector<8x128xf32>
    %1185 = vector.broadcast %1093 : f32 to vector<8x128xf32>
    %1186 = arith.mulf %1185, %1080 : vector<8x128xf32>
    %1187 = arith.addf %1184, %1186 : vector<8x128xf32>
    %1188 = vector.broadcast %1094 : f32 to vector<8x128xf32>
    %1189 = arith.mulf %1188, %1174 : vector<8x128xf32>
    %1190 = arith.addf %1187, %1189 : vector<8x128xf32>
    %1191 = arith.addf %1154, %1190 : vector<8x128xf32>
    %1192 = vector.broadcast %1095 : f32 to vector<8x128xf32>
    %1193 = arith.mulf %1192, %1173 : vector<8x128xf32>
    %1194 = vector.broadcast %1096 : f32 to vector<8x128xf32>
    %1195 = arith.mulf %1194, %1080 : vector<8x128xf32>
    %1196 = arith.addf %1193, %1195 : vector<8x128xf32>
    %1197 = vector.broadcast %1097 : f32 to vector<8x128xf32>
    %1198 = arith.mulf %1197, %1174 : vector<8x128xf32>
    %1199 = arith.addf %1196, %1198 : vector<8x128xf32>
    %1200 = arith.addf %1163, %1199 : vector<8x128xf32>
    %c1_i32_124 = arith.constant 1 : i32
    %1201 = tpu.dynamic_rotate %1082 by %c1_i32_124 dim 1 : vector<8x128xf32>, i32 -> vector<8x128xf32>
    %c127_i32_125 = arith.constant 127 : i32
    %1202 = tpu.dynamic_rotate %1082 by %c127_i32_125 dim 1 : vector<8x128xf32>, i32 -> vector<8x128xf32>
    %1203 = vector.broadcast %1089 : f32 to vector<8x128xf32>
    %1204 = arith.mulf %1203, %1201 : vector<8x128xf32>
    %1205 = vector.broadcast %1090 : f32 to vector<8x128xf32>
    %1206 = arith.mulf %1205, %1082 : vector<8x128xf32>
    %1207 = arith.addf %1204, %1206 : vector<8x128xf32>
    %1208 = vector.broadcast %1091 : f32 to vector<8x128xf32>
    %1209 = arith.mulf %1208, %1202 : vector<8x128xf32>
    %1210 = arith.addf %1207, %1209 : vector<8x128xf32>
    %1211 = vector.broadcast %1092 : f32 to vector<8x128xf32>
    %1212 = arith.mulf %1211, %1201 : vector<8x128xf32>
    %1213 = vector.broadcast %1093 : f32 to vector<8x128xf32>
    %1214 = arith.mulf %1213, %1082 : vector<8x128xf32>
    %1215 = arith.addf %1212, %1214 : vector<8x128xf32>
    %1216 = vector.broadcast %1094 : f32 to vector<8x128xf32>
    %1217 = arith.mulf %1216, %1202 : vector<8x128xf32>
    %1218 = arith.addf %1215, %1217 : vector<8x128xf32>
    %1219 = arith.addf %1182, %1218 : vector<8x128xf32>
    %1220 = vector.broadcast %1095 : f32 to vector<8x128xf32>
    %1221 = arith.mulf %1220, %1201 : vector<8x128xf32>
    %1222 = vector.broadcast %1096 : f32 to vector<8x128xf32>
    %1223 = arith.mulf %1222, %1082 : vector<8x128xf32>
    %1224 = arith.addf %1221, %1223 : vector<8x128xf32>
    %1225 = vector.broadcast %1097 : f32 to vector<8x128xf32>
    %1226 = arith.mulf %1225, %1202 : vector<8x128xf32>
    %1227 = arith.addf %1224, %1226 : vector<8x128xf32>
    %1228 = arith.addf %1191, %1227 : vector<8x128xf32>
    %c1_i32_126 = arith.constant 1 : i32
    %1229 = tpu.dynamic_rotate %1084 by %c1_i32_126 dim 1 : vector<8x128xf32>, i32 -> vector<8x128xf32>
    %c127_i32_127 = arith.constant 127 : i32
    %1230 = tpu.dynamic_rotate %1084 by %c127_i32_127 dim 1 : vector<8x128xf32>, i32 -> vector<8x128xf32>
    %1231 = vector.broadcast %1089 : f32 to vector<8x128xf32>
    %1232 = arith.mulf %1231, %1229 : vector<8x128xf32>
    %1233 = vector.broadcast %1090 : f32 to vector<8x128xf32>
    %1234 = arith.mulf %1233, %1084 : vector<8x128xf32>
    %1235 = arith.addf %1232, %1234 : vector<8x128xf32>
    %1236 = vector.broadcast %1091 : f32 to vector<8x128xf32>
    %1237 = arith.mulf %1236, %1230 : vector<8x128xf32>
    %1238 = arith.addf %1235, %1237 : vector<8x128xf32>
    %1239 = vector.broadcast %1092 : f32 to vector<8x128xf32>
    %1240 = arith.mulf %1239, %1229 : vector<8x128xf32>
    %1241 = vector.broadcast %1093 : f32 to vector<8x128xf32>
    %1242 = arith.mulf %1241, %1084 : vector<8x128xf32>
    %1243 = arith.addf %1240, %1242 : vector<8x128xf32>
    %1244 = vector.broadcast %1094 : f32 to vector<8x128xf32>
    %1245 = arith.mulf %1244, %1230 : vector<8x128xf32>
    %1246 = arith.addf %1243, %1245 : vector<8x128xf32>
    %1247 = arith.addf %1210, %1246 : vector<8x128xf32>
    %1248 = vector.broadcast %1095 : f32 to vector<8x128xf32>
    %1249 = arith.mulf %1248, %1229 : vector<8x128xf32>
    %1250 = vector.broadcast %1096 : f32 to vector<8x128xf32>
    %1251 = arith.mulf %1250, %1084 : vector<8x128xf32>
    %1252 = arith.addf %1249, %1251 : vector<8x128xf32>
    %1253 = vector.broadcast %1097 : f32 to vector<8x128xf32>
    %1254 = arith.mulf %1253, %1230 : vector<8x128xf32>
    %1255 = arith.addf %1252, %1254 : vector<8x128xf32>
    %1256 = arith.addf %1219, %1255 : vector<8x128xf32>
    %c1_i32_128 = arith.constant 1 : i32
    %1257 = tpu.dynamic_rotate %1086 by %c1_i32_128 dim 1 : vector<8x128xf32>, i32 -> vector<8x128xf32>
    %c127_i32_129 = arith.constant 127 : i32
    %1258 = tpu.dynamic_rotate %1086 by %c127_i32_129 dim 1 : vector<8x128xf32>, i32 -> vector<8x128xf32>
    %1259 = vector.broadcast %1089 : f32 to vector<8x128xf32>
    %1260 = arith.mulf %1259, %1257 : vector<8x128xf32>
    %1261 = vector.broadcast %1090 : f32 to vector<8x128xf32>
    %1262 = arith.mulf %1261, %1086 : vector<8x128xf32>
    %1263 = arith.addf %1260, %1262 : vector<8x128xf32>
    %1264 = vector.broadcast %1091 : f32 to vector<8x128xf32>
    %1265 = arith.mulf %1264, %1258 : vector<8x128xf32>
    %1266 = arith.addf %1263, %1265 : vector<8x128xf32>
    %1267 = vector.broadcast %1092 : f32 to vector<8x128xf32>
    %1268 = arith.mulf %1267, %1257 : vector<8x128xf32>
    %1269 = vector.broadcast %1093 : f32 to vector<8x128xf32>
    %1270 = arith.mulf %1269, %1086 : vector<8x128xf32>
    %1271 = arith.addf %1268, %1270 : vector<8x128xf32>
    %1272 = vector.broadcast %1094 : f32 to vector<8x128xf32>
    %1273 = arith.mulf %1272, %1258 : vector<8x128xf32>
    %1274 = arith.addf %1271, %1273 : vector<8x128xf32>
    %1275 = arith.addf %1238, %1274 : vector<8x128xf32>
    %1276 = vector.broadcast %1095 : f32 to vector<8x128xf32>
    %1277 = arith.mulf %1276, %1257 : vector<8x128xf32>
    %1278 = vector.broadcast %1096 : f32 to vector<8x128xf32>
    %1279 = arith.mulf %1278, %1086 : vector<8x128xf32>
    %1280 = arith.addf %1277, %1279 : vector<8x128xf32>
    %1281 = vector.broadcast %1097 : f32 to vector<8x128xf32>
    %1282 = arith.mulf %1281, %1258 : vector<8x128xf32>
    %1283 = arith.addf %1280, %1282 : vector<8x128xf32>
    %1284 = arith.addf %1247, %1283 : vector<8x128xf32>
    %c1_i32_130 = arith.constant 1 : i32
    %1285 = tpu.dynamic_rotate %1088 by %c1_i32_130 dim 1 : vector<8x128xf32>, i32 -> vector<8x128xf32>
    %c127_i32_131 = arith.constant 127 : i32
    %1286 = tpu.dynamic_rotate %1088 by %c127_i32_131 dim 1 : vector<8x128xf32>, i32 -> vector<8x128xf32>
    %1287 = vector.broadcast %1092 : f32 to vector<8x128xf32>
    %1288 = arith.mulf %1287, %1285 : vector<8x128xf32>
    %1289 = vector.broadcast %1093 : f32 to vector<8x128xf32>
    %1290 = arith.mulf %1289, %1088 : vector<8x128xf32>
    %1291 = arith.addf %1288, %1290 : vector<8x128xf32>
    %1292 = vector.broadcast %1094 : f32 to vector<8x128xf32>
    %1293 = arith.mulf %1292, %1286 : vector<8x128xf32>
    %1294 = arith.addf %1291, %1293 : vector<8x128xf32>
    %1295 = arith.addf %1266, %1294 : vector<8x128xf32>
    %1296 = vector.broadcast %1095 : f32 to vector<8x128xf32>
    %1297 = arith.mulf %1296, %1285 : vector<8x128xf32>
    %1298 = vector.broadcast %1096 : f32 to vector<8x128xf32>
    %1299 = arith.mulf %1298, %1088 : vector<8x128xf32>
    %1300 = arith.addf %1297, %1299 : vector<8x128xf32>
    %1301 = vector.broadcast %1097 : f32 to vector<8x128xf32>
    %1302 = arith.mulf %1301, %1286 : vector<8x128xf32>
    %1303 = arith.addf %1300, %1302 : vector<8x128xf32>
    %1304 = arith.addf %1275, %1303 : vector<8x128xf32>
    %1305 = vector.broadcast %1098 : f32 to vector<8x128xf32>
    %1306 = arith.addf %1144, %1305 : vector<8x128xf32>
    %1307 = vector.broadcast %4 : vector<1x128xf32> to vector<8x128xf32>
    %1308 = arith.mulf %1306, %1307 : vector<8x128xf32>
    %1309 = vector.broadcast %1098 : f32 to vector<8x128xf32>
    %1310 = arith.addf %1172, %1309 : vector<8x128xf32>
    %1311 = vector.broadcast %4 : vector<1x128xf32> to vector<8x128xf32>
    %1312 = arith.mulf %1310, %1311 : vector<8x128xf32>
    %1313 = vector.broadcast %1098 : f32 to vector<8x128xf32>
    %1314 = arith.addf %1200, %1313 : vector<8x128xf32>
    %1315 = vector.broadcast %4 : vector<1x128xf32> to vector<8x128xf32>
    %1316 = arith.mulf %1314, %1315 : vector<8x128xf32>
    %1317 = vector.broadcast %1098 : f32 to vector<8x128xf32>
    %1318 = arith.addf %1228, %1317 : vector<8x128xf32>
    %1319 = vector.broadcast %4 : vector<1x128xf32> to vector<8x128xf32>
    %1320 = arith.mulf %1318, %1319 : vector<8x128xf32>
    %1321 = vector.broadcast %1098 : f32 to vector<8x128xf32>
    %1322 = arith.addf %1256, %1321 : vector<8x128xf32>
    %1323 = vector.broadcast %4 : vector<1x128xf32> to vector<8x128xf32>
    %1324 = arith.mulf %1322, %1323 : vector<8x128xf32>
    %1325 = vector.broadcast %1098 : f32 to vector<8x128xf32>
    %1326 = arith.addf %1284, %1325 : vector<8x128xf32>
    %1327 = vector.broadcast %4 : vector<1x128xf32> to vector<8x128xf32>
    %1328 = arith.mulf %1326, %1327 : vector<8x128xf32>
    %1329 = vector.broadcast %1098 : f32 to vector<8x128xf32>
    %1330 = arith.addf %1304, %1329 : vector<8x128xf32>
    %1331 = vector.broadcast %4 : vector<1x128xf32> to vector<8x128xf32>
    %1332 = arith.mulf %1330, %1331 : vector<8x128xf32>
    %1333 = vector.broadcast %1098 : f32 to vector<8x128xf32>
    %1334 = arith.addf %1295, %1333 : vector<8x128xf32>
    %1335 = vector.broadcast %4 : vector<1x128xf32> to vector<8x128xf32>
    %1336 = arith.mulf %1334, %1335 : vector<8x128xf32>
    %1337 = arith.index_cast %8 : i32 to index
    %c0_132 = arith.constant 0 : index
    %1338 = vector.load %arg9[%1337, %c0_132] : memref<8x1024xf32, #tpu.memory_space<vmem>>, vector<8x128xf32>
    tpu.vector_store %arg9[%1337, %c0_132], %1308 {strides = array<i32>} : memref<8x1024xf32, #tpu.memory_space<vmem>>, vector<8x128xf32>,
    %1339 = arith.index_cast %8 : i32 to index
    %c128 = arith.constant 128 : index
    %1340 = vector.load %arg9[%1339, %c128] : memref<8x1024xf32, #tpu.memory_space<vmem>>, vector<8x128xf32>
    tpu.vector_store %arg9[%1339, %c128], %1312 {strides = array<i32>} : memref<8x1024xf32, #tpu.memory_space<vmem>>, vector<8x128xf32>,
    %1341 = arith.index_cast %8 : i32 to index
    %c256 = arith.constant 256 : index
    %1342 = vector.load %arg9[%1341, %c256] : memref<8x1024xf32, #tpu.memory_space<vmem>>, vector<8x128xf32>
    tpu.vector_store %arg9[%1341, %c256], %1316 {strides = array<i32>} : memref<8x1024xf32, #tpu.memory_space<vmem>>, vector<8x128xf32>,
    %1343 = arith.index_cast %8 : i32 to index
    %c384 = arith.constant 384 : index
    %1344 = vector.load %arg9[%1343, %c384] : memref<8x1024xf32, #tpu.memory_space<vmem>>, vector<8x128xf32>
    tpu.vector_store %arg9[%1343, %c384], %1320 {strides = array<i32>} : memref<8x1024xf32, #tpu.memory_space<vmem>>, vector<8x128xf32>,
    %1345 = arith.index_cast %8 : i32 to index
    %c512 = arith.constant 512 : index
    %1346 = vector.load %arg9[%1345, %c512] : memref<8x1024xf32, #tpu.memory_space<vmem>>, vector<8x128xf32>
    tpu.vector_store %arg9[%1345, %c512], %1324 {strides = array<i32>} : memref<8x1024xf32, #tpu.memory_space<vmem>>, vector<8x128xf32>,
    %1347 = arith.index_cast %8 : i32 to index
    %c640 = arith.constant 640 : index
    %1348 = vector.load %arg9[%1347, %c640] : memref<8x1024xf32, #tpu.memory_space<vmem>>, vector<8x128xf32>
    tpu.vector_store %arg9[%1347, %c640], %1328 {strides = array<i32>} : memref<8x1024xf32, #tpu.memory_space<vmem>>, vector<8x128xf32>,
    %1349 = arith.index_cast %8 : i32 to index
    %c768 = arith.constant 768 : index
    %1350 = vector.load %arg9[%1349, %c768] : memref<8x1024xf32, #tpu.memory_space<vmem>>, vector<8x128xf32>
    tpu.vector_store %arg9[%1349, %c768], %1332 {strides = array<i32>} : memref<8x1024xf32, #tpu.memory_space<vmem>>, vector<8x128xf32>,
    %1351 = arith.index_cast %8 : i32 to index
    %c896 = arith.constant 896 : index
    %1352 = vector.load %arg9[%1351, %c896] : memref<8x1024xf32, #tpu.memory_space<vmem>>, vector<8x128xf32>
    tpu.vector_store %arg9[%1351, %c896], %1336 {strides = array<i32>} : memref<8x1024xf32, #tpu.memory_space<vmem>>, vector<8x128xf32>,
    %c1_i32_133 = arith.constant 1 : i32
    %c0_134 = arith.constant 0 : index
    %c0_135 = arith.constant 0 : index
    %1353 = vector.load %arg9[%c0_134, %c0_135] : memref<8x1024xf32, #tpu.memory_space<vmem>>, vector<8x1024xf32>
    %c0_136 = arith.constant 0 : index
    %c0_137 = arith.constant 0 : index
    %1354 = vector.load %arg4[%c0_136, %c0_137] : memref<1024x64xf32, #tpu.memory_space<vmem>>, vector<1024x64xf32>
    %cst_138 = arith.constant dense<0.000000e+00> : vector<8x64xf32>
    %1355 = tpu.matmul %1353, %1354, %cst_138 {dimension_numbers = #tpu.dot_dimension_numbers<[1], [0], [0], [1], [0, 0, 1, 1], [], []>} : vector<8x1024xf32>, vector<1024x64xf32>, vector<8x64xf32> -> vector<8x64xf32>
    %c0_139 = arith.constant 0 : index
    %c0_140 = arith.constant 0 : index
    %1356 = vector.load %arg5[%c0_139, %c0_140] : memref<1x64xf32, #tpu.memory_space<vmem>>, vector<1x64xf32>
    %1357 = vector.broadcast %1356 : vector<1x64xf32> to vector<8x64xf32>
    %1358 = arith.addf %1355, %1357 : vector<8x64xf32>
    %cst_141 = arith.constant 0.000000e+00 : f32
    %1359 = vector.broadcast %cst_141 : f32 to vector<8x64xf32>
    %1360 = arith.maximumf %1358, %1359 : vector<8x64xf32>
    %c0_142 = arith.constant 0 : index
    %c0_143 = arith.constant 0 : index
    %1361 = vector.load %arg6[%c0_142, %c0_143] : memref<1x64xf32, #tpu.memory_space<vmem>>, vector<1x64xf32>
    %1362 = vector.broadcast %1361 : vector<1x64xf32> to vector<8x64xf32>
    %1363 = arith.mulf %1360, %1362 : vector<8x64xf32>
    %cst_144 = arith.constant dense<0.000000e+00> : vector<8xf32>
    %1364 = vector.multi_reduction <add>, %1363, %cst_144 [1] : vector<8x64xf32> to vector<8xf32>
    %c0_145 = arith.constant 0 : index
    %1365 = memref.load %arg7[%c0_145] : memref<1xf32, #tpu.memory_space<smem>>
    %1366 = vector.broadcast %1365 : f32 to vector<8xf32>
    %1367 = arith.addf %1364, %1366 : vector<8xf32>
    %1368 = vector.shape_cast %1367 : vector<8xf32> to vector<1x1x8xf32>
    %c0_146 = arith.constant 0 : index
    %c0_147 = arith.constant 0 : index
    %c0_148 = arith.constant 0 : index
    %1369 = vector.load %arg8[%c0_146, %c0_147, %c0_148] : memref<1x1x8xf32, #tpu.memory_space<vmem>>, vector<1x1x8xf32>
    tpu.vector_store %arg8[%c0_146, %c0_147, %c0_148], %1368 {strides = array<i32>} : memref<1x1x8xf32, #tpu.memory_space<vmem>>, vector<1x1x8xf32>,
    return
  }
  func.func @transform_0(%arg0: i32) -> (i32, i32, i32) {
    %c0_i32 = arith.constant 0 : i32
    %c0_i32_0 = arith.constant 0 : i32
    %c0_i32_1 = arith.constant 0 : i32
    return %c0_i32, %arg0, %c0_i32_0 : i32, i32, i32
  }
  func.func @transform_1(%arg0: i32) -> i32 {
    %c0_i32 = arith.constant 0 : i32
    %c0_i32_0 = arith.constant 0 : i32
    return %c0_i32 : i32
  }
  func.func @transform_2(%arg0: i32) -> i32 {
    %c0_i32 = arith.constant 0 : i32
    %c0_i32_0 = arith.constant 0 : i32
    return %c0_i32 : i32
  }
  func.func @transform_3(%arg0: i32) -> (i32, i32) {
    %c0_i32 = arith.constant 0 : i32
    %c0_i32_0 = arith.constant 0 : i32
    %c0_i32_1 = arith.constant 0 : i32
    return %c0_i32, %c0_i32_0 : i32, i32
  }
  func.func @transform_4(%arg0: i32) -> (i32, i32) {
    %c0_i32 = arith.constant 0 : i32
    %c0_i32_0 = arith.constant 0 : i32
    %c0_i32_1 = arith.constant 0 : i32
    return %c0_i32, %c0_i32_0 : i32, i32
  }
  func.func @transform_5(%arg0: i32) -> (i32, i32) {
    %c0_i32 = arith.constant 0 : i32
    %c0_i32_0 = arith.constant 0 : i32
    %c0_i32_1 = arith.constant 0 : i32
    return %c0_i32, %c0_i32_0 : i32, i32
  }
  func.func @transform_6(%arg0: i32) -> i32 {
    %c0_i32 = arith.constant 0 : i32
    %c0_i32_0 = arith.constant 0 : i32
    return %c0_i32 : i32
  }
  func.func @transform_7(%arg0: i32) -> (i32, i32, i32) {
    %c0_i32 = arith.constant 0 : i32
    %c0_i32_0 = arith.constant 0 : i32
    %c0_i32_1 = arith.constant 0 : i32
    return %arg0, %c0_i32, %c0_i32_0 : i32, i32, i32
  }
}

</mosaic_0001>

<bundles_post_ra>
// kernel: tpu_custom_call.1
= control target key start
LH: loop header
LB: loop body
LE: loop exit
PB: predicated region body
PF: predicated region fallthrough
CT: control target
= control target key end

     0   :  { %13 = vsyncpa [#allocation6], 0  ;;  %s2979_s0 = inlined_call_operand.vmem [shape: f32[8,8,128], index: 0, kind: input, shape index: {}]   ;;  %s2980_s1 = inlined_call_operand.vmem [shape: f32[45], index: 1, kind: input, shape index: {}]   ;;  %s2981_s2 = inlined_call_operand.vmem [shape: f32[5], index: 2, kind: input, shape index: {}]   ;;  %s2982_s3 = inlined_call_operand.vmem [shape: f32[1024,64], index: 3, kind: input, shape index: {}]   ;;  %s2983_s4 = inlined_call_operand.vmem [shape: f32[1,64], index: 4, kind: input, shape index: {}]   ;;  %s2984_s5 = inlined_call_operand.vmem [shape: f32[1,64], index: 5, kind: input, shape index: {}]   ;;  %s2985_s6 = inlined_call_operand.<no memory space> [shape: f32[1], index: 6, kind: input, shape index: {}]   ;;  %s2986_s7 = inlined_call_operand.hbm [shape: f32[1,1,8], index: 7, kind: output, shape index: {}]  }
   0x1   :  { %14 = vsyncpa [#allocation8], 0 }
   0x2   :  { %15 = vsyncpa [#allocation5], 0  ;;  %s23_s26 = sshll.u32 %s2980_s1, 4  ;;  %s32_s29 = sshll.u32 %s2981_s2, 4  ;;  %s24_s26 = int_to_ptr.vmem [resolvable:$true] %s23_s26  ;;  %s33_s29 = int_to_ptr.vmem [resolvable:$true] %s32_s29 }
   0x3   :  { %s1544_s30 = smov [#allocation4]   ;;  %s1545_s8 = smov [#allocation7]  }
   0x4   :  { %26 = dma.vmem_to_smem %s24_s26, 16, %s1544_s30, [#allocation6]  }
   0x5   :  { %35 = dma.vmem_to_smem %s33_s29, 16, %s1545_s8, [#allocation8]  }
   0x6   :  { %1538 = dma.done.wait [#allocation6], 16  }
   0x7   :  { %1539 = vsyncadd [#allocation6], 4294967280 }
   0x8   :  { %1540 = dma.done.wait [#allocation8], 16  }
   0x9   :  { %1541 = vsyncadd [#allocation8], 4294967280 }
   0xa   :  { %52 = sfence }
   0xb   :  { %v1428_v0 = vld [vmem:[%s2979_s0 + $0x10] sm:$0xff]  ;;  %v58_v1 = vld [vmem:[%s2979_s0] sm:$0xff]  ;;  %s1546_s12 = smov 1   ;;  %v1427_v2 = vld [vmem:[%s2979_s0 + $0x8] sm:$0xff]  ;;  %s1547_s14 = smov 127   ;;  %v53_v14 = vlaneseq  ;;  %vm1389_vm1 = vcmask 523264  }
   0xc   :  { %134 = vrot.lane.b32.xlu1 %v1428_v0, %s1546_s12  ;;  %90 = vrot.lane.b32.xlu0 %v58_v1, %s1546_s12  ;;  %v1614_v3 = vld [vmem:[%s2979_s0 + $0x18] sm:$0xff]  ;;  %v1623_v4 = vld [vmem:[%s2979_s0 + $0x20] sm:$0xff]  ;;  %s1435_s25 = sld [smem:[#allocation4 + $0x2]]  ;;  %vm1399_vm2 = vcmask 57344  }
   0xd   :  { %112 = vrot.lane.b32.xlu2 %v1427_v2, %s1547_s14  ;;  %v1630_v5 = vld [vmem:[%s2979_s0 + $0x28] sm:$0xff]  ;;  %v1641_v6 = vld [vmem:[%s2979_s0 + $0x30] sm:$0xff]  ;;  %v1650_v7 = vld [vmem:[%s2979_s0 + $0x38] sm:$0xff]  ;;  %s1438_s26 = sld [smem:[#allocation4 + $0x5]]  ;;  %v1692_v31 = vand.u32 127, %v53_v14 }
   0xe   :  { %s1441_s27 = sld [smem:[#allocation4 + $0x8]] }
   0xf   :  { %s80_s28 = sld [smem:[#allocation4]]  ;;  %vm55_vm0 = vcmp.lt.s32.totalorder %v1692_v31, 90 }
  0x10   :  { %s1434_s29 = sld [smem:[#allocation4 + $0x1]] }
  0x11   :  { %s1437_s30 = sld [smem:[#allocation4 + $0x4]] }
  0x12   :  { %s1440_s8 = sld [smem:[#allocation4 + $0x7]]  ;;  %v1666_v15 = vstv %s1435_s25 }
  0x13   :  { %s1439_s9 = sld [smem:[#allocation4 + $0x6]]  ;;  %v1668_v16 = vstv %s1438_s26 }
  0x14   :  { %92 = vrot.lane.b32.xlu1 %v58_v1, %s1547_s14  ;;  %110 = vrot.lane.b32.xlu0 %v1427_v2, %s1546_s12  ;;  %s1436_s10 = sld [smem:[#allocation4 + $0x3]]  ;;  %v1674_v19 = vstv %s1441_s27 }
  0x15   :  { %136 = vrot.lane.b32.xlu2 %v1428_v0, %s1547_s14  ;;  %s1660_s0 = sld [smem:[#allocation7]]  ;;  %v1670_v17 = vstv %s80_s28 }
  0x16   :  { %v1658_v11 = vstv %s1434_s29  ;;  %s1443_s1 = sld [smem:[#allocation4 + $0xa]] }
  0x17   :  { %v1662_v12 = vstv %s1437_s30  ;;  %v1679_v21 = vmul.f32 %v1428_v0, %v1658_v11  ;;  %v97_v22 = vmul.f32 %v1658_v11, %v58_v1  ;;  %v115_v39 = vmul.f32 %v1427_v2, %v1658_v11  ;;  %s1446_s11 = sld [smem:[#allocation4 + $0xd]] }
  0x18   :  { %v1664_v13 = vstv %s1440_s8  ;;  %v144_v25 = vmul.f32 %v1428_v0, %v1662_v12  ;;  %v105_v27 = vmul.f32 %v1662_v12, %v58_v1  ;;  %v120_v30 = vmul.f32 %v1427_v2, %v1662_v12  ;;  %s1449_s2 = sld [smem:[#allocation4 + $0x10]] }
  0x19   :  { %v1672_v18 = vstv %s1439_s9  ;;  %v150_v26 = vmul.f32 %v1428_v0, %v1664_v13  ;;  %v128_v36 = vmul.f32 %v1427_v2, %v1664_v13  ;;  %v160_v59 = vmul.f32 %v1614_v3, %v1658_v11  ;;  %s1442_s13 = sld [smem:[#allocation4 + $0x9]] }
  0x1a   :  { %v1676_v20 = vstv %s1436_s10  ;;  %v165_v60 = vmul.f32 %v1614_v3, %v1662_v12  ;;  %v171_v63 = vmul.f32 %v1614_v3, %v1664_v13  ;;  %v1548_v0 = vmov 0.0   ;;  %s1445_s15 = sld [smem:[#allocation4 + $0xc]] }
  0x1b   :  { %v1706_v44 = vstv %s1660_s0  ;;  %v1722_v1 = vsel %vm55_vm0, 1.0, %v1548_v0  ;;  %s1448_s16 = sld [smem:[#allocation4 + $0xf]] }
  0x1c   :  { %157 = vrot.lane.b32.xlu1 %v1614_v3, %s1547_s14  ;;  %155 = vrot.lane.b32.xlu0 %v1614_v3, %s1546_s12  ;;  %s1447_s17 = sld [smem:[#allocation4 + $0xe]] }
  0x1d   :  { %176 = vrot.lane.b32.xlu2 %v1623_v4, %s1546_s12  ;;  %s1450_s18 = sld [smem:[#allocation4 + $0x11]] }
  0x1e   :  { %s1444_s19 = sld [smem:[#allocation4 + $0xb]] }
  0x1f   :  { %s1451_s20 = sld [smem:[#allocation7 + $0x1]] }
  0x20   :  { %s1453_s21 = sld [smem:[#allocation4 + $0x13]] }
  0x21   :  { %s1456_s22 = sld [smem:[#allocation4 + $0x16]] }
  0x22   :  { %s1459_s23 = sld [smem:[#allocation4 + $0x19]] }
  0x23   :  { %s1452_s24 = sld [smem:[#allocation4 + $0x12]] }
  0x24   :  { %197 = vrot.lane.b32.xlu1 %v1630_v5, %s1546_s12  ;;  %178 = vrot.lane.b32.xlu0 %v1623_v4, %s1547_s14  ;;  %s1455_s25 = sld [smem:[#allocation4 + $0x15]] }
  0x25   :  { %199 = vrot.lane.b32.xlu2 %v1630_v5, %s1547_s14  ;;  %s1454_s26 = sld [smem:[#allocation4 + $0x14]] }
  0x26   :  { %s1457_s27 = sld [smem:[#allocation4 + $0x17]] }
  0x27   :  { %s1458_s28 = sld [smem:[#allocation4 + $0x18]] }
  0x28   :  { %s1460_s29 = sld [smem:[#allocation4 + $0x1a]] }
  0x29   :  { %s1461_s30 = sld [smem:[#allocation7 + $0x2]] }
  0x2a   :  { %s1463_s8 = sld [smem:[#allocation4 + $0x1c]] }
  0x2b   :  { %s1466_s9 = sld [smem:[#allocation4 + $0x1f]] }
  0x2c   :  { %218 = vrot.lane.b32.xlu0 %v1641_v6, %s1546_s12  ;;  %220 = vrot.lane.b32.xlu1 %v1641_v6, %s1547_s14  ;;  %s1469_s10 = sld [smem:[#allocation4 + $0x22]] }
  0x2d   :  { %239 = vrot.lane.b32.xlu2 %v1650_v7, %s1546_s12  ;;  %s1462_s0 = sld [smem:[#allocation4 + $0x1b]] }
  0x34   :  { %241 = vrot.lane.b32.xlu0 %v1650_v7, %s1547_s14 }
  0x67   :  { %v113_v8 = vpop.permute.xlu2 %112 }
  0x68   :  { %v117_v24 = vmul.f32 %v113_v8, %v1666_v15  ;;  %v122_v32 = vmul.f32 %v113_v8, %v1668_v16  ;;  %v131_v33 = vmul.f32 %v1674_v19, %v113_v8 }
  0x6f   :  { %v1682_v23 = vpop.permute.xlu2 %136 }
  0x70   :  { %v152_v42 = vmul.f32 %v1682_v23, %v1674_v19  ;;  %v146_v52 = vmul.f32 %v1682_v23, %v1668_v16 }
  0x77   :  { %v177_v56 = vpop.permute.xlu2 %176 }
  0x7e   :  { %v1656_v9 = vpop.permute.xlu1 %134  ;;  %v91_v10 = vpop.permute.xlu0 %90 }
  0x7f   :  { %v149_v28 = vmul.f32 %v1656_v9, %v1672_v18  ;;  %v95_v29 = vmul.f32 %v1670_v17, %v91_v10  ;;  %v103_v34 = vmul.f32 %v1676_v20, %v91_v10  ;;  %v143_v49 = vmul.f32 %v1656_v9, %v1676_v20 }
  0x81   :  { %v151_v46 = vadd.f32 %v150_v26, %v149_v28  ;;  %v98_v47 = vadd.f32 %v97_v22, %v95_v29  ;;  %v106_v50 = vadd.f32 %v105_v27, %v103_v34  ;;  %v145_v2 = vadd.f32 %v144_v25, %v143_v49 }
  0x82   :  { %v186_v22 = vmul.f32 %v1623_v4, %v1662_v12  ;;  %v192_v26 = vmul.f32 %v1623_v4, %v1664_v13  ;;  %v138_v27 = vmul.f32 %v1656_v9, %v1670_v17  ;;  %v185_v29 = vmul.f32 %v177_v56, %v1676_v20 }
  0x83   :  { %v153_v61 = vadd.f32 %v152_v42, %v151_v46  ;;  %v191_v9 = vmul.f32 %v177_v56, %v1672_v18  ;;  %v181_v42 = vmul.f32 %v1623_v4, %v1658_v11 }
  0x84   :  { %v187_v4 = vadd.f32 %v186_v22, %v185_v29 }
  0x86   :  { %v93_v35 = vpop.permute.xlu1 %92  ;;  %v111_v37 = vpop.permute.xlu0 %110 }
  0x87   :  { %v100_v38 = vmul.f32 %v1666_v15, %v93_v35  ;;  %v114_v40 = vmul.f32 %v111_v37, %v1670_v17  ;;  %v119_v41 = vmul.f32 %v111_v37, %v1676_v20  ;;  %v108_v43 = vmul.f32 %v1668_v16, %v93_v35 }
  0x88   :  { %v126_v45 = vmul.f32 %v1672_v18, %v111_v37 }
  0x89   :  { %v121_v48 = vadd.f32 %v120_v30, %v119_v41  ;;  %v101_v53 = vadd.f32 %v100_v38, %v98_v47  ;;  %v116_v54 = vadd.f32 %v115_v39, %v114_v40  ;;  %v109_v57 = vadd.f32 %v108_v43, %v106_v50 }
  0x8a   :  { %v129_v51 = vadd.f32 %v128_v36, %v126_v45  ;;  %v140_v40 = vadd.f32 %v1679_v21, %v138_v27  ;;  %v141_v41 = vmul.f32 %v1682_v23, %v1666_v15 }
  0x8b   :  { %v123_v55 = vadd.f32 %v122_v32, %v121_v48  ;;  %v118_v28 = vadd.f32 %v117_v24, %v116_v54  ;;  %v147_v24 = vadd.f32 %v146_v52, %v145_v2  ;;  %v213_v48 = vmul.f32 %v1630_v5, %v1664_v13  ;;  %v200_v52 = vpop.permute.xlu2 %199 }
  0x8c   :  { %v132_v58 = vadd.f32 %v131_v33, %v129_v51  ;;  %v193_v54 = vadd.f32 %v192_v26, %v191_v9  ;;  %v215_v0 = vmul.f32 %v200_v52, %v1674_v19 }
  0x8d   :  { %v124_v62 = vadd.f32 %v123_v55, %v101_v53  ;;  %v148_v45 = vadd.f32 %v147_v24, %v118_v28  ;;  %v180_v53 = vmul.f32 %v177_v56, %v1670_v17 }
  0x8e   :  { %v133_v8 = vadd.f32 %v132_v58, %v109_v57  ;;  %v158_v10 = vpop.permute.xlu1 %157  ;;  %v156_v14 = vpop.permute.xlu0 %155  ;;  %v142_v58 = vadd.f32 %v141_v41, %v140_v40 }
  0x8f   :  { %v154_v3 = vadd.f32 %v153_v61, %v124_v62  ;;  %v173_v30 = vmul.f32 %v158_v10, %v1674_v19  ;;  %v164_v25 = vmul.f32 %v156_v14, %v1676_v20  ;;  %v170_v32 = vmul.f32 %v156_v14, %v1672_v18 }
  0x90   :  { %v256_v33 = vadd.f32 %v1706_v44, %v133_v8  ;;  %v167_v35 = vmul.f32 %v158_v10, %v1668_v16  ;;  %v159_v36 = vmul.f32 %v156_v14, %v1670_v17  ;;  %v162_v49 = vmul.f32 %v158_v10, %v1666_v15 }
  0x91   :  { %v258_v34 = vadd.f32 %v1706_v44, %v154_v3  ;;  %v166_v37 = vadd.f32 %v165_v60, %v164_v25  ;;  %v172_v38 = vadd.f32 %v171_v63, %v170_v32  ;;  %v207_v60 = vmul.f32 %v1630_v5, %v1662_v12 }
  0x92   :  { %v257_v39 = vmul.f32 %v1722_v1, %v256_v33  ;;  %v161_v50 = vadd.f32 %v160_v59, %v159_v36  ;;  %v202_v8 = vmul.f32 %v1630_v5, %v1658_v11  ;;  %v182_v3 = vadd.f32 %v181_v42, %v180_v53 }
  0x93   :  { %v259_v43 = vmul.f32 %v1722_v1, %v258_v34  ;;  %v174_v46 = vadd.f32 %v173_v30, %v172_v38  ;;  %v168_v51 = vadd.f32 %v167_v35, %v166_v37  ;;  %v209_v25 = vmul.f32 %v200_v52, %v1668_v16  ;;  %v240_v9 = vpop.permute.xlu2 %239 }
  0x94   :  { %v1746_v47 = vmax.f32 %v257_v39, 0.0  ;;  %v163_v2 = vadd.f32 %v162_v49, %v161_v50  ;;  %v228_v5 = vmul.f32 %v1641_v6, %v1662_v12  ;;  %v234_v36 = vmul.f32 %v1641_v6, %v1664_v13 }
  0x95   :  { %v1751_v21 = vmax.f32 %v259_v43, 0.0  ;;  %v175_v23 = vadd.f32 %v174_v46, %v148_v45  ;;  %v169_v14 = vadd.f32 %v168_v51, %v142_v58  ;;  %v204_v38 = vmul.f32 %v200_v52, %v1666_v15 }
  0x96   :  { %290 = vrot.lane.b32.xlu1 %v1746_v47, %s1546_s12  ;;  %v198_v55 = vpop.permute.xlu1 %197  ;;  %v179_v57 = vpop.permute.xlu0 %178  ;;  %v249_v53 = vmul.f32 %v240_v9, %v1672_v18 }
  0x97   :  { %v206_v59 = vmul.f32 %v198_v55, %v1676_v20  ;;  %v212_v61 = vmul.f32 %v198_v55, %v1672_v18  ;;  %310 = vrot.lane.b32.xlu2 %v1751_v21, %s1546_s12  ;;  %v260_v56 = vadd.f32 %v1706_v44, %v175_v23  ;;  %v188_v62 = vmul.f32 %v179_v57, %v1668_v16 }
  0x98   :  { %v194_v63 = vmul.f32 %v179_v57, %v1674_v19  ;;  %v201_v22 = vmul.f32 %v198_v55, %v1670_v17  ;;  %v183_v30 = vmul.f32 %v179_v57, %v1666_v15  ;;  %v250_v23 = vmul.f32 %v1650_v7, %v1664_v13 }
  0x99   :  { %v214_v10 = vadd.f32 %v213_v48, %v212_v61  ;;  %v189_v26 = vadd.f32 %v188_v62, %v187_v4  ;;  %v261_v28 = vmul.f32 %v1722_v1, %v260_v56  ;;  %v208_v29 = vadd.f32 %v207_v60, %v206_v59 }
  0x9a   :  { %v195_v27 = vadd.f32 %v194_v63, %v193_v54  ;;  %v203_v24 = vadd.f32 %v202_v8, %v201_v22  ;;  %v184_v41 = vadd.f32 %v183_v30, %v182_v3  ;;  %v223_v4 = vmul.f32 %v1641_v6, %v1658_v11 }
  0x9b   :  { %v190_v32 = vadd.f32 %v189_v26, %v163_v2  ;;  %v216_v34 = vadd.f32 %v215_v0, %v214_v10  ;;  %v1772_v35 = vmax.f32 %v261_v28, 0.0  ;;  %v210_v42 = vadd.f32 %v209_v25, %v208_v29 }
  0x9c   :  { %v196_v33 = vadd.f32 %v195_v27, %v169_v14  ;;  %v244_v55 = vmul.f32 %v1650_v7, %v1662_v12  ;;  %v243_v57 = vmul.f32 %v240_v9, %v1676_v20  ;;  %v205_v58 = vadd.f32 %v204_v38, %v203_v24 }
  0x9d   :  { %334 = vrot.lane.b32.xlu0 %v1772_v35, %s1546_s12  ;;  %v217_v48 = vadd.f32 %v216_v34, %v190_v32  ;;  %v211_v60 = vadd.f32 %v210_v42, %v184_v41  ;;  %v1845_v34 = vstv %s1448_s16  ;;  %v1849_v9 = vstv %s1443_s1  ;;  %s1465_s1 = sld [smem:[#allocation4 + $0x1e]] }
  0x9e   :  { %v262_v37 = vadd.f32 %v1706_v44, %v196_v33  ;;  %292 = vrot.lane.b32.xlu1 %v1746_v47, %s1547_s14  ;;  %v219_v39 = vpop.permute.xlu0 %218  ;;  %v221_v40 = vpop.permute.xlu1 %220  ;;  %v245_v7 = vadd.f32 %v244_v55, %v243_v57  ;;  %v1843_v33 = vstv %s1445_s15  ;;  %v1851_v24 = vstv %s1446_s11  ;;  %s1468_s11 = sld [smem:[#allocation4 + $0x21]] }
  0x9f   :  { %v227_v43 = vmul.f32 %v219_v39, %v1676_v20  ;;  %v233_v45 = vmul.f32 %v219_v39, %v1672_v18  ;;  %312 = vrot.lane.b32.xlu2 %v1751_v21, %s1547_s14  ;;  %v230_v49 = vmul.f32 %v221_v40, %v1668_v16  ;;  %v236_v50 = vmul.f32 %v221_v40, %v1674_v19  ;;  %s1464_s15 = sld [smem:[#allocation4 + $0x1d]] }
  0xa0   :  { %v263_v46 = vmul.f32 %v1722_v1, %v262_v37  ;;  %v222_v54 = vmul.f32 %v219_v39, %v1670_v17  ;;  %v264_v56 = vadd.f32 %v1706_v44, %v217_v48  ;;  %v251_v18 = vadd.f32 %v250_v23, %v249_v53  ;;  %s2214_s16 = sld [smem:[#allocation7 + $0x3]] }
  0xa1   :  { %v229_v51 = vadd.f32 %v228_v5, %v227_v43  ;;  %v235_v52 = vadd.f32 %v234_v36, %v233_v45  ;;  %v225_v6 = vmul.f32 %v221_v40, %v1666_v15  ;;  %v1847_v36 = vstv %s1442_s13  ;;  %s1470_s13 = sld [smem:[#allocation4 + $0x23]] }
  0xa2   :  { %v1801_v62 = vmax.f32 %v263_v46, 0.0  ;;  %v224_v63 = vadd.f32 %v223_v4, %v222_v54  ;;  %v265_v15 = vmul.f32 %v1722_v1, %v264_v56  ;;  %v1853_v37 = vstv %s1447_s17 }
  0xa3   :  { %v231_v59 = vadd.f32 %v230_v49, %v229_v51  ;;  %v237_v61 = vadd.f32 %v236_v50, %v235_v52  ;;  %v1855_v38 = vstv %s1449_s2  ;;  %v1858_v40 = vstv %s1450_s18  ;;  %s1467_s2 = sld [smem:[#allocation4 + $0x20]] }
  0xa4   :  { %v226_v10 = vadd.f32 %v225_v6, %v224_v63  ;;  %v1815_v26 = vmax.f32 %v265_v15, 0.0  ;;  %v320_v45 = vmul.f32 %v1851_v24, %v1751_v21  ;;  %v297_v48 = vmul.f32 %v1849_v9, %v1746_v47  ;;  %s2601_s18 = sld [smem:[#allocation4 + $0x24]] }
  0xa5   :  { %v238_v13 = vadd.f32 %v237_v61, %v211_v60  ;;  %336 = vrot.lane.b32.xlu0 %v1772_v35, %s1547_s14  ;;  %v232_v12 = vadd.f32 %v231_v59, %v205_v58  ;;  %v328_v49 = vmul.f32 %v1855_v38, %v1751_v21  ;;  %v1870_v50 = vstv %s1444_s19 }
  0xa6   :  { %355 = vrot.lane.b32.xlu1 %v1801_v62, %s1546_s12  ;;  %v242_v11 = vpop.permute.xlu0 %241  ;;  %v305_v52 = vmul.f32 %v1851_v24, %v1746_v47  ;;  %v339_v15 = vmul.f32 %v1849_v9, %v1772_v35 }
  0xa7   :  { %v266_v17 = vadd.f32 %v1706_v44, %v238_v13  ;;  %357 = vrot.lane.b32.xlu2 %v1801_v62, %s1547_s14  ;;  %v246_v20 = vmul.f32 %v242_v11, %v1668_v16  ;;  %v252_v0 = vmul.f32 %v242_v11, %v1674_v19  ;;  %v315_v13 = vmul.f32 %v1849_v9, %v1751_v21 }
  0xa8   :  { %v344_v21 = vmul.f32 %v1851_v24, %v1772_v35 }
  0xa9   :  { %v267_v2 = vmul.f32 %v1722_v1, %v266_v17  ;;  %v253_v8 = vadd.f32 %v252_v0, %v251_v18  ;;  %v247_v14 = vadd.f32 %v246_v20, %v245_v7 }
  0xab   :  { %v254_v22 = vadd.f32 %v253_v8, %v232_v12  ;;  %v1818_v28 = vmax.f32 %v267_v2, 0.0  ;;  %v248_v3 = vadd.f32 %v247_v14, %v226_v10  ;;  %v1883_v12 = vstv %s1451_s20  ;;  %s2654_s20 = sld [smem:[#allocation4 + $0x29]] }
  0xac   :  { %v350_v2 = vmul.f32 %v1855_v38, %v1772_v35  ;;  %v365_v8 = vmul.f32 %v1851_v24, %v1801_v62 }
  0xad   :  { %v268_v27 = vadd.f32 %v1706_v44, %v254_v22  ;;  %376 = vrot.lane.b32.xlu0 %v1815_v26, %s1546_s12  ;;  %v270_v19 = vadd.f32 %v1706_v44, %v248_v3  ;;  %v371_v3 = vmul.f32 %v1855_v38, %v1801_v62 }
  0xae   :  { %378 = vrot.lane.b32.xlu1 %v1815_v26, %s1547_s14 }
  0xaf   :  { %v269_v16 = vmul.f32 %v1722_v1, %v268_v27  ;;  %397 = vrot.lane.b32.xlu2 %v1818_v28, %s1546_s12  ;;  %v271_v30 = vmul.f32 %v1722_v1, %v270_v19 }
  0xb1   :  { %v1828_v29 = vmax.f32 %v269_v16, 0.0  ;;  %v1837_v25 = vmax.f32 %v271_v30, 0.0 }
  0xb5   :  { %399 = vrot.lane.b32.xlu0 %v1818_v28, %s1547_s14 }
  0xb6   :  { %418 = vrot.lane.b32.xlu1 %v1828_v29, %s1546_s12 }
  0xb7   :  { %420 = vrot.lane.b32.xlu2 %v1828_v29, %s1547_s14 }
  0xbd   :  { %439 = vrot.lane.b32.xlu0 %v1837_v25, %s1546_s12 }
  0xbe   :  { %441 = vrot.lane.b32.xlu1 %v1837_v25, %s1547_s14 }
  0xf1   :  { %v311_v44 = vpop.permute.xlu2 %310 }
  0xf2   :  { %v319_v39 = vmul.f32 %v311_v44, %v1843_v33  ;;  %v326_v42 = vmul.f32 %v1845_v34, %v311_v44  ;;  %v314_v57 = vmul.f32 %v311_v44, %v1847_v36 }
  0xf4   :  { %v321_v4 = vadd.f32 %v320_v45, %v319_v39  ;;  %v329_v58 = vadd.f32 %v328_v49, %v326_v42  ;;  %v316_v20 = vadd.f32 %v315_v13, %v314_v57  ;;  %v392_v13 = vmul.f32 %v1855_v38, %v1815_v26 }
  0xf9   :  { %v313_v5 = vpop.permute.xlu2 %312 }
  0xfa   :  { %v322_v46 = vmul.f32 %v313_v5, %v1853_v37  ;;  %v331_v51 = vmul.f32 %v1858_v40, %v313_v5  ;;  %v317_v18 = vmul.f32 %v313_v5, %v1870_v50 }
  0xfc   :  { %v323_v61 = vadd.f32 %v322_v46, %v321_v4  ;;  %v332_v47 = vadd.f32 %v331_v51, %v329_v58  ;;  %v318_v10 = vadd.f32 %v317_v18, %v316_v20 }
 0x101   :  { %v358_v6 = vpop.permute.xlu2 %357 }
 0x102   :  { %v367_v42 = vmul.f32 %v358_v6, %v1853_v37 }
 0x108   :  { %v291_v32 = vpop.permute.xlu1 %290 }
 0x109   :  { %v295_v41 = vmul.f32 %v1847_v36, %v291_v32  ;;  %v303_v43 = vmul.f32 %v1843_v33, %v291_v32  ;;  %v398_v58 = vpop.permute.xlu2 %397 }
 0x10b   :  { %v298_v54 = vadd.f32 %v297_v48, %v295_v41  ;;  %v306_v60 = vadd.f32 %v305_v52, %v303_v43  ;;  %v373_v43 = vmul.f32 %v358_v6, %v1858_v40 }
 0x10f   :  { %v335_v23 = vpop.permute.xlu0 %334 }
 0x110   :  { %v293_v53 = vpop.permute.xlu1 %292  ;;  %v343_v7 = vmul.f32 %v335_v23, %v1843_v33  ;;  %v349_v11 = vmul.f32 %v335_v23, %v1845_v34  ;;  %v338_v14 = vmul.f32 %v335_v23, %v1847_v36 }
 0x111   :  { %v300_v55 = vmul.f32 %v1870_v50, %v293_v53  ;;  %v308_v59 = vmul.f32 %v1853_v37, %v293_v53 }
 0x112   :  { %v345_v19 = vadd.f32 %v344_v21, %v343_v7  ;;  %v351_v30 = vadd.f32 %v350_v2, %v349_v11  ;;  %v340_v48 = vadd.f32 %v339_v15, %v338_v14 }
 0x113   :  { %v301_v56 = vadd.f32 %v300_v55, %v298_v54  ;;  %v309_v63 = vadd.f32 %v308_v59, %v306_v60  ;;  %v360_v59 = vmul.f32 %v1849_v9, %v1801_v62 }
 0x115   :  { %v324_v17 = vadd.f32 %v323_v61, %v301_v56  ;;  %v333_v0 = vadd.f32 %v332_v47, %v309_v63  ;;  %v386_v56 = vmul.f32 %v1851_v24, %v1815_v26 }
 0x117   :  { %v456_v22 = vadd.f32 %v1883_v12, %v333_v0  ;;  %v337_v27 = vpop.permute.xlu0 %336  ;;  %v362_v0 = vmul.f32 %v358_v6, %v1870_v50  ;;  %v381_v6 = vmul.f32 %v1849_v9, %v1815_v26  ;;  %v402_v26 = vmul.f32 %v1849_v9, %v1818_v28 }
 0x118   :  { %v356_v16 = vpop.permute.xlu1 %355  ;;  %v346_v44 = vmul.f32 %v337_v27, %v1853_v37  ;;  %v352_v32 = vmul.f32 %v337_v27, %v1858_v40  ;;  %v341_v35 = vmul.f32 %v337_v27, %v1870_v50  ;;  %v412_v27 = vmul.f32 %v398_v58, %v1845_v34 }
 0x119   :  { %v364_v5 = vmul.f32 %v356_v16, %v1843_v33  ;;  %v370_v39 = vmul.f32 %v356_v16, %v1845_v34  ;;  %v457_v41 = vmul.f32 %v1722_v1, %v456_v22  ;;  %v359_v4 = vmul.f32 %v356_v16, %v1847_v36 }
 0x11a   :  { %v347_v45 = vadd.f32 %v346_v44, %v345_v19  ;;  %v353_v46 = vadd.f32 %v352_v32, %v351_v30  ;;  %v342_v54 = vadd.f32 %v341_v35, %v340_v48  ;;  %v406_v22 = vmul.f32 %v398_v58, %v1843_v33 }
 0x11b   :  { %v366_v49 = vadd.f32 %v365_v8, %v364_v5  ;;  %v372_v51 = vadd.f32 %v371_v3, %v370_v39  ;;  %v1905_v52 = vmax.f32 %v457_v41, 0.0  ;;  %v361_v11 = vadd.f32 %v360_v59, %v359_v4 }
 0x11c   :  { %v348_v23 = vadd.f32 %v347_v45, %v318_v10  ;;  %v354_v53 = vadd.f32 %v353_v46, %v324_v17  ;;  %v407_v44 = vmul.f32 %v1851_v24, %v1818_v28  ;;  %v413_v32 = vmul.f32 %v1855_v38, %v1818_v28 }
 0x11d   :  { %v368_v55 = vadd.f32 %v367_v42, %v366_v49  ;;  %v374_v57 = vadd.f32 %v373_v43, %v372_v51  ;;  %490 = vrot.lane.b32.xlu2 %v1905_v52, %s1546_s12  ;;  %v363_v16 = vadd.f32 %v362_v0, %v361_v11  ;;  %v401_v35 = vmul.f32 %v398_v58, %v1847_v36 }
 0x11e   :  { %v458_v60 = vadd.f32 %v1883_v12, %v354_v53  ;;  %v408_v43 = vadd.f32 %v407_v44, %v406_v22  ;;  %v414_v45 = vadd.f32 %v413_v32, %v412_v27  ;;  %v428_v48 = vmul.f32 %v1851_v24, %v1828_v29 }
 0x11f   :  { %v375_v61 = vadd.f32 %v374_v57, %v348_v23  ;;  %v377_v18 = vpop.permute.xlu0 %376  ;;  %v369_v47 = vadd.f32 %v368_v55, %v342_v54  ;;  %v434_v49 = vmul.f32 %v1855_v38, %v1828_v29  ;;  %v421_v23 = vpop.permute.xlu2 %420  ;;  %v403_v55 = vadd.f32 %v402_v26, %v401_v35 }
 0x120   :  { %v379_v63 = vpop.permute.xlu1 %378  ;;  %v459_v7 = vmul.f32 %v1722_v1, %v458_v60  ;;  %v385_v17 = vmul.f32 %v377_v18, %v1843_v33  ;;  %v391_v20 = vmul.f32 %v377_v18, %v1845_v34  ;;  %v380_v15 = vmul.f32 %v377_v18, %v1847_v36 }
 0x121   :  { %v460_v62 = vadd.f32 %v1883_v12, %v375_v61  ;;  %v388_v21 = vmul.f32 %v379_v63, %v1853_v37  ;;  %v394_v10 = vmul.f32 %v379_v63, %v1858_v40  ;;  %v383_v53 = vmul.f32 %v379_v63, %v1870_v50 }
 0x122   :  { %v387_v2 = vadd.f32 %v386_v56, %v385_v17  ;;  %v393_v8 = vadd.f32 %v392_v13, %v391_v20  ;;  %v1925_v14 = vmax.f32 %v459_v7, 0.0  ;;  %v382_v39 = vadd.f32 %v381_v6, %v380_v15 }
 0x123   :  { %v461_v3 = vmul.f32 %v1722_v1, %v460_v62  ;;  %v430_v18 = vmul.f32 %v421_v23, %v1853_v37  ;;  %v450_v22 = vmul.f32 %v1855_v38, %v1837_v25 }
 0x124   :  { %v389_v19 = vadd.f32 %v388_v21, %v387_v2  ;;  %v395_v30 = vadd.f32 %v394_v10, %v393_v8  ;;  %510 = vrot.lane.b32.xlu0 %v1925_v14, %s1546_s12  ;;  %v384_v59 = vadd.f32 %v383_v53, %v382_v39  ;;  %v423_v8 = vmul.f32 %v1849_v9, %v1828_v29 }
 0x125   :  { %492 = vrot.lane.b32.xlu2 %v1905_v52, %s1547_s14  ;;  %v1941_v5 = vmax.f32 %v461_v3, 0.0 }
 0x126   :  { %v390_v41 = vadd.f32 %v389_v19, %v363_v16  ;;  %v396_v42 = vadd.f32 %v395_v30, %v369_v47  ;;  %v436_v47 = vmul.f32 %v421_v23, %v1858_v40  ;;  %v425_v30 = vmul.f32 %v421_v23, %v1870_v50 }
 0x127   :  { %534 = vrot.lane.b32.xlu1 %v1941_v5, %s1546_s12  ;;  %v400_v46 = vpop.permute.xlu0 %399  ;;  %v2017_v23 = vstv %s1453_s21 }
 0x128   :  { %v419_v51 = vpop.permute.xlu1 %418  ;;  %v462_v28 = vadd.f32 %v1883_v12, %v396_v42  ;;  %v409_v4 = vmul.f32 %v400_v46, %v1853_v37  ;;  %v415_v54 = vmul.f32 %v400_v46, %v1858_v40  ;;  %v404_v57 = vmul.f32 %v400_v46, %v1870_v50 }
 0x129   :  { %v427_v58 = vmul.f32 %v419_v51, %v1843_v33  ;;  %v433_v60 = vmul.f32 %v419_v51, %v1845_v34  ;;  %v422_v20 = vmul.f32 %v419_v51, %v1847_v36  ;;  %v444_v36 = vmul.f32 %v1851_v24, %v1837_v25 }
 0x12a   :  { %v463_v61 = vmul.f32 %v1722_v1, %v462_v28  ;;  %v410_v56 = vadd.f32 %v409_v4, %v408_v43  ;;  %v416_v13 = vadd.f32 %v415_v54, %v414_v45  ;;  %v405_v62 = vadd.f32 %v404_v57, %v403_v55 }
 0x12b   :  { %v429_v63 = vadd.f32 %v428_v48, %v427_v58  ;;  %v435_v7 = vadd.f32 %v434_v49, %v433_v60  ;;  %v424_v19 = vadd.f32 %v423_v8, %v422_v20  ;;  %v2015_v51 = vstv %s1452_s24 }
 0x12c   :  { %v411_v11 = vadd.f32 %v410_v56, %v384_v59  ;;  %v417_v17 = vadd.f32 %v416_v13, %v390_v41  ;;  %512 = vrot.lane.b32.xlu0 %v1925_v14, %s1547_s14  ;;  %v1964_v0 = vmax.f32 %v463_v61, 0.0  ;;  %v2019_v28 = vstv %s1455_s25  ;;  %s2797_s25 = sld [smem:[#allocation7 + $0x4]] }
 0x12d   :  { %v431_v15 = vadd.f32 %v430_v18, %v429_v63  ;;  %v437_v21 = vadd.f32 %v436_v47, %v435_v7  ;;  %v426_v38 = vadd.f32 %v425_v30, %v424_v19  ;;  %v2021_v4 = vstv %s1456_s22 }
 0x12e   :  { %v464_v2 = vadd.f32 %v1883_v12, %v417_v17  ;;  %555 = vrot.lane.b32.xlu2 %v1964_v0, %s1546_s12  ;;  %v2023_v54 = vstv %s1459_s23  ;;  %v497_v57 = vmul.f32 %v2017_v23, %v1905_v52  ;;  %v2028_v58 = vstv %s1454_s26  ;;  %s2609_s23 = sld [smem:[#allocation4 + $0x27]] }
 0x12f   :  { %v438_v10 = vadd.f32 %v437_v21, %v411_v11  ;;  %536 = vrot.lane.b32.xlu1 %v1941_v5, %s1547_s14  ;;  %v440_v27 = vpop.permute.xlu0 %439  ;;  %v432_v3 = vadd.f32 %v431_v15, %v405_v62  ;;  %v2030_v60 = vstv %s1457_s27  ;;  %v505_v56 = vmul.f32 %v2021_v4, %v1905_v52  ;;  %s2577_s27 = sld [smem:[#allocation4 + $0x25]] }
 0x130   :  { %v442_v16 = vpop.permute.xlu1 %441  ;;  %v465_v6 = vmul.f32 %v1722_v1, %v464_v2  ;;  %v443_v29 = vmul.f32 %v440_v27, %v1843_v33  ;;  %v449_v9 = vmul.f32 %v440_v27, %v1845_v34  ;;  %v2035_v13 = vstv %s1458_s28 }
 0x131   :  { %v446_v44 = vmul.f32 %v442_v16, %v1853_v37  ;;  %v466_v32 = vadd.f32 %v1883_v12, %v438_v10  ;;  %v452_v25 = vmul.f32 %v442_v16, %v1858_v40  ;;  %v515_v18 = vmul.f32 %v2017_v23, %v1925_v14 }
 0x132   :  { %v445_v24 = vadd.f32 %v444_v36, %v443_v29  ;;  %v451_v35 = vadd.f32 %v450_v22, %v449_v9  ;;  %v1986_v41 = vmax.f32 %v465_v6, 0.0  ;;  %v520_v7 = vmul.f32 %v2021_v4, %v1925_v14 }
 0x133   :  { %v467_v37 = vmul.f32 %v1722_v1, %v466_v32  ;;  %v528_v17 = vmul.f32 %v2023_v54, %v1925_v14  ;;  %v544_v62 = vmul.f32 %v2021_v4, %v1941_v5  ;;  %v550_v15 = vmul.f32 %v2023_v54, %v1941_v5 }
 0x134   :  { %v447_v26 = vadd.f32 %v446_v44, %v445_v24  ;;  %v453_v39 = vadd.f32 %v452_v25, %v451_v35  ;;  %557 = vrot.lane.b32.xlu0 %v1964_v0, %s1547_s14  ;;  %v565_v2 = vmul.f32 %v2021_v4, %v1964_v0  ;;  %v2053_v8 = vstv %s1460_s29  ;;  %s2705_s29 = sld [smem:[#allocation4 + $0x2c]] }
 0x135   :  { %v1995_v42 = vmax.f32 %v467_v37, 0.0  ;;  %v2058_v27 = vstv %s1461_s30 }
 0x136   :  { %v448_v33 = vadd.f32 %v447_v26, %v426_v38  ;;  %v454_v34 = vadd.f32 %v453_v39, %v432_v3  ;;  %578 = vrot.lane.b32.xlu2 %v1986_v41, %s1547_s14 }
 0x137   :  { %576 = vrot.lane.b32.xlu1 %v1986_v41, %s1546_s12 }
 0x138   :  { %v468_v40 = vadd.f32 %v1883_v12, %v454_v34  ;;  %v470_v43 = vadd.f32 %v1883_v12, %v448_v33 }
 0x13a   :  { %v469_v50 = vmul.f32 %v1722_v1, %v468_v40  ;;  %v471_v46 = vmul.f32 %v1722_v1, %v470_v43  ;;  %v571_v40 = vmul.f32 %v2023_v54, %v1964_v0 }
 0x13c   :  { %v1998_v45 = vmax.f32 %v469_v50, 0.0  ;;  %597 = vrot.lane.b32.xlu0 %v1995_v42, %s1546_s12  ;;  %v2009_v48 = vmax.f32 %v471_v46, 0.0 }
 0x13e   :  { %618 = vrot.lane.b32.xlu2 %v1998_v45, %s1546_s12 }
 0x13f   :  { %599 = vrot.lane.b32.xlu1 %v1995_v42, %s1547_s14 }
 0x144   :  { %620 = vrot.lane.b32.xlu0 %v1998_v45, %s1547_s14 }
 0x146   :  { %641 = vrot.lane.b32.xlu2 %v2009_v48, %s1547_s14 }
 0x147   :  { %639 = vrot.lane.b32.xlu1 %v2009_v48, %s1546_s12 }
 0x177   :  { %v491_v12 = vpop.permute.xlu2 %490 }
 0x178   :  { %v495_v55 = vmul.f32 %v2015_v51, %v491_v12  ;;  %v503_v61 = vmul.f32 %v2019_v28, %v491_v12 }
 0x17a   :  { %v498_v21 = vadd.f32 %v497_v57, %v495_v55  ;;  %v506_v36 = vadd.f32 %v505_v56, %v503_v61  ;;  %v560_v57 = vmul.f32 %v2017_v23, %v1964_v0  ;;  %v539_v56 = vmul.f32 %v2017_v23, %v1941_v5 }
 0x17b   :  { %v586_v5 = vmul.f32 %v2021_v4, %v1986_v41 }
 0x17f   :  { %v493_v49 = vpop.permute.xlu2 %492 }
 0x180   :  { %v500_v20 = vmul.f32 %v2028_v58, %v493_v49  ;;  %v508_v52 = vmul.f32 %v2030_v60, %v493_v49 }
 0x182   :  { %v501_v9 = vadd.f32 %v500_v20, %v498_v21  ;;  %v509_v30 = vadd.f32 %v508_v52, %v506_v36 }
 0x188   :  { %v556_v47 = vpop.permute.xlu2 %555 }
 0x189   :  { %v564_v44 = vmul.f32 %v556_v47, %v2019_v28  ;;  %v570_v24 = vmul.f32 %v556_v47, %v2035_v13  ;;  %v559_v12 = vmul.f32 %v556_v47, %v2015_v51 }
 0x190   :  { %v579_v61 = vpop.permute.xlu2 %578 }
 0x196   :  { %v511_v53 = vpop.permute.xlu0 %510 }
 0x197   :  { %v519_v63 = vmul.f32 %v511_v53, %v2019_v28  ;;  %v526_v11 = vmul.f32 %v2035_v13, %v511_v53  ;;  %v514_v10 = vmul.f32 %v511_v53, %v2015_v51 }
 0x199   :  { %v535_v59 = vpop.permute.xlu1 %534  ;;  %v521_v16 = vadd.f32 %v520_v7, %v519_v63  ;;  %v529_v6 = vadd.f32 %v528_v17, %v526_v11  ;;  %v516_v35 = vadd.f32 %v515_v18, %v514_v10  ;;  %v566_v7 = vadd.f32 %v565_v2, %v564_v44 }
 0x19a   :  { %v543_v14 = vmul.f32 %v535_v59, %v2019_v28  ;;  %v549_v22 = vmul.f32 %v535_v59, %v2035_v13  ;;  %v538_v50 = vmul.f32 %v535_v59, %v2015_v51  ;;  %v572_v59 = vadd.f32 %v571_v40, %v570_v24 }
 0x19b   :  { %v592_v2 = vmul.f32 %v2023_v54, %v1986_v41  ;;  %v594_v24 = vmul.f32 %v579_v61, %v2053_v8 }
 0x19c   :  { %v545_v39 = vadd.f32 %v544_v62, %v543_v14  ;;  %v551_v33 = vadd.f32 %v550_v15, %v549_v22  ;;  %v540_v47 = vadd.f32 %v539_v56, %v538_v50  ;;  %v561_v15 = vadd.f32 %v560_v57, %v559_v12 }
 0x19d   :  { %v613_v50 = vmul.f32 %v2023_v54, %v1995_v42 }
 0x19e   :  { %v513_v3 = vpop.permute.xlu0 %512 }
 0x19f   :  { %v522_v19 = vmul.f32 %v513_v3, %v2030_v60  ;;  %v531_v29 = vmul.f32 %v2053_v8, %v513_v3  ;;  %v517_v32 = vmul.f32 %v513_v3, %v2028_v58 }
 0x1a1   :  { %v523_v25 = vadd.f32 %v522_v19, %v521_v16  ;;  %v532_v38 = vadd.f32 %v531_v29, %v529_v6  ;;  %v537_v26 = vpop.permute.xlu1 %536  ;;  %v518_v49 = vadd.f32 %v517_v32, %v516_v35 }
 0x1a2   :  { %v546_v34 = vmul.f32 %v537_v26, %v2030_v60  ;;  %v552_v37 = vmul.f32 %v537_v26, %v2053_v8  ;;  %v541_v63 = vmul.f32 %v537_v26, %v2028_v58 }
 0x1a3   :  { %v524_v43 = vadd.f32 %v523_v25, %v501_v9  ;;  %v533_v46 = vadd.f32 %v532_v38, %v509_v30  ;;  %v588_v9 = vmul.f32 %v579_v61, %v2030_v60 }
 0x1a4   :  { %v547_v53 = vadd.f32 %v546_v34, %v545_v39  ;;  %v553_v55 = vadd.f32 %v552_v37, %v551_v33  ;;  %v542_v10 = vadd.f32 %v541_v63, %v540_v47  ;;  %v581_v39 = vmul.f32 %v2017_v23, %v1986_v41 }
 0x1a5   :  { %v656_v18 = vadd.f32 %v2058_v27, %v533_v46  ;;  %v607_v33 = vmul.f32 %v2021_v4, %v1995_v42  ;;  %v619_v46 = vpop.permute.xlu2 %618 }
 0x1a6   :  { %v548_v11 = vadd.f32 %v547_v53, %v518_v49  ;;  %v554_v17 = vadd.f32 %v553_v55, %v524_v43  ;;  %v558_v20 = vpop.permute.xlu0 %557 }
 0x1a7   :  { %v567_v52 = vmul.f32 %v558_v20, %v2030_v60  ;;  %v573_v62 = vmul.f32 %v558_v20, %v2053_v8  ;;  %v657_v0 = vmul.f32 %v1722_v1, %v656_v18  ;;  %v562_v6 = vmul.f32 %v558_v20, %v2028_v58 }
 0x1a8   :  { %v658_v21 = vadd.f32 %v2058_v27, %v554_v17  ;;  %v583_v18 = vmul.f32 %v579_v61, %v2028_v58  ;;  %v602_v20 = vmul.f32 %v2017_v23, %v1995_v42 }
 0x1a9   :  { %v568_v36 = vadd.f32 %v567_v52, %v566_v7  ;;  %v574_v14 = vadd.f32 %v573_v62, %v572_v59  ;;  %v577_v22 = vpop.permute.xlu1 %576  ;;  %v2085_v3 = vmax.f32 %v657_v0, 0.0  ;;  %v563_v34 = vadd.f32 %v562_v6, %v561_v15 }
 0x1aa   :  { %v659_v16 = vmul.f32 %v1722_v1, %v658_v21  ;;  %v585_v19 = vmul.f32 %v577_v22, %v2019_v28  ;;  %v591_v29 = vmul.f32 %v577_v22, %v2035_v13  ;;  %v580_v32 = vmul.f32 %v577_v22, %v2015_v51 }
 0x1ab   :  { %v569_v30 = vadd.f32 %v568_v36, %v542_v10  ;;  %v575_v44 = vadd.f32 %v574_v14, %v548_v11  ;;  %690 = vrot.lane.b32.xlu0 %v2085_v3, %s1546_s12  ;;  %v627_v62 = vmul.f32 %v619_v46, %v2019_v28  ;;  %v633_v0 = vmul.f32 %v619_v46, %v2035_v13 }
 0x1ac   :  { %v587_v35 = vadd.f32 %v586_v5, %v585_v19  ;;  %v593_v25 = vadd.f32 %v592_v2, %v591_v29  ;;  %v2096_v38 = vmax.f32 %v659_v16, 0.0  ;;  %v582_v49 = vadd.f32 %v581_v39, %v580_v32 }
 0x1ad   :  { %v660_v26 = vadd.f32 %v2058_v27, %v575_v44  ;;  %v628_v2 = vmul.f32 %v2021_v4, %v1998_v45  ;;  %v634_v10 = vmul.f32 %v2023_v54, %v1998_v45  ;;  %v622_v14 = vmul.f32 %v619_v46, %v2015_v51 }
 0x1ae   :  { %v589_v37 = vadd.f32 %v588_v9, %v587_v35  ;;  %v595_v40 = vadd.f32 %v594_v24, %v593_v25  ;;  %710 = vrot.lane.b32.xlu1 %v2096_v38, %s1546_s12  ;;  %v598_v43 = vpop.permute.xlu0 %597  ;;  %v584_v15 = vadd.f32 %v583_v18, %v582_v49  ;;  %v623_v44 = vmul.f32 %v2017_v23, %v1998_v45 }
 0x1af   :  { %v661_v12 = vmul.f32 %v1722_v1, %v660_v26  ;;  %v606_v53 = vmul.f32 %v598_v43, %v2019_v28  ;;  %v612_v41 = vmul.f32 %v598_v43, %v2035_v13  ;;  %v601_v57 = vmul.f32 %v598_v43, %v2015_v51  ;;  %v642_v51 = vpop.permute.xlu2 %641 }
 0x1b0   :  { %v596_v55 = vadd.f32 %v595_v40, %v569_v30  ;;  %v590_v56 = vadd.f32 %v589_v37, %v563_v34  ;;  %v629_v19 = vadd.f32 %v628_v2, %v627_v62  ;;  %v635_v29 = vadd.f32 %v634_v10, %v633_v0 }
 0x1b1   :  { %v608_v63 = vadd.f32 %v607_v33, %v606_v53  ;;  %v614_v7 = vadd.f32 %v613_v50, %v612_v41  ;;  %v600_v59 = vpop.permute.xlu1 %599  ;;  %v2112_v11 = vmax.f32 %v661_v12, 0.0  ;;  %v603_v61 = vadd.f32 %v602_v20, %v601_v57 }
 0x1b2   :  { %v662_v17 = vadd.f32 %v2058_v27, %v596_v55  ;;  %v609_v47 = vmul.f32 %v600_v59, %v2030_v60  ;;  %v615_v52 = vmul.f32 %v600_v59, %v2053_v8  ;;  %v604_v21 = vmul.f32 %v600_v59, %v2028_v58 }
 0x1b3   :  { %692 = vrot.lane.b32.xlu0 %v2085_v3, %s1547_s14  ;;  %734 = vrot.lane.b32.xlu2 %v2112_v11, %s1546_s12  ;;  %v644_v24 = vmul.f32 %v2021_v4, %v2009_v48  ;;  %v650_v37 = vmul.f32 %v2023_v54, %v2009_v48  ;;  %v624_v23 = vadd.f32 %v623_v44, %v622_v14  ;;  %v2187_v20 = vstv %s1463_s8 }
 0x1b4   :  { %v610_v5 = vadd.f32 %v609_v47, %v608_v63  ;;  %v616_v42 = vadd.f32 %v615_v52, %v614_v7  ;;  %v663_v36 = vmul.f32 %v1722_v1, %v662_v17  ;;  %v605_v32 = vadd.f32 %v604_v21, %v603_v61 }
 0x1b5   :  { %v646_v43 = vmul.f32 %v642_v51, %v2030_v60  ;;  %v2189_v47 = vstv %s1466_s9  ;;  %v2191_v52 = vstv %s1465_s1  ;;  %v2195_v61 = vstv %s1462_s0  ;;  %s2585_s9 = sld [smem:[#allocation4 + $0x28]] }
 0x1b6   :  { %v611_v22 = vadd.f32 %v610_v5, %v584_v15  ;;  %v617_v16 = vadd.f32 %v616_v42, %v590_v56  ;;  %712 = vrot.lane.b32.xlu1 %v2096_v38, %s1547_s14  ;;  %v621_v6 = vpop.permute.xlu0 %620  ;;  %v2141_v33 = vmax.f32 %v663_v36, 0.0  ;;  %v2193_v15 = vstv %s1469_s10 }
 0x1b7   :  { %v630_v9 = vmul.f32 %v621_v6, %v2030_v60  ;;  %v636_v30 = vmul.f32 %v621_v6, %v2053_v8  ;;  %v625_v34 = vmul.f32 %v621_v6, %v2028_v58  ;;  %v652_v58 = vmul.f32 %v642_v51, %v2053_v8 }
 0x1b8   :  { %v664_v35 = vadd.f32 %v2058_v27, %v617_v16  ;;  %v697_v21 = vmul.f32 %v2187_v20, %v2085_v3  ;;  %v705_v5 = vmul.f32 %v2189_v47, %v2085_v3  ;;  %v715_v42 = vmul.f32 %v2187_v20, %v2096_v38 }
 0x1b9   :  { %v631_v25 = vadd.f32 %v630_v9, %v629_v19  ;;  %v637_v26 = vadd.f32 %v636_v30, %v635_v29  ;;  %v640_v39 = vpop.permute.xlu1 %639  ;;  %v626_v54 = vadd.f32 %v625_v34, %v624_v23  ;;  %v2203_v2 = vstv %s1468_s11 }
 0x1ba   :  { %v643_v40 = vmul.f32 %v640_v39, %v2019_v28  ;;  %v649_v45 = vmul.f32 %v640_v39, %v2035_v13  ;;  %v665_v48 = vmul.f32 %v1722_v1, %v664_v35  ;;  %v2206_v36 = vstv %s1467_s2  ;;  %s2593_s2 = sld [smem:[#allocation4 + $0x2b]] }
 0x1bb   :  { %v632_v50 = vadd.f32 %v631_v25, %v605_v32  ;;  %v638_v4 = vadd.f32 %v637_v26, %v611_v22  ;;  %755 = vrot.lane.b32.xlu0 %v2141_v33, %s1546_s12  ;;  %736 = vrot.lane.b32.xlu2 %v2112_v11, %s1547_s14  ;;  %v2208_v14 = vstv %s1470_s13  ;;  %v744_v3 = vmul.f32 %v2189_v47, %v2112_v11 }
 0x1bc   :  { %v645_v46 = vadd.f32 %v644_v24, %v643_v40  ;;  %v651_v12 = vadd.f32 %v650_v37, %v649_v45  ;;  %v2159_v57 = vmax.f32 %v665_v48, 0.0  ;;  %v2218_v29 = vstv %s1464_s15 }
 0x1bd   :  { %v666_v28 = vadd.f32 %v2058_v27, %v638_v4  ;;  %v720_v9 = vmul.f32 %v2189_v47, %v2096_v38  ;;  %v728_v51 = vmul.f32 %v2193_v15, %v2096_v38  ;;  %v750_v26 = vmul.f32 %v2193_v15, %v2112_v11 }
 0x1be   :  { %v647_v13 = vadd.f32 %v646_v43, %v645_v46  ;;  %v653_v49 = vadd.f32 %v652_v58, %v651_v12  ;;  %757 = vrot.lane.b32.xlu1 %v2141_v33, %s1547_s14 }
 0x1bf   :  { %v667_v53 = vmul.f32 %v1722_v1, %v666_v28 }
 0x1c0   :  { %v648_v41 = vadd.f32 %v647_v13, %v626_v54  ;;  %v654_v55 = vadd.f32 %v653_v49, %v632_v50 }
 0x1c1   :  { %v2166_v8 = vmax.f32 %v667_v53, 0.0 }
 0x1c2   :  { %v668_v60 = vadd.f32 %v2058_v27, %v654_v55  ;;  %v670_v18 = vadd.f32 %v2058_v27, %v648_v41  ;;  %v2237_v55 = vstv %s2214_s16  ;;  %s2646_s16 = sld [smem:[#allocation4 + $0x26]] }
 0x1c3   :  { %778 = vrot.lane.b32.xlu0 %v2159_v57, %s1547_s14  ;;  %776 = vrot.lane.b32.xlu2 %v2159_v57, %s1546_s12 }
 0x1c4   :  { %v669_v56 = vmul.f32 %v1722_v1, %v668_v60  ;;  %v671_v7 = vmul.f32 %v1722_v1, %v670_v18 }
 0x1c6   :  { %797 = vrot.lane.b32.xlu1 %v2166_v8, %s1546_s12  ;;  %v2172_v63 = vmax.f32 %v669_v56, 0.0  ;;  %v2181_v59 = vmax.f32 %v671_v7, 0.0 }
 0x1cb   :  { %818 = vrot.lane.b32.xlu0 %v2172_v63, %s1546_s12  ;;  %799 = vrot.lane.b32.xlu2 %v2166_v8, %s1547_s14 }
 0x1ce   :  { %820 = vrot.lane.b32.xlu1 %v2172_v63, %s1547_s14 }
 0x1d3   :  { %841 = vrot.lane.b32.xlu0 %v2181_v59, %s1547_s14  ;;  %839 = vrot.lane.b32.xlu2 %v2181_v59, %s1546_s12 }
 0x20d   :  { %v735_v27 = vpop.permute.xlu2 %734 }
 0x20e   :  { %v743_v10 = vmul.f32 %v735_v27, %v2191_v52  ;;  %v749_v32 = vmul.f32 %v735_v27, %v2203_v2  ;;  %v738_v41 = vmul.f32 %v735_v27, %v2195_v61  ;;  %v739_v27 = vmul.f32 %v2187_v20, %v2112_v11 }
 0x210   :  { %v745_v25 = vadd.f32 %v744_v3, %v743_v10  ;;  %v751_v46 = vadd.f32 %v750_v26, %v749_v32  ;;  %v792_v26 = vmul.f32 %v2193_v15, %v2159_v57 }
 0x215   :  { %v737_v62 = vpop.permute.xlu2 %736 }
 0x216   :  { %v746_v24 = vmul.f32 %v737_v62, %v2206_v36  ;;  %v752_v39 = vmul.f32 %v737_v62, %v2208_v14  ;;  %v741_v10 = vmul.f32 %v737_v62, %v2218_v29  ;;  %v786_v62 = vmul.f32 %v2189_v47, %v2159_v57 }
 0x218   :  { %v747_v12 = vadd.f32 %v746_v24, %v745_v25  ;;  %v753_v60 = vadd.f32 %v752_v39, %v751_v46 }
 0x21d   :  { %v691_v17 = vpop.permute.xlu0 %690  ;;  %v777_v48 = vpop.permute.xlu2 %776 }
 0x21e   :  { %v695_v22 = vmul.f32 %v2195_v61, %v691_v17  ;;  %v703_v16 = vmul.f32 %v2191_v52, %v691_v17  ;;  %v785_v32 = vmul.f32 %v777_v48, %v2191_v52 }
 0x220   :  { %v711_v0 = vpop.permute.xlu1 %710  ;;  %v698_v37 = vadd.f32 %v697_v21, %v695_v22  ;;  %v706_v40 = vadd.f32 %v705_v5, %v703_v16  ;;  %v771_v21 = vmul.f32 %v2193_v15, %v2141_v33 }
 0x221   :  { %v714_v6 = vmul.f32 %v711_v0, %v2195_v61  ;;  %v719_v19 = vmul.f32 %v711_v0, %v2191_v52  ;;  %v726_v30 = vmul.f32 %v2203_v2, %v711_v0  ;;  %v765_v0 = vmul.f32 %v2189_v47, %v2141_v33 }
 0x223   :  { %v716_v45 = vadd.f32 %v715_v42, %v714_v6  ;;  %v721_v23 = vadd.f32 %v720_v9, %v719_v19  ;;  %v729_v4 = vadd.f32 %v728_v51, %v726_v30  ;;  %v760_v6 = vmul.f32 %v2187_v20, %v2141_v33 }
 0x224   :  { %v791_v51 = vmul.f32 %v777_v48, %v2203_v2 }
 0x225   :  { %v693_v44 = vpop.permute.xlu0 %692 }
 0x226   :  { %v700_v35 = vmul.f32 %v2218_v29, %v693_v44  ;;  %v708_v34 = vmul.f32 %v2206_v36, %v693_v44  ;;  %v740_v44 = vadd.f32 %v739_v27, %v738_v41 }
 0x228   :  { %v713_v50 = vpop.permute.xlu1 %712  ;;  %v701_v28 = vadd.f32 %v700_v35, %v698_v37  ;;  %v709_v54 = vadd.f32 %v708_v34, %v706_v40  ;;  %v742_v25 = vadd.f32 %v741_v10, %v740_v44  ;;  %v800_v37 = vpop.permute.xlu2 %799 }
 0x229   :  { %v717_v43 = vmul.f32 %v713_v50, %v2218_v29  ;;  %v722_v38 = vmul.f32 %v713_v50, %v2206_v36  ;;  %v731_v58 = vmul.f32 %v2208_v14, %v713_v50 }
 0x22b   :  { %v718_v13 = vadd.f32 %v717_v43, %v716_v45  ;;  %v723_v49 = vadd.f32 %v722_v38, %v721_v23  ;;  %v732_v53 = vadd.f32 %v731_v58, %v729_v4  ;;  %v780_v4 = vmul.f32 %v777_v48, %v2195_v61 }
 0x22c   :  { %v787_v43 = vadd.f32 %v786_v62, %v785_v32  ;;  %v807_v48 = vmul.f32 %v2189_v47, %v2166_v8 }
 0x22d   :  { %v724_v56 = vadd.f32 %v723_v49, %v701_v28  ;;  %v733_v18 = vadd.f32 %v732_v53, %v709_v54  ;;  %v748_v7 = vadd.f32 %v747_v12, %v718_v13  ;;  %v756_v17 = vpop.permute.xlu0 %755  ;;  %v793_v12 = vadd.f32 %v792_v26, %v791_v51 }
 0x22e   :  { %v764_v5 = vmul.f32 %v756_v17, %v2191_v52  ;;  %v770_v42 = vmul.f32 %v756_v17, %v2203_v2  ;;  %v759_v19 = vmul.f32 %v756_v17, %v2195_v61  ;;  %v781_v49 = vmul.f32 %v2187_v20, %v2159_v57 }
 0x22f   :  { %v754_v22 = vadd.f32 %v753_v60, %v724_v56  ;;  %v856_v16 = vadd.f32 %v2237_v55, %v733_v18  ;;  %v813_v53 = vmul.f32 %v2193_v15, %v2166_v8 }
 0x230   :  { %v766_v3 = vadd.f32 %v765_v0, %v764_v5  ;;  %v772_v9 = vadd.f32 %v771_v21, %v770_v42  ;;  %v758_v30 = vpop.permute.xlu1 %757  ;;  %v761_v40 = vadd.f32 %v760_v6, %v759_v19  ;;  %v782_v17 = vadd.f32 %v781_v49, %v780_v4  ;;  %v840_v51 = vpop.permute.xlu2 %839 }
 0x231   :  { %v858_v24 = vadd.f32 %v2237_v55, %v754_v22  ;;  %v767_v11 = vmul.f32 %v758_v30, %v2206_v36  ;;  %v773_v35 = vmul.f32 %v758_v30, %v2208_v14  ;;  %v857_v33 = vmul.f32 %v1722_v1, %v856_v16 }
 0x232   :  { %v762_v45 = vmul.f32 %v758_v30, %v2218_v29  ;;  %v809_v22 = vmul.f32 %v800_v37, %v2206_v36  ;;  %v815_v16 = vmul.f32 %v800_v37, %v2208_v14  ;;  %v823_v4 = vmul.f32 %v2187_v20, %v2172_v63 }
 0x233   :  { %v768_v39 = vadd.f32 %v767_v11, %v766_v3  ;;  %v859_v34 = vmul.f32 %v1722_v1, %v858_v24  ;;  %v774_v23 = vadd.f32 %v773_v35, %v772_v9  ;;  %v2264_v50 = vmax.f32 %v857_v33, 0.0 }
 0x234   :  { %v763_v41 = vadd.f32 %v762_v45, %v761_v40  ;;  %v802_v9 = vmul.f32 %v2187_v20, %v2166_v8  ;;  %v828_v11 = vmul.f32 %v2189_v47, %v2172_v63  ;;  %v834_v8 = vmul.f32 %v2193_v15, %v2172_v63  ;;  %v1106_v40 = vld [vmem:[%s2982_s3 + $0x78] sm:$0xff] }
 0x235   :  { %v769_v38 = vadd.f32 %v768_v39, %v742_v25  ;;  %v779_v58 = vpop.permute.xlu0 %778  ;;  %v2267_v46 = vmax.f32 %v859_v34, 0.0  ;;  %v775_v28 = vadd.f32 %v774_v23, %v748_v7  ;;  %890 = vrot.lane.b32.xlu0 %v2264_v50, %s1546_s12  ;;  %v804_v45 = vmul.f32 %v800_v37, %v2218_v29  ;;  %1223 = vmatpush.msra.mxu0 %v1106_v40  ;;  %v1136_v40 = vld [vmem:[%s2982_s3 + $0x168] sm:$0xff] }
 0x236   :  { %v788_v54 = vmul.f32 %v779_v58, %v2206_v36  ;;  %v794_v13 = vmul.f32 %v779_v58, %v2208_v14  ;;  %v783_v0 = vmul.f32 %v779_v58, %v2218_v29  ;;  %v849_v58 = vmul.f32 %v840_v51, %v2203_v2 }
 0x237   :  { %910 = vrot.lane.b32.xlu1 %v2267_v46, %s1546_s12  ;;  %v860_v60 = vadd.f32 %v2237_v55, %v775_v28 }
 0x238   :  { %v789_v56 = vadd.f32 %v788_v54, %v787_v43  ;;  %v795_v18 = vadd.f32 %v794_v13, %v793_v12  ;;  %v798_v7 = vpop.permute.xlu1 %797  ;;  %v784_v44 = vadd.f32 %v783_v0, %v782_v17  ;;  %v844_v54 = vmul.f32 %v2189_v47, %v2181_v59 }
 0x239   :  { %v806_v57 = vmul.f32 %v798_v7, %v2191_v52  ;;  %v812_v21 = vmul.f32 %v798_v7, %v2203_v2  ;;  %v861_v5 = vmul.f32 %v1722_v1, %v860_v60  ;;  %v801_v10 = vmul.f32 %v798_v7, %v2195_v61 }
 0x23a   :  { %v790_v42 = vadd.f32 %v789_v56, %v763_v41  ;;  %v796_v27 = vadd.f32 %v795_v18, %v769_v38  ;;  %v850_v13 = vmul.f32 %v2193_v15, %v2181_v59 }
 0x23b   :  { %v808_v6 = vadd.f32 %v807_v48, %v806_v57  ;;  %v814_v19 = vadd.f32 %v813_v53, %v812_v21  ;;  %v2292_v30 = vmax.f32 %v861_v5, 0.0  ;;  %v803_v35 = vadd.f32 %v802_v9, %v801_v10  ;;  %v1104_v9 = vld [vmem:[%s2982_s3 + $0x68] sm:$0xff] }
 0x23c   :  { %v862_v3 = vadd.f32 %v2237_v55, %v796_v27  ;;  %v851_v60 = vadd.f32 %v850_v13, %v849_v58  ;;  %v1115_v58 = vld [vmem:[%s2982_s3 + $0xc0] sm:$0xff]  ;;  %v1133_v13 = vld [vmem:[%s2982_s3 + $0x150] sm:$0xff] }
 0x23d   :  { %v810_v32 = vadd.f32 %v809_v22, %v808_v6  ;;  %v816_v24 = vadd.f32 %v815_v16, %v814_v19  ;;  %v819_v62 = vpop.permute.xlu0 %818  ;;  %892 = vrot.lane.b32.xlu0 %v2264_v50, %s1547_s14  ;;  %934 = vrot.lane.b32.xlu2 %v2292_v30, %s1546_s12  ;;  %v805_v49 = vadd.f32 %v804_v45, %v803_v35  ;;  %v1119_v35 = vld [vmem:[%s2982_s3 + $0xe0] sm:$0xff]  ;;  %v1152_v45 = vld [vmem:[%s2982_s3 + $0x1e8] sm:$0xff] }
 0x23e   :  { %v827_v33 = vmul.f32 %v819_v62, %v2191_v52  ;;  %v822_v26 = vmul.f32 %v819_v62, %v2195_v61  ;;  %v833_v39 = vmul.f32 %v819_v62, %v2203_v2  ;;  %v863_v23 = vmul.f32 %v1722_v1, %v862_v3  ;;  %v1122_v3 = vld [vmem:[%s2982_s3 + $0xf8] sm:$0xff] }
 0x23f   :  { %v817_v25 = vadd.f32 %v816_v24, %v790_v42  ;;  %936 = vrot.lane.b32.xlu1 %v2292_v30, %s1547_s14  ;;  %v811_v34 = vadd.f32 %v810_v32, %v784_v44  ;;  %v843_v61 = vmul.f32 %v840_v51, %v2191_v52  ;;  %1243 = vmatpush.msra.mxu1 %v1122_v3  ;;  %v1121_v44 = vld [vmem:[%s2982_s3 + $0xf0] sm:$0xff]  ;;  %v1103_v32 = vld [vmem:[%s2982_s3 + $0x60] sm:$0xff]  ;;  %v1120_v24 = vld [vmem:[%s2982_s3 + $0xe8] sm:$0xff] }
 0x240   :  { %v829_v43 = vadd.f32 %v828_v11, %v827_v33  ;;  %v821_v38 = vpop.permute.xlu1 %820  ;;  %v835_v12 = vadd.f32 %v834_v8, %v833_v39  ;;  %v824_v63 = vadd.f32 %v823_v4, %v822_v26  ;;  %v2324_v2 = vmax.f32 %v863_v23, 0.0  ;;  %v1138_v11 = vld [vmem:[%s2982_s3 + $0x178] sm:$0xff]  ;;  %v1101_v8 = vld [vmem:[%s2982_s3 + $0x50] sm:$0xff]  ;;  %v1100_v39 = vld [vmem:[%s2982_s3 + $0x48] sm:$0xff] }
 0x241   :  { %v830_v28 = vmul.f32 %v821_v38, %v2206_v36  ;;  %v836_v37 = vmul.f32 %v821_v38, %v2208_v14  ;;  %v864_v48 = vadd.f32 %v2237_v55, %v817_v25  ;;  %v825_v52 = vmul.f32 %v821_v38, %v2218_v29  ;;  %1244 = vmatpush.msra.mxu1 %v1121_v44  ;;  %v1154_v62 = vld [vmem:[%s2982_s3 + $0x1f8] sm:$0xff]  ;;  %v1137_v25 = vld [vmem:[%s2982_s3 + $0x170] sm:$0xff]  ;;  %v1099_v23 = vld [vmem:[%s2982_s3 + $0x40] sm:$0xff] }
 0x242   :  { %v845_v41 = vadd.f32 %v844_v54, %v843_v61  ;;  %v1102_v51 = vld [vmem:[%s2982_s3 + $0x58] sm:$0xff]  ;;  %1263 = vmatpush.msra.mxu2 %v1138_v11  ;;  %1283 = vmatpush.msra.mxu3 %v1154_v62  ;;  %v1153_v26 = vld [vmem:[%s2982_s3 + $0x1f0] sm:$0xff]  ;;  %v1116_v4 = vld [vmem:[%s2982_s3 + $0xc8] sm:$0xff] }
 0x243   :  { %v831_v20 = vadd.f32 %v830_v28, %v829_v43  ;;  %v837_v53 = vadd.f32 %v836_v37, %v835_v12  ;;  %v826_v29 = vadd.f32 %v825_v52, %v824_v63  ;;  %v865_v0 = vmul.f32 %v1722_v1, %v864_v48  ;;  %1245 = vmatpush.msra.mxu1 %v1120_v24  ;;  %v1118_v33 = vld [vmem:[%s2982_s3 + $0xd8] sm:$0xff]  ;;  %v1135_v43 = vld [vmem:[%s2982_s3 + $0x160] sm:$0xff]  ;;  %v1097_v54 = vld [vmem:[%s2982_s3 + $0x30] sm:$0xff] }
 0x244   :  { %1264 = vmatpush.msra.mxu2 %v1137_v25  ;;  %1284 = vmatpush.msra.mxu3 %v1153_v26  ;;  %v1151_v38 = vld [vmem:[%s2982_s3 + $0x1e0] sm:$0xff]  ;;  %v1098_v61 = vld [vmem:[%s2982_s3 + $0x38] sm:$0xff]  ;;  %v1096_v63 = vld [vmem:[%s2982_s3 + $0x28] sm:$0xff] }
 0x245   :  { %v832_v56 = vadd.f32 %v831_v20, %v805_v49  ;;  %v842_v18 = vpop.permute.xlu0 %841  ;;  %v838_v47 = vadd.f32 %v837_v53, %v811_v34  ;;  %912 = vrot.lane.b32.xlu0 %v2267_v46, %s1547_s14  ;;  %955 = vrot.lane.b32.xlu2 %v2324_v2, %s1546_s12  ;;  %v2337_v27 = vmax.f32 %v865_v0, 0.0  ;;  %v1117_v34 = vld [vmem:[%s2982_s3 + $0xd0] sm:$0xff]  ;;  %v1134_v12 = vld [vmem:[%s2982_s3 + $0x158] sm:$0xff] }
 0x246   :  { %v846_v59 = vmul.f32 %v842_v18, %v2206_v36  ;;  %v852_v15 = vmul.f32 %v842_v18, %v2208_v14  ;;  %1246 = vmatpush.msra.mxu1 %v1119_v35  ;;  %1265 = vmatpush.msra.mxu2 %v1136_v40  ;;  %v1150_v28 = vld [vmem:[%s2982_s3 + $0x1d8] sm:$0xff]  ;;  %v1149_v49 = vld [vmem:[%s2982_s3 + $0x1d0] sm:$0xff]  ;;  %v1132_v48 = vld [vmem:[%s2982_s3 + $0x148] sm:$0xff] }
 0x247   :  { %957 = vrot.lane.b32.xlu1 %v2324_v2, %s1547_s14  ;;  %v866_v5 = vadd.f32 %v2237_v55, %v838_v47  ;;  %1285 = vmatpush.msra.mxu3 %v1152_v45  ;;  %v1114_v37 = vld [vmem:[%s2982_s3 + $0xb8] sm:$0xff]  ;;  %v1113_v20 = vld [vmem:[%s2982_s3 + $0xb0] sm:$0xff]  ;;  %v1148_v52 = vld [vmem:[%s2982_s3 + $0x1c8] sm:$0xff] }
 0x248   :  { %v847_v7 = vadd.f32 %v846_v59, %v845_v41  ;;  %v853_v17 = vadd.f32 %v852_v15, %v851_v60  ;;  %1247 = vmatpush.msra.mxu1 %v1118_v33  ;;  %1266 = vmatpush.msra.mxu2 %v1135_v43  ;;  %v1095_v53 = vld [vmem:[%s2982_s3 + $0x20] sm:$0xff]  ;;  %v1112_v41 = vld [vmem:[%s2982_s3 + $0xa8] sm:$0xff]  ;;  %v1094_v18 = vld [vmem:[%s2982_s3 + $0x18] sm:$0xff] }
 0x249   :  { %v867_v14 = vmul.f32 %v1722_v1, %v866_v5  ;;  %1286 = vmatpush.msra.mxu3 %v1151_v38  ;;  %v1131_v60 = vld [vmem:[%s2982_s3 + $0x140] sm:$0xff]  ;;  %v1130_v59 = vld [vmem:[%s2982_s3 + $0x138] sm:$0xff]  ;;  %v1145_v0 = vld [vmem:[%s2982_s3 + $0x1b0] sm:$0xff] }
 0x24a   :  { %v848_v57 = vadd.f32 %v847_v7, %v826_v29  ;;  %v854_v21 = vadd.f32 %v853_v17, %v832_v56  ;;  %1248 = vmatpush.msra.mxu1 %v1117_v34  ;;  %1267 = vmatpush.msra.mxu2 %v1134_v12  ;;  %v1147_v56 = vld [vmem:[%s2982_s3 + $0x1c0] sm:$0xff]  ;;  %v1146_v15 = vld [vmem:[%s2982_s3 + $0x1b8] sm:$0xff]  ;;  %v1093_v29 = vld [vmem:[%s2982_s3 + $0x10] sm:$0xff] }
 0x24b   :  { %v2350_v16 = vmax.f32 %v867_v14, 0.0  ;;  %1287 = vmatpush.msra.mxu3 %v1150_v28  ;;  %v1111_v47 = vld [vmem:[%s2982_s3 + $0xa0] sm:$0xff]  ;;  %v1110_v7 = vld [vmem:[%s2982_s3 + $0x98] sm:$0xff]  ;;  %v1129_v17 = vld [vmem:[%s2982_s3 + $0x130] sm:$0xff] }
 0x24c   :  { %v868_v42 = vadd.f32 %v2237_v55, %v854_v21  ;;  %v870_v10 = vadd.f32 %v2237_v55, %v848_v57  ;;  %v1105_v55 = vld [vmem:[%s2982_s3 + $0x70] sm:$0xff]  ;;  %1249 = vmatpush.msra.mxu1 %v1116_v4  ;;  %1268 = vmatpush.msra.mxu2 %v1133_v13  ;;  %v1092_v57 = vld [vmem:[%s2982_s3 + $0x8] sm:$0xff]  ;;  %v1107_v3 = vld [vmem:[%s2982_s3 + $0x80] sm:$0xff] }
 0x24d   :  { %976 = vrot.lane.b32.xlu2 %v2337_v27, %s1546_s12  ;;  %1224 = vmatpush.msra.mxu0 %v1105_v55  ;;  %v1109_v21 = vld [vmem:[%s2982_s3 + $0x90] sm:$0xff]  ;;  %v1128_v5 = vld [vmem:[%s2982_s3 + $0x128] sm:$0xff]  ;;  %v1170_v55 = vld [vmem:[%s2982_s3 + $0x278] sm:$0xff] }
 0x24e   :  { %v869_v36 = vmul.f32 %v1722_v1, %v868_v42  ;;  %v871_v6 = vmul.f32 %v1722_v1, %v870_v10  ;;  %1250 = vmatpush.msra.mxu1 %v1115_v58  ;;  %1288 = vmatpush.msra.mxu3 %v1149_v49  ;;  %v1144_v42 = vld [vmem:[%s2982_s3 + $0x1a8] sm:$0xff]  ;;  %v1127_v10 = vld [vmem:[%s2982_s3 + $0x120] sm:$0xff]  ;;  %v1142_v44 = vld [vmem:[%s2982_s3 + $0x198] sm:$0xff] }
 0x24f   :  { %978 = vrot.lane.b32.xlu1 %v2337_v27, %s1547_s14  ;;  %1225 = vmatpush.msra.mxu0 %v1104_v9  ;;  %v1108_v14 = vld [vmem:[%s2982_s3 + $0x88] sm:$0xff]  ;;  %v1126_v9 = vld [vmem:[%s2982_s3 + $0x118] sm:$0xff]  ;;  %v1125_v11 = vld [vmem:[%s2982_s3 + $0x110] sm:$0xff] }
 0x250   :  { %v2346_v22 = vmax.f32 %v869_v36, 0.0  ;;  %v2357_v19 = vmax.f32 %v871_v6, 0.0  ;;  %1251 = vmatpush.msra.mxu1 %v1114_v37  ;;  %1269 = vmatpush.msra.mxu2 %v1132_v48  ;;  %v1091_v36 = vld [vmem:[%s2982_s3] sm:$0xff]  ;;  %v1186_v24 = vld [vmem:[%s2982_s3 + $0x2f8] sm:$0xff]  ;;  %v1141_v62 = vld [vmem:[%s2982_s3 + $0x190] sm:$0xff] }
 0x251   :  { %1226 = vmatpush.msra.mxu0 %v1103_v32  ;;  %1289 = vmatpush.msra.mxu3 %v1148_v52  ;;  %v1143_v6 = vld [vmem:[%s2982_s3 + $0x1a0] sm:$0xff]  ;;  %v1169_v32 = vld [vmem:[%s2982_s3 + $0x270] sm:$0xff]  ;;  %v1140_v33 = vld [vmem:[%s2982_s3 + $0x188] sm:$0xff] }
 0x252   :  { %1018 = vrot.lane.b32.xlu0 %v2346_v22, %s1546_s12  ;;  %1252 = vmatpush.msra.mxu1 %v1113_v20  ;;  %v1185_v35 = vld [vmem:[%s2982_s3 + $0x2f0] sm:$0xff]  ;;  %v1167_v26 = vld [vmem:[%s2982_s3 + $0x260] sm:$0xff]  ;;  %v1166_v45 = vld [vmem:[%s2982_s3 + $0x258] sm:$0xff] }
 0x253   :  { %1227 = vmatpush.msra.mxu0 %v1102_v51  ;;  %1270 = vmatpush.msra.mxu2 %v1131_v60  ;;  %v1168_v51 = vld [vmem:[%s2982_s3 + $0x268] sm:$0xff]  ;;  %v1123_v34 = vld [vmem:[%s2982_s3 + $0x100] sm:$0xff]  ;;  %v1202_v4 = vld [vmem:[%s2982_s3 + $0x378] sm:$0xff] }
 0x254   :  { %1253 = vmatpush.msra.mxu1 %v1112_v41  ;;  %1290 = vmatpush.msra.mxu3 %v1147_v56  ;;  %v1139_v40 = vld [vmem:[%s2982_s3 + $0x180] sm:$0xff]  ;;  %v1218_v43 = vld [vmem:[%s2982_s3 + $0x3f8] sm:$0xff]  ;;  %v1165_v38 = vld [vmem:[%s2982_s3 + $0x250] sm:$0xff]  ;;  %v2642_v41 = vstv %s2585_s9 }
 0x255   :  { %997 = vrot.lane.b32.xlu2 %v2350_v16, %s1546_s12  ;;  %1228 = vmatpush.msra.mxu0 %v1101_v8  ;;  %v1124_v8 = vld [vmem:[%s2982_s3 + $0x108] sm:$0xff]  ;;  %v1201_v58 = vld [vmem:[%s2982_s3 + $0x370] sm:$0xff]  ;;  %v1163_v49 = vld [vmem:[%s2982_s3 + $0x240] sm:$0xff] }
 0x256   :  { %1254 = vmatpush.msra.mxu1 %v1111_v47  ;;  %1271 = vmatpush.msra.mxu2 %v1130_v59  ;;  %v1217_v12 = vld [vmem:[%s2982_s3 + $0x3f0] sm:$0xff]  ;;  %v1164_v28 = vld [vmem:[%s2982_s3 + $0x248] sm:$0xff]  ;;  %v1199_v52 = vld [vmem:[%s2982_s3 + $0x360] sm:$0xff] }
 0x257   :  { %999 = vrot.lane.b32.xlu1 %v2350_v16, %s1547_s14  ;;  %1229 = vmatpush.msra.mxu0 %v1100_v39  ;;  %v1184_v39 = vld [vmem:[%s2982_s3 + $0x2e8] sm:$0xff]  ;;  %v1215_v56 = vld [vmem:[%s2982_s3 + $0x3e0] sm:$0xff]  ;;  %v1162_v47 = vld [vmem:[%s2982_s3 + $0x238] sm:$0xff] }
 0x258   :  { %1291 = vmatpush.msra.mxu3 %v1146_v15  ;;  %1255 = vmatpush.msra.mxu1 %v1110_v7  ;;  %v1200_v37 = vld [vmem:[%s2982_s3 + $0x368] sm:$0xff]  ;;  %v1179_v59 = vld [vmem:[%s2982_s3 + $0x2c0] sm:$0xff]  ;;  %v2663_v15 = vstv %s2601_s18  ;;  %v1214_v7 = vld [vmem:[%s2982_s3 + $0x3d8] sm:$0xff] }
 0x259   :  { %1230 = vmatpush.msra.mxu0 %v1099_v23  ;;  %1272 = vmatpush.msra.mxu2 %v1129_v17  ;;  %v1183_v23 = vld [vmem:[%s2982_s3 + $0x2e0] sm:$0xff]  ;;  %v1216_v13 = vld [vmem:[%s2982_s3 + $0x3e8] sm:$0xff]  ;;  %v2672_v17 = vstv %s2609_s23  ;;  %s1549_s23 = smov [#allocation9]  }
 0x25a   :  { %1039 = vrot.lane.b32.xlu0 %v2357_v19, %s1546_s12  ;;  %1292 = vmatpush.msra.mxu3 %v1145_v0  ;;  %s1406_s30 = sshll.u32 %s1549_s23, 4  ;;  %s1407_s30 = int_to_ptr.vmem [resolvable:$true] %s1406_s30 }
 0x25b   :  { %1231 = vmatpush.msra.mxu0 %v1098_v61  ;;  %1256 = vmatpush.msra.mxu1 %v1109_v21  ;;  %v1182_v61 = vld [vmem:[%s2982_s3 + $0x2d8] sm:$0xff] }
 0x25c   :  { %1273 = vmatpush.msra.mxu2 %v1128_v5  ;;  %1293 = vmatpush.msra.mxu3 %v1144_v42  ;;  %v1161_v5 = vld [vmem:[%s2982_s3 + $0x230] sm:$0xff]  ;;  %v1178_v42 = vld [vmem:[%s2982_s3 + $0x2b8] sm:$0xff] }
 0x25d   :  { %1020 = vrot.lane.b32.xlu2 %v2346_v22, %s1547_s14  ;;  %1232 = vmatpush.msra.mxu0 %v1097_v54  ;;  %v1181_v54 = vld [vmem:[%s2982_s3 + $0x2d0] sm:$0xff] }
 0x25e   :  { %1257 = vmatpush.msra.mxu1 %v1108_v14  ;;  %1274 = vmatpush.msra.mxu2 %v1127_v10 }
 0x25f   :  { %1041 = vrot.lane.b32.xlu1 %v2357_v19, %s1547_s14  ;;  %1233 = vmatpush.msra.mxu0 %v1096_v63  ;;  %s2617_s14 = sld [smem:[#allocation4 + $0x2a]]  ;;  %v1180_v63 = vld [vmem:[%s2982_s3 + $0x2c8] sm:$0xff] }
 0x260   :  { %1294 = vmatpush.msra.mxu3 %v1143_v6  ;;  %1258 = vmatpush.msra.mxu1 %v1107_v3  ;;  %v1197_v6 = vld [vmem:[%s2982_s3 + $0x350] sm:$0xff] }
 0x261   :  { %1234 = vmatpush.msra.mxu0 %v1095_v53  ;;  %1275 = vmatpush.msra.mxu2 %v1126_v9  ;;  %v2639_v53 = vstv %s2577_s27  ;;  %v944_v9 = vmul.f32 %v2642_v41, %v2292_v30 }
 0x262   :  { %1295 = vmatpush.msra.mxu3 %v1142_v44  ;;  %1323 = vmatpush.msrb.mxu1 %v1186_v24  ;;  %v2676_v0 = vmul.f32 %v2639_v53, %v2264_v50  ;;  %v2684_v21 = vmul.f32 %v2639_v53, %v2267_v46  ;;  %v939_v14 = vmul.f32 %v2639_v53, %v2292_v30  ;;  %v1160_v44 = vld [vmem:[%s2982_s3 + $0x228] sm:$0xff] }
 0x263   :  { %1235 = vmatpush.msra.mxu0 %v1094_v18  ;;  %1276 = vmatpush.msra.mxu2 %v1125_v11  ;;  %v2652_v18 = vstv %s2593_s2  ;;  %v2726_v24 = vmul.f32 %v2639_v53, %v2324_v2  ;;  %v965_v11 = vmul.f32 %v2642_v41, %v2324_v2 }
 0x264   :  { %1296 = vmatpush.msra.mxu3 %v1141_v62  ;;  %1324 = vmatpush.msrb.mxu1 %v1185_v35  ;;  %v2703_v10 = vmul.f32 %v2652_v18, %v2267_v46  ;;  %v971_v35 = vmul.f32 %v2652_v18, %v2324_v2  ;;  %v2754_v2 = vmul.f32 %v2652_v18, %v2337_v27 }
 0x265   :  { %1236 = vmatpush.msra.mxu0 %v1093_v29  ;;  %1277 = vmatpush.msra.mxu2 %v1124_v8  ;;  %v1198_v29 = vld [vmem:[%s2982_s3 + $0x358] sm:$0xff] }
 0x266   :  { %1297 = vmatpush.msra.mxu3 %v1140_v33  ;;  %1325 = vmatpush.msrb.mxu1 %v1184_v39  ;;  %v1196_v33 = vld [vmem:[%s2982_s3 + $0x348] sm:$0xff]  ;;  %v2750_v39 = vmul.f32 %v2642_v41, %v2337_v27 }
 0x267   :  { %1237 = vmatpush.msra.mxu0 %v1092_v57  ;;  %1278 = vmatpush.msra.mxu2 %v1123_v34  ;;  %v2680_v57 = vmul.f32 %v2642_v41, %v2264_v50  ;;  %v2699_v50 = vmul.f32 %v2642_v41, %v2267_v46  ;;  %v950_v46 = vmul.f32 %v2652_v18, %v2292_v30  ;;  %v1177_v30 = vld [vmem:[%s2982_s3 + $0x2b0] sm:$0xff] }
 0x268   :  { %1298 = vmatpush.msra.mxu3 %v1139_v40  ;;  %1326 = vmatpush.msrb.mxu1 %v1183_v23  ;;  %v1212_v40 = vld [vmem:[%s2982_s3 + $0x3c8] sm:$0xff] }
 0x269   :  { %1238 = vmatpush.msra.mxu0 %v1091_v36  ;;  %1343 = vmatpush.msrb.mxu2 %v1202_v4  ;;  %v2693_v36 = vstv %s2617_s14  ;;  %v2764_v4 = vstv %s2646_s16  ;;  %s1408_s14 = sshll.u32 %s2986_s7, 4  ;;  %s1409_s14 = int_to_ptr.hbm [resolvable:$true] %s1408_s14 }
 0x26a   :  { %1363 = vmatpush.msrb.mxu3 %v1218_v43  ;;  %1327 = vmatpush.msrb.mxu1 %v1182_v61  ;;  %v2767_v43 = vstv %s2654_s20  ;;  %v1176_v61 = vld [vmem:[%s2982_s3 + $0x2a8] sm:$0xff] }
 0x26b   :  { %1303 = vmatpush.msrb.mxu0 %v1170_v55  ;;  %1344 = vmatpush.msrb.mxu2 %v1201_v58  ;;  %v1213_v55 = vld [vmem:[%s2982_s3 + $0x3d0] sm:$0xff] }
 0x26c   :  { %1364 = vmatpush.msrb.mxu3 %v1217_v12  ;;  %1328 = vmatpush.msrb.mxu1 %v1181_v54 }
 0x26d   :  { %1304 = vmatpush.msrb.mxu0 %v1169_v32  ;;  %1345 = vmatpush.msrb.mxu2 %v1200_v37  ;;  %v1195_v37 = vld [vmem:[%s2982_s3 + $0x340] sm:$0xff] }
 0x26e   :  { %1365 = vmatpush.msrb.mxu3 %v1216_v13  ;;  %1329 = vmatpush.msrb.mxu1 %v1180_v63  ;;  %v1211_v13 = vld [vmem:[%s2982_s3 + $0x3c0] sm:$0xff] }
 0x26f   :  { %1305 = vmatpush.msrb.mxu0 %v1168_v51  ;;  %1346 = vmatpush.msrb.mxu2 %v1199_v52 }
 0x270   :  { %1366 = vmatpush.msrb.mxu3 %v1215_v56  ;;  %1330 = vmatpush.msrb.mxu1 %v1179_v59  ;;  %v1158_v56 = vld [vmem:[%s2982_s3 + $0x218] sm:$0xff] }
 0x271   :  { %1306 = vmatpush.msrb.mxu0 %v1167_v26  ;;  %1347 = vmatpush.msrb.mxu2 %v1198_v29 }
 0x272   :  { %1367 = vmatpush.msrb.mxu3 %v1214_v7  ;;  %1331 = vmatpush.msrb.mxu1 %v1178_v42  ;;  %v2812_v7 = vstv %s2705_s29  ;;  %v1210_v42 = vld [vmem:[%s2982_s3 + $0x3b8] sm:$0xff] }
 0x273   :  { %1307 = vmatpush.msrb.mxu0 %v1166_v45  ;;  %1348 = vmatpush.msrb.mxu2 %v1197_v6 }
 0x274   :  { %1368 = vmatpush.msrb.mxu3 %v1213_v55  ;;  %1332 = vmatpush.msrb.mxu1 %v1177_v30 }
 0x275   :  { %1308 = vmatpush.msrb.mxu0 %v1165_v38  ;;  %v2771_v38 = vmul.f32 %v2639_v53, %v2350_v16  ;;  %1349 = vmatpush.msrb.mxu2 %v1196_v33  ;;  %v1156_v33 = vld [vmem:[%s2982_s3 + $0x208] sm:$0xff] }
 0x276   :  { %1369 = vmatpush.msrb.mxu3 %v1212_v40  ;;  %1333 = vmatpush.msrb.mxu1 %v1176_v61 }
 0x277   :  { %1309 = vmatpush.msrb.mxu0 %v1164_v28  ;;  %1350 = vmatpush.msrb.mxu2 %v1195_v37  ;;  %v1192_v37 = vld [vmem:[%s2982_s3 + $0x328] sm:$0xff] }
 0x278   :  { %1370 = vmatpush.msrb.mxu3 %v1211_v13 }
 0x279   :  { %1310 = vmatpush.msrb.mxu0 %v1163_v49 }
 0x27a   :  { %1371 = vmatpush.msrb.mxu3 %v1210_v42  ;;  %v1172_v42 = vld [vmem:[%s2982_s3 + $0x288] sm:$0xff] }
 0x27b   :  { %1311 = vmatpush.msrb.mxu0 %v1162_v47  ;;  %v1175_v47 = vld [vmem:[%s2982_s3 + $0x2a0] sm:$0xff] }
 0x27c   :  { %1334 = vmatpush.msrb.mxu1 %v1175_v47 }
 0x27d   :  { %1312 = vmatpush.msrb.mxu0 %v1161_v5  ;;  %v1194_v5 = vld [vmem:[%s2982_s3 + $0x338] sm:$0xff] }
 0x27e   :  { %1351 = vmatpush.msrb.mxu2 %v1194_v5  ;;  %v1155_v5 = vld [vmem:[%s2982_s3 + $0x200] sm:$0xff] }
 0x27f   :  { %1313 = vmatpush.msrb.mxu0 %v1160_v44  ;;  %v1174_v44 = vld [vmem:[%s2982_s3 + $0x298] sm:$0xff] }
 0x280   :  { %1335 = vmatpush.msrb.mxu1 %v1174_v44 }
 0x297   :  { %v2563_v25 = vpop.permute.xlu2 %934 }
 0x298   :  { %v938_v3 = vmul.f32 %v2563_v25, %v2663_v15  ;;  %v943_v32 = vmul.f32 %v2563_v25, %v2672_v17  ;;  %v949_v62 = vmul.f32 %v2563_v25, %v2693_v36  ;;  %v2746_v25 = vmul.f32 %v2639_v53, %v2337_v27  ;;  %v1159_v27 = vld [vmem:[%s2982_s3 + $0x220] sm:$0xff] }
 0x299   :  { %1314 = vmatpush.msrb.mxu0 %v1159_v27  ;;  %v1173_v27 = vld [vmem:[%s2982_s3 + $0x290] sm:$0xff] }
 0x29a   :  { %v2759_v45 = vadd.f32 %v939_v14, %v938_v3  ;;  %v945_v58 = vadd.f32 %v944_v9, %v943_v32  ;;  %v951_v49 = vadd.f32 %v950_v46, %v949_v62  ;;  %1336 = vmatpush.msrb.mxu1 %v1173_v27 }
 0x29b   :  { %1315 = vmatpush.msrb.mxu0 %v1158_v56 }
 0x29c   :  { %1337 = vmatpush.msrb.mxu1 %v1172_v42  ;;  %v1028_v42 = vmul.f32 %v2642_v41, %v2346_v22 }
 0x29f   :  { %v2631_v20 = vpop.permute.xlu2 %955 }
 0x2a0   :  { %v964_v51 = vmul.f32 %v2631_v20, %v2672_v17  ;;  %v970_v26 = vmul.f32 %v2631_v20, %v2693_v36  ;;  %v2793_v63 = vmul.f32 %v2631_v20, %v2663_v15 }
 0x2a2   :  { %v966_v52 = vadd.f32 %v965_v11, %v964_v51  ;;  %v972_v59 = vadd.f32 %v971_v35, %v970_v26 }
 0x2a7   :  { %v2633_v48 = vpop.permute.xlu0 %890  ;;  %v2761_v23 = vpop.permute.xlu2 %976 }
 0x2a8   :  { %v895_v12 = vmul.f32 %v2663_v15, %v2633_v48  ;;  %v903_v28 = vmul.f32 %v2672_v17, %v2633_v48  ;;  %v2807_v20 = vmul.f32 %v2761_v23, %v2672_v17 }
 0x2a9   :  { %v2644_v60 = vpop.permute.xlu1 %910 }
 0x2aa   :  { %v914_v54 = vmul.f32 %v2644_v60, %v2663_v15  ;;  %v919_v48 = vmul.f32 %v2644_v60, %v2672_v17  ;;  %v926_v29 = vmul.f32 %v2693_v36, %v2644_v60  ;;  %v1157_v60 = vld [vmem:[%s2982_s3 + $0x210] sm:$0xff]  ;;  %v898_v3 = vadd.f32 %v2676_v0, %v895_v12 }
 0x2ab   :  { %v906_v9 = vadd.f32 %v2680_v57, %v903_v28  ;;  %v1193_v0 = vld [vmem:[%s2982_s3 + $0x330] sm:$0xff]  ;;  %1316 = vmatpush.msrb.mxu0 %v1157_v60 }
 0x2ac   :  { %v916_v46 = vadd.f32 %v2684_v21, %v914_v54  ;;  %v921_v32 = vadd.f32 %v2699_v50, %v919_v48  ;;  %v929_v57 = vadd.f32 %v2703_v10, %v926_v29  ;;  %1352 = vmatpush.msrb.mxu2 %v1193_v0  ;;  %v2861_v29 = vstv %s2797_s25 }
 0x2ad   :  { %1317 = vmatpush.msrb.mxu0 %v1156_v33  ;;  %v980_v0 = vmul.f32 %v2761_v23, %v2663_v15 }
 0x2ae   :  { %1353 = vmatpush.msrb.mxu2 %v1192_v37 }
 0x2af   :  { %v893_v8 = vpop.permute.xlu0 %892  ;;  %v998_v13 = vpop.permute.xlu2 %997  ;;  %1318 = vmatpush.msrb.mxu0 %v1155_v5 }
 0x2b0   :  { %v900_v14 = vmul.f32 %v2764_v4, %v893_v8  ;;  %v908_v6 = vmul.f32 %v2767_v43, %v893_v8  ;;  %v1209_v8 = vld [vmem:[%s2982_s3 + $0x3b0] sm:$0xff] }
 0x2b1   :  { %v937_v34 = vpop.permute.xlu1 %936  ;;  %1372 = vmatpush.msrb.mxu3 %v1209_v8 }
 0x2b2   :  { %v946_v55 = vmul.f32 %v937_v34, %v2767_v43  ;;  %v941_v11 = vmul.f32 %v937_v34, %v2764_v4  ;;  %v952_v30 = vmul.f32 %v937_v34, %v2812_v7  ;;  %v901_v26 = vadd.f32 %v900_v14, %v898_v3 }
 0x2b3   :  { %v909_v34 = vadd.f32 %v908_v6, %v906_v9  ;;  %v2879_v3 = vmul.f32 %v2642_v41, %v2350_v16  ;;  %v1171_v9 = vld [vmem:[%s2982_s3 + $0x280] sm:$0xff] }
 0x2b4   :  { %v947_v10 = vadd.f32 %v946_v55, %v945_v58  ;;  %v1208_v58 = vld [vmem:[%s2982_s3 + $0x3a8] sm:$0xff]  ;;  %v942_v48 = vadd.f32 %v941_v11, %v2759_v45  ;;  %v953_v56 = vadd.f32 %v952_v30, %v951_v49  ;;  %v1191_v45 = vld [vmem:[%s2982_s3 + $0x320] sm:$0xff]  ;;  %v1190_v11 = vld [vmem:[%s2982_s3 + $0x318] sm:$0xff]  ;;  %1338 = vmatpush.msrb.mxu1 %v1171_v9 }
 0x2b5   :  { %v1207_v49 = vld [vmem:[%s2982_s3 + $0x3a0] sm:$0xff]  ;;  %1373 = vmatpush.msrb.mxu3 %v1208_v58  ;;  %v1206_v30 = vld [vmem:[%s2982_s3 + $0x398] sm:$0xff]  ;;  %1354 = vmatpush.msrb.mxu2 %v1191_v45 }
 0x2b7   :  { %v913_v62 = vpop.permute.xlu0 %912  ;;  %1374 = vmatpush.msrb.mxu3 %v1207_v49  ;;  %1355 = vmatpush.msrb.mxu2 %v1190_v11 }
 0x2b8   :  { %v917_v21 = vmul.f32 %v913_v62, %v2764_v4  ;;  %v922_v51 = vmul.f32 %v913_v62, %v2767_v43  ;;  %v931_v35 = vmul.f32 %v2812_v7, %v913_v62  ;;  %v961_v62 = vadd.f32 %v2726_v24, %v2793_v63  ;;  %v1189_v24 = vld [vmem:[%s2982_s3 + $0x310] sm:$0xff] }
 0x2b9   :  { %v958_v50 = vpop.permute.xlu1 %957  ;;  %1375 = vmatpush.msrb.mxu3 %v1206_v30  ;;  %1356 = vmatpush.msrb.mxu2 %v1189_v24 }
 0x2ba   :  { %v967_v40 = vmul.f32 %v958_v50, %v2767_v43  ;;  %v918_v61 = vadd.f32 %v917_v21, %v916_v46  ;;  %v923_v12 = vadd.f32 %v922_v51, %v921_v32  ;;  %v932_v28 = vadd.f32 %v931_v35, %v929_v57 }
 0x2bb   :  { %v973_v54 = vmul.f32 %v958_v50, %v2812_v7  ;;  %v962_v57 = vmul.f32 %v958_v50, %v2764_v4  ;;  %v987_v21 = vadd.f32 %v2750_v39, %v2807_v20  ;;  %v1001_v50 = vmul.f32 %v998_v13, %v2663_v15 }
 0x2bc   :  { %v968_v47 = vadd.f32 %v967_v40, %v966_v52  ;;  %v933_v6 = vadd.f32 %v932_v28, %v909_v34  ;;  %v924_v55 = vadd.f32 %v923_v12, %v901_v26  ;;  %v948_v60 = vadd.f32 %v947_v10, %v918_v61  ;;  %v1188_v40 = vld [vmem:[%s2982_s3 + $0x308] sm:$0xff] }
 0x2bd   :  { %v974_v14 = vadd.f32 %v973_v54, %v972_v59  ;;  %v991_v52 = vmul.f32 %v2761_v23, %v2693_v36  ;;  %v1205_v23 = vld [vmem:[%s2982_s3 + $0x390] sm:$0xff]  ;;  %v1006_v26 = vmul.f32 %v998_v13, %v2672_v17  ;;  %v963_v27 = vadd.f32 %v962_v57, %v961_v62  ;;  %1357 = vmatpush.msrb.mxu2 %v1188_v40 }
 0x2be   :  { %v969_v59 = vadd.f32 %v968_v47, %v942_v48  ;;  %v1056_v46 = vadd.f32 %v2861_v29, %v933_v6  ;;  %v954_v44 = vadd.f32 %v953_v56, %v924_v55  ;;  %1376 = vmatpush.msrb.mxu3 %v1205_v23  ;;  %v1012_v54 = vmul.f32 %v998_v13, %v2693_v36  ;;  %v1187_v48 = vld [vmem:[%s2982_s3 + $0x300] sm:$0xff]  ;;  %v1021_v47 = vpop.permute.xlu2 %1020 }
 0x2bf   :  { %v975_v32 = vadd.f32 %v974_v14, %v948_v60  ;;  %v993_v63 = vadd.f32 %v2754_v2, %v991_v52  ;;  %v1204_v2 = vld [vmem:[%s2982_s3 + $0x388] sm:$0xff]  ;;  %v1203_v56 = vld [vmem:[%s2982_s3 + $0x380] sm:$0xff]  ;;  %v982_v14 = vadd.f32 %v2746_v25, %v980_v0  ;;  %v1013_v6 = vmul.f32 %v2652_v18, %v2350_v16  ;;  %1358 = vmatpush.msrb.mxu2 %v1187_v48 }
 0x2c0   :  { %v1057_v35 = vmul.f32 %v1722_v1, %v1056_v46  ;;  %v1058_v8 = vadd.f32 %v2861_v29, %v954_v44  ;;  %1377 = vmatpush.msrb.mxu3 %v1204_v2  ;;  %v1034_v60 = vmul.f32 %v2652_v18, %v2346_v22  ;;  %v1003_v45 = vadd.f32 %v2771_v38, %v1001_v50 }
 0x2c1   :  { %v979_v51 = vpop.permute.xlu1 %978  ;;  %v1060_v33 = vadd.f32 %v2861_v29, %v975_v32  ;;  %v1014_v9 = vadd.f32 %v1013_v6, %v1012_v54  ;;  %v1030_v25 = vmul.f32 %v1021_v47, %v2767_v43  ;;  %v1036_v30 = vmul.f32 %v1021_v47, %v2812_v7 }
 0x2c2   :  { %v988_v39 = vmul.f32 %v979_v51, %v2767_v43  ;;  %v994_v20 = vmul.f32 %v979_v51, %v2812_v7  ;;  %1239 = vmatmul.f32.vlgmr.msra.gmra.mxu0 %v1057_v35  ;;  %v1059_v34 = vmul.f32 %v1722_v1, %v1058_v8  ;;  %v983_v55 = vmul.f32 %v979_v51, %v2764_v4 }
 0x2c3   :  { %v1061_v10 = vmul.f32 %v1722_v1, %v1060_v33  ;;  %1378 = vmatpush.msrb.mxu3 %v1203_v56  ;;  %v1023_v8 = vmul.f32 %v2639_v53, %v2346_v22  ;;  %v1050_v50 = vmul.f32 %v2652_v18, %v2357_v19  ;;  %v1025_v22 = vmul.f32 %v1021_v47, %v2764_v4 }
 0x2c4   :  { %v989_v61 = vadd.f32 %v988_v39, %v987_v21  ;;  %v995_v12 = vadd.f32 %v994_v20, %v993_v63  ;;  %v1019_v28 = vpop.permute.xlu0 %1018  ;;  %1259 = vmatmul.f32.vlgmr.msra.gmra.mxu1 %v1059_v34  ;;  %v984_v62 = vadd.f32 %v983_v55, %v982_v14 }
 0x2c5   :  { %1279 = vmatmul.f32.vlgmr.msra.gmra.mxu2 %v1061_v10  ;;  %v1027_v37 = vmul.f32 %v1019_v28, %v2672_v17  ;;  %v1033_v58 = vmul.f32 %v1019_v28, %v2693_v36  ;;  %v1022_v0 = vmul.f32 %v1019_v28, %v2663_v15  ;;  %v1044_v15 = vmul.f32 %v2642_v41, %v2357_v19 }
 0x2c6   :  { %v990_v5 = vadd.f32 %v989_v61, %v963_v27  ;;  %v996_v13 = vadd.f32 %v995_v12, %v969_v59  ;;  %v1008_v59 = vadd.f32 %v2879_v3, %v1006_v26 }
 0x2c7   :  { %v1029_v49 = vadd.f32 %v1028_v42, %v1027_v37  ;;  %v1035_v46 = vadd.f32 %v1034_v60, %v1033_v58  ;;  %v1024_v26 = vadd.f32 %v1023_v8, %v1022_v0  ;;  %v1488_v58 = vld [vmem:[%s2983_s4] ss:$0 sm:$0xff] }
 0x2c8   :  { %v1062_v52 = vadd.f32 %v2861_v29, %v996_v13 }
 0x2c9   :  { %v1000_v44 = vpop.permute.xlu1 %999  ;;  %v1031_v57 = vadd.f32 %v1030_v25, %v1029_v49  ;;  %v1037_v23 = vadd.f32 %v1036_v30, %v1035_v46  ;;  %v1026_v61 = vadd.f32 %v1025_v22, %v1024_v26 }
 0x2ca   :  { %v1004_v16 = vmul.f32 %v1000_v44, %v2764_v4  ;;  %v1009_v32 = vmul.f32 %v1000_v44, %v2767_v43  ;;  %v1015_v11 = vmul.f32 %v1000_v44, %v2812_v7  ;;  %v1063_v38 = vmul.f32 %v1722_v1, %v1062_v52 }
 0x2cc   :  { %v1005_v3 = vadd.f32 %v1004_v16, %v1003_v45  ;;  %v1010_v21 = vadd.f32 %v1009_v32, %v1008_v59  ;;  %v1016_v51 = vadd.f32 %v1015_v11, %v1014_v9  ;;  %1299 = vmatmul.f32.vlgmr.msra.gmra.mxu3 %v1063_v38  ;;  %v1040_v35 = vpop.permute.xlu0 %1039  ;;  %v1489_v9 = vld [vmem:[%s2984_s5] ss:$0 sm:$0xff]  ;;  %v1394_v16 = vstv %s2985_s6 }
 0x2cd   :  { %v1043_v33 = vmul.f32 %v1040_v35, %v2672_v17  ;;  %v1049_v24 = vmul.f32 %v1040_v35, %v2693_v36 }
 0x2ce   :  { %v1011_v63 = vadd.f32 %v1010_v21, %v984_v62  ;;  %v1017_v39 = vadd.f32 %v1016_v51, %v990_v5  ;;  %v1032_v20 = vadd.f32 %v1031_v57, %v1005_v3 }
 0x2cf   :  { %v1045_v53 = vadd.f32 %v1044_v15, %v1043_v33  ;;  %v1051_v17 = vadd.f32 %v1050_v50, %v1049_v24 }
 0x2d0   :  { %v1064_v34 = vadd.f32 %v2861_v29, %v1017_v39  ;;  %v1038_v10 = vadd.f32 %v1037_v23, %v1011_v63 }
 0x2d1   :  { %v1042_v40 = vpop.permute.xlu1 %1041 }
 0x2d2   :  { %v1046_v36 = vmul.f32 %v1042_v40, %v2767_v43  ;;  %v1052_v2 = vmul.f32 %v1042_v40, %v2812_v7  ;;  %v1065_v27 = vmul.f32 %v1722_v1, %v1064_v34  ;;  %v1066_v41 = vadd.f32 %v2861_v29, %v1038_v10 }
 0x2d4   :  { %v1047_v12 = vadd.f32 %v1046_v36, %v1045_v53  ;;  %v1053_v19 = vadd.f32 %v1052_v2, %v1051_v17  ;;  %1319 = vmatmul.f32.vlgmr.msrb.gmra.mxu0 %v1065_v27  ;;  %v1067_v18 = vmul.f32 %v1722_v1, %v1066_v41 }
 0x2d6   :  { %v1048_v28 = vadd.f32 %v1047_v12, %v1026_v61  ;;  %v1054_v54 = vadd.f32 %v1053_v19, %v1032_v20  ;;  %1339 = vmatmul.f32.vlgmr.msrb.gmra.mxu1 %v1067_v18 }
 0x2d8   :  { %v1068_v4 = vadd.f32 %v2861_v29, %v1054_v54  ;;  %v1070_v37 = vadd.f32 %v2861_v29, %v1048_v28 }
 0x2da   :  { %v1069_v43 = vmul.f32 %v1722_v1, %v1068_v4  ;;  %v1071_v7 = vmul.f32 %v1722_v1, %v1070_v37 }
 0x2dc   :  { %1359 = vmatmul.f32.vlgmr.msrb.gmra.mxu2 %v1069_v43  ;;  %1379 = vmatmul.f32.vlgmr.msrb.gmra.mxu3 %v1071_v7 }
 0x33f   :  { %v1240_v48 = vpop.f32.mrf.mxu0 }
 0x340   :  { %v1241_v56 = vadd.f32 %v1488_v58, %v1240_v48 }
 0x341   :  { %v1260_v47 = vpop.f32.mrf.mxu1 }
 0x342   :  { %v1261_v42 = vadd.f32 %v1260_v47, %v1241_v56 }
 0x348   :  { %v1280_v5 = vpop.f32.mrf.mxu2 }
 0x349   :  { %v1281_v14 = vadd.f32 %v1280_v5, %v1261_v42 }
 0x34f   :  { %v1300_v13 = vpop.f32.mrf.mxu3 }
 0x350   :  { %v1301_v6 = vadd.f32 %v1300_v13, %v1281_v14 }
 0x351   :  { %v1320_v55 = vpop.f32.mrf.mxu0 }
 0x352   :  { %v1321_v29 = vadd.f32 %v1320_v55, %v1301_v6 }
 0x353   :  { %v1340_v60 = vpop.f32.mrf.mxu1 }
 0x354   :  { %v1341_v45 = vadd.f32 %v1340_v60, %v1321_v29 }
 0x35f   :  { %v1360_v49 = vpop.f32.mrf.mxu2  ;;  %v1380_v52 = vpop.f32.mrf.mxu3 }
 0x360   :  { %v1361_v1 = vadd.f32 %v1360_v49, %v1341_v45 }
 0x362   :  { %v1381_v59 = vadd.f32 %v1380_v52, %v1361_v1 }
 0x364   :  { %v1383_v25 = vmax.f32 %v1381_v59, 0.0 }
 0x366   :  { %v1388_v46 = vmul.f32 %v1489_v9, %v1383_v25 }
 0x368   :  { %v1390_v44 = vsel %vm1389_vm1, %v1388_v46, 0.0 }
 0x369   :  { %1391 = vadd.xlane.f32.xlu2 %v1390_v44 }
 0x3dc   :  { %v1392_v32 = vpop.xlane.xlu2 %1391 }
 0x3dd   :  { %v1395_v11 = vadd.f32 %v1394_v16, %v1392_v32 }
 0x3df   :  { %v1397_v38 = vperm.slane %v1395_v11, %v1692_v31 }
 0x3e1   :  { %1400 = vst.msk [vmem:[#allocation9] sm:$0x1] %vm1399_vm2, %v1397_v38 }
 0x3e2   :  { %1411 = dma.vmem_to_hbm [thread:$0]  %s1407_s30, 16, %s1409_s14, [#allocation5]  }
 0x3e3   :  { %1542 = dma.done.wait [#allocation5], 16  }
 0x3e4   :  { %1543 = vsyncadd [#allocation5], 4294967280 }
 0x3e5   :  { %1416 = vsyncpa [#allocation5], 1 }
 0x3e6   :  { %1417 = vsyncpa [#allocation6], 1 }
 0x3e7   :  { %1418 = vsyncpa [#allocation8], 1 }

</bundles_post_ra>
